<compile_context>
chip_gen: v7x
topology: tpu7x:2x2x1
jax: 0.10.0
libtpu: 0.0.40
codegen_flags: <defaults>
</compile_context>

<pallas_src>
import functools

import jax
import jax.numpy as jnp
from jax import lax
from jax.experimental import pallas as pl
from jax.experimental.pallas import tpu as pltpu


def _spatial_attention_kernel(x_ref, w_ref, b_ref, o_ref, *, H, W, K, dilation):
    # x_ref : VMEM (NB, C, H*W)   flattened samples (lane-dense)
    # w_ref : SMEM (2*K*K,)       conv weights, order (in_c, kh, kw)
    # b_ref : SMEM (1,)           conv bias
    # o_ref : VMEM (NB, 1, H*W)   stride-1 attention map (pre-subsample)
    HW = H * W
    xv = x_ref[...]                                   # already f32; no extra cast

    # Channel descriptors: reduce over the sublane (C) axis, H*W lanes stay dense.
    avg = jnp.mean(xv, axis=1, keepdims=True)         # (NB, 1, HW)
    mx = jnp.max(xv, axis=1, keepdims=True)           # (NB, 1, HW)

    # Flat pixel index -> border validity masks (hoisted; no per-tap iota).
    pos = lax.broadcasted_iota(jnp.int32, (1, 1, HW), 2)
    col = pos % W                                     # W=16 -> lowers to an AND
    half = (K - 1) // 2

    # Per-column-offset validity; None means "trivially all-true" (skip the op).
    col_ok = []
    for kw in range(K):
        dw = (kw - half) * dilation
        col_ok.append(None if dw == 0 else (col >= -dw) & (col < W - dw))

    # Center tap needs neither a roll nor a mask: fold it into the acc init.
    c = half * K + half
    acc = b_ref[0] + avg * w_ref[c] + mx * w_ref[K * K + c]   # (NB, 1, HW) f32

    for kh in range(K):
        dh = (kh - half) * dilation
        # row >= -dh  <=>  pos >= -dh*W ;  row < H - dh  <=>  pos < (H - dh)*W
        row_ok = None if dh == 0 else (pos >= (-dh) * W) & (pos < (H - dh) * W)
        for kw in range(K):
            dw = (kw - half) * dilation
            if dh == 0 and dw == 0:
                continue                               # center tap already done
            off = dh * W + dw                          # flat source offset of tap
            shift = (-off) % HW                        # jnp.roll-style shift
            # XLU lane rotation; co-issues with the VPU multiply/adds below.
            ra = pltpu.roll(avg, shift, axis=2)
            rm = pltpu.roll(mx, shift, axis=2)
            w_avg = w_ref[kh * K + kw]                 # channel 0 (avg plane)
            w_max = w_ref[K * K + kh * K + kw]         # channel 1 (max plane)
            contrib = ra * w_avg + rm * w_max          # scalar splats from SMEM
            if row_ok is None:
                mask = col_ok[kw]
            elif col_ok[kw] is None:
                mask = row_ok
            else:
                mask = row_ok & col_ok[kw]
            acc = acc + jnp.where(mask, contrib, 0.0)

    o_ref[...] = jax.nn.sigmoid(acc).astype(o_ref.dtype)


def spatial_attention_pallas(x, weight, bias, *, stride=1, dilation=1):
    """x: (N, C, H, W) f32. weight: (1, 2, K, K). bias: (1,). -> (N, 1, Ho, Wo)."""
    N, C, H, W = x.shape
    K = weight.shape[-1]                               # 7
    assert K % 2 == 1, "module uses an odd kernel (K=7)"
    HW = H * W

    w_flat = weight.reshape(-1).astype(jnp.float32)    # (2*K*K,)
    b_flat = jnp.asarray(bias, jnp.float32).reshape(-1)  # (1,)
    x_flat = x.reshape(N, C, HW)                       # lane-dense input layout

    # Batch as many samples per grid step as comfortably fit in VMEM.
    bytes_per_sample = (C + 4) * HW * 4
    nb = max(1, min(N, (4 << 20) // max(bytes_per_sample, 1)))
    while N % nb:
        nb -= 1

    kernel = functools.partial(_spatial_attention_kernel,
                               H=H, W=W, K=K, dilation=dilation)

    y_flat = pl.pallas_call(
        kernel,
        out_shape=jax.ShapeDtypeStruct((N, 1, HW), x.dtype),
        grid=(N // nb,),
        in_specs=[
            pl.BlockSpec((nb, C, HW), lambda n: (n, 0, 0)),
            pl.BlockSpec(memory_space=pltpu.MemorySpace.SMEM),
            pl.BlockSpec(memory_space=pltpu.MemorySpace.SMEM),
        ],
        out_specs=pl.BlockSpec((nb, 1, HW), lambda n: (n, 0, 0)),
        compiler_params=pltpu.CompilerParams(
            dimension_semantics=("parallel",),
            vmem_limit_bytes=32 * 1024 * 1024),
    )(x_flat, w_flat, b_flat)

    y = y_flat.reshape(N, 1, H, W)
    if stride > 1:
        # Strided conv output == stride-1 output subsampled; sigmoid is
        # elementwise, so subsampling after the kernel is exact.
        y = y[:, :, ::stride, ::stride]
    return y


def spatial_attention_ref(x, weight, bias, *, stride=1, dilation=1):
    """Pure-JAX reference mirroring the PyTorch forward."""
    K = weight.shape[-1]
    pad = dilation * (K - 1) // 2
    avg = jnp.mean(x, axis=1, keepdims=True)
    mx = jnp.max(x, axis=1, keepdims=True)
    cat = jnp.concatenate([avg, mx], axis=1)
    y = jax.lax.conv_general_dilated(
        cat, weight, (stride, stride), [(pad, pad), (pad, pad)],
        rhs_dilation=(dilation, dilation),
        dimension_numbers=("NCHW", "OIHW", "NCHW"))
    y = y + bias.reshape(1, -1, 1, 1)
    return jax.nn.sigmoid(y)


if __name__ == "__main__":
    # module config: _spatial_attention_module_(in_channels=4, stride=1, dilation=1, bias=True)
    N, C, H, W = 2, 4, 16, 16
    K = 7
    stride, dilation = 1, 1

    key = jax.random.PRNGKey(0)
    kx, kw = jax.random.split(key)

    x = jax.random.normal(kx, (N, C, H, W), dtype=jnp.float32)

    # xavier_uniform_ on Conv2d(2, 1, 7): fan_in = 2*7*7, fan_out = 1*7*7
    fan_in, fan_out = 2 * K * K, 1 * K * K
    bound = (6.0 / (fan_in + fan_out)) ** 0.5
    weight = jax.random.uniform(kw, (1, 2, K, K), minval=-bound, maxval=bound,
                                dtype=jnp.float32)
    bias = jnp.zeros((1,), dtype=jnp.float32)          # bias.data.zero_()

    out = spatial_attention_pallas(x, weight, bias, stride=stride,
                                   dilation=dilation)
    out = jax.block_until_ready(out)

    ref = spatial_attention_ref(x, weight, bias, stride=stride,
                                dilation=dilation)
    assert out.shape == ref.shape, (out.shape, ref.shape)
    assert jnp.allclose(out, ref, atol=1e-5, rtol=1e-5), \
        float(jnp.max(jnp.abs(out - ref)))

    print("KERNEL_OK")
</pallas_src>

<mosaic_0001>
module attributes {stable_mosaic.version = 11 : i64} {
  func.func @_spatial_attention_kernel(%arg0: i32, %arg1: memref<2x4x256xf32, #tpu.memory_space<vmem>>, %arg2: memref<98xf32, #tpu.memory_space<smem>>, %arg3: memref<1xf32, #tpu.memory_space<smem>>, %arg4: memref<2x1x256xf32, #tpu.memory_space<vmem>>) attributes {dimension_semantics = [#tpu.dimension_semantics<parallel>], iteration_bounds = array<i64: 1>, scalar_prefetch = 0 : i64, scratch_operands = 0 : i64, tpu.core_type = #tpu.core_type<tc>, window_params = [{transform_indices = @transform_0, window_bounds = array<i64: 2, 4, 256>}, {transform_indices = @transform_1, window_bounds = array<i64: 98>}, {transform_indices = @transform_2, window_bounds = array<i64: 1>}, {transform_indices = @transform_3, window_bounds = array<i64: 2, 1, 256>}]} {
    %c0 = arith.constant 0 : index
    %c0_0 = arith.constant 0 : index
    %c0_1 = arith.constant 0 : index
    %0 = vector.load %arg1[%c0, %c0_0, %c0_1] : memref<2x4x256xf32, #tpu.memory_space<vmem>>, vector<2x4x256xf32>
    %cst = arith.constant dense<0.000000e+00> : vector<2x256xf32>
    %1 = vector.multi_reduction <add>, %0, %cst [1] : vector<2x4x256xf32> to vector<2x256xf32>
    %2 = vector.shape_cast %1 : vector<2x256xf32> to vector<2x1x256xf32>
    %cst_2 = arith.constant 4.000000e+00 : f32
    %3 = vector.broadcast %cst_2 : f32 to vector<2x1x256xf32>
    %4 = arith.divf %2, %3 : vector<2x1x256xf32>
    %cst_3 = arith.constant dense<0xFF800000> : vector<2x256xf32>
    %5 = vector.multi_reduction <maximumf>, %0, %cst_3 [1] : vector<2x4x256xf32> to vector<2x256xf32>
    %6 = vector.shape_cast %5 : vector<2x256xf32> to vector<2x1x256xf32>
    %7 = tpu.iota {dimensions = array<i32: 2>} : vector<1x1x256xi32>
    %c16_i32 = arith.constant 16 : i32
    %c0_i32 = arith.constant 0 : i32
    %8 = arith.cmpi eq, %c16_i32, %c0_i32 : i32
    %c1_i32 = arith.constant 1 : i32
    %9 = arith.select %8, %c1_i32, %c16_i32 : i32
    %10 = vector.broadcast %9 : i32 to vector<1x1x256xi32>
    %11 = arith.remsi %7, %10 : vector<1x1x256xi32>
    %c0_i32_4 = arith.constant 0 : i32
    %12 = vector.broadcast %c0_i32_4 : i32 to vector<1x1x256xi32>
    %13 = arith.cmpi ne, %11, %12 : vector<1x1x256xi32>
    %c0_i32_5 = arith.constant 0 : i32
    %14 = vector.broadcast %c0_i32_5 : i32 to vector<1x1x256xi32>
    %15 = arith.cmpi slt, %11, %14 : vector<1x1x256xi32>
    %c0_i32_6 = arith.constant 0 : i32
    %16 = arith.cmpi slt, %9, %c0_i32_6 : i32
    %17 = vector.broadcast %16 : i1 to vector<1x1x256xi1>
    %18 = vector.broadcast %17 : vector<1x1x256xi1> to vector<1x1x256xi1>
    %19 = arith.xori %15, %18 : vector<1x1x256xi1>
    %20 = arith.andi %19, %13 : vector<1x1x256xi1>
    %21 = vector.broadcast %9 : i32 to vector<1x1x256xi32>
    %22 = arith.addi %11, %21 : vector<1x1x256xi32>
    %23 = arith.select %20, %22, %11 : vector<1x1x256xi1>, vector<1x1x256xi32>
    %c3_i32 = arith.constant 3 : i32
    %24 = vector.broadcast %c3_i32 : i32 to vector<1x1x256xi32>
    %25 = arith.cmpi sge, %23, %24 : vector<1x1x256xi32>
    %c19_i32 = arith.constant 19 : i32
    %26 = vector.broadcast %c19_i32 : i32 to vector<1x1x256xi32>
    %27 = arith.cmpi slt, %23, %26 : vector<1x1x256xi32>
    %28 = arith.andi %25, %27 : vector<1x1x256xi1>
    %c2_i32 = arith.constant 2 : i32
    %29 = vector.broadcast %c2_i32 : i32 to vector<1x1x256xi32>
    %30 = arith.cmpi sge, %23, %29 : vector<1x1x256xi32>
    %c18_i32 = arith.constant 18 : i32
    %31 = vector.broadcast %c18_i32 : i32 to vector<1x1x256xi32>
    %32 = arith.cmpi slt, %23, %31 : vector<1x1x256xi32>
    %33 = arith.andi %30, %32 : vector<1x1x256xi1>
    %c1_i32_7 = arith.constant 1 : i32
    %34 = vector.broadcast %c1_i32_7 : i32 to vector<1x1x256xi32>
    %35 = arith.cmpi sge, %23, %34 : vector<1x1x256xi32>
    %c17_i32 = arith.constant 17 : i32
    %36 = vector.broadcast %c17_i32 : i32 to vector<1x1x256xi32>
    %37 = arith.cmpi slt, %23, %36 : vector<1x1x256xi32>
    %38 = arith.andi %35, %37 : vector<1x1x256xi1>
    %c-1_i32 = arith.constant -1 : i32
    %39 = vector.broadcast %c-1_i32 : i32 to vector<1x1x256xi32>
    %40 = arith.cmpi sge, %23, %39 : vector<1x1x256xi32>
    %c15_i32 = arith.constant 15 : i32
    %41 = vector.broadcast %c15_i32 : i32 to vector<1x1x256xi32>
    %42 = arith.cmpi slt, %23, %41 : vector<1x1x256xi32>
    %43 = arith.andi %40, %42 : vector<1x1x256xi1>
    %c-2_i32 = arith.constant -2 : i32
    %44 = vector.broadcast %c-2_i32 : i32 to vector<1x1x256xi32>
    %45 = arith.cmpi sge, %23, %44 : vector<1x1x256xi32>
    %c14_i32 = arith.constant 14 : i32
    %46 = vector.broadcast %c14_i32 : i32 to vector<1x1x256xi32>
    %47 = arith.cmpi slt, %23, %46 : vector<1x1x256xi32>
    %48 = arith.andi %45, %47 : vector<1x1x256xi1>
    %c-3_i32 = arith.constant -3 : i32
    %49 = vector.broadcast %c-3_i32 : i32 to vector<1x1x256xi32>
    %50 = arith.cmpi sge, %23, %49 : vector<1x1x256xi32>
    %c13_i32 = arith.constant 13 : i32
    %51 = vector.broadcast %c13_i32 : i32 to vector<1x1x256xi32>
    %52 = arith.cmpi slt, %23, %51 : vector<1x1x256xi32>
    %53 = arith.andi %50, %52 : vector<1x1x256xi1>
    %c0_8 = arith.constant 0 : index
    %54 = memref.load %arg3[%c0_8] : memref<1xf32, #tpu.memory_space<smem>>
    %c24 = arith.constant 24 : index
    %55 = memref.load %arg2[%c24] : memref<98xf32, #tpu.memory_space<smem>>
    %56 = vector.broadcast %55 : f32 to vector<2x1x256xf32>
    %57 = arith.mulf %4, %56 : vector<2x1x256xf32>
    %58 = vector.broadcast %54 : f32 to vector<2x1x256xf32>
    %59 = arith.addf %58, %57 : vector<2x1x256xf32>
    %c73 = arith.constant 73 : index
    %60 = memref.load %arg2[%c73] : memref<98xf32, #tpu.memory_space<smem>>
    %61 = vector.broadcast %60 : f32 to vector<2x1x256xf32>
    %62 = arith.mulf %6, %61 : vector<2x1x256xf32>
    %63 = arith.addf %59, %62 : vector<2x1x256xf32>
    %c48_i32 = arith.constant 48 : i32
    %64 = vector.broadcast %c48_i32 : i32 to vector<1x1x256xi32>
    %65 = arith.cmpi sge, %7, %64 : vector<1x1x256xi32>
    %c304_i32 = arith.constant 304 : i32
    %66 = vector.broadcast %c304_i32 : i32 to vector<1x1x256xi32>
    %67 = arith.cmpi slt, %7, %66 : vector<1x1x256xi32>
    %68 = arith.andi %65, %67 : vector<1x1x256xi1>
    %c51_i32 = arith.constant 51 : i32
    %69 = tpu.dynamic_rotate %4 by %c51_i32 dim 2 : vector<2x1x256xf32>, i32 -> vector<2x1x256xf32>
    %c51_i32_9 = arith.constant 51 : i32
    %70 = tpu.dynamic_rotate %6 by %c51_i32_9 dim 2 : vector<2x1x256xf32>, i32 -> vector<2x1x256xf32>
    %c0_10 = arith.constant 0 : index
    %71 = memref.load %arg2[%c0_10] : memref<98xf32, #tpu.memory_space<smem>>
    %c49 = arith.constant 49 : index
    %72 = memref.load %arg2[%c49] : memref<98xf32, #tpu.memory_space<smem>>
    %73 = vector.broadcast %71 : f32 to vector<2x1x256xf32>
    %74 = arith.mulf %69, %73 : vector<2x1x256xf32>
    %75 = vector.broadcast %72 : f32 to vector<2x1x256xf32>
    %76 = arith.mulf %70, %75 : vector<2x1x256xf32>
    %77 = arith.addf %74, %76 : vector<2x1x256xf32>
    %78 = arith.andi %68, %28 : vector<1x1x256xi1>
    %cst_11 = arith.constant 0.000000e+00 : f32
    %79 = vector.shape_cast %78 : vector<1x1x256xi1> to vector<1x1x256xi1>
    %80 = vector.broadcast %79 : vector<1x1x256xi1> to vector<2x1x256xi1>
    %81 = vector.broadcast %cst_11 : f32 to vector<2x1x256xf32>
    %82 = arith.select %80, %77, %81 : vector<2x1x256xi1>, vector<2x1x256xf32>
    %83 = arith.addf %63, %82 : vector<2x1x256xf32>
    %c50_i32 = arith.constant 50 : i32
    %84 = tpu.dynamic_rotate %4 by %c50_i32 dim 2 : vector<2x1x256xf32>, i32 -> vector<2x1x256xf32>
    %c50_i32_12 = arith.constant 50 : i32
    %85 = tpu.dynamic_rotate %6 by %c50_i32_12 dim 2 : vector<2x1x256xf32>, i32 -> vector<2x1x256xf32>
    %c1 = arith.constant 1 : index
    %86 = memref.load %arg2[%c1] : memref<98xf32, #tpu.memory_space<smem>>
    %c50 = arith.constant 50 : index
    %87 = memref.load %arg2[%c50] : memref<98xf32, #tpu.memory_space<smem>>
    %88 = vector.broadcast %86 : f32 to vector<2x1x256xf32>
    %89 = arith.mulf %84, %88 : vector<2x1x256xf32>
    %90 = vector.broadcast %87 : f32 to vector<2x1x256xf32>
    %91 = arith.mulf %85, %90 : vector<2x1x256xf32>
    %92 = arith.addf %89, %91 : vector<2x1x256xf32>
    %93 = arith.andi %68, %33 : vector<1x1x256xi1>
    %cst_13 = arith.constant 0.000000e+00 : f32
    %94 = vector.shape_cast %93 : vector<1x1x256xi1> to vector<1x1x256xi1>
    %95 = vector.broadcast %94 : vector<1x1x256xi1> to vector<2x1x256xi1>
    %96 = vector.broadcast %cst_13 : f32 to vector<2x1x256xf32>
    %97 = arith.select %95, %92, %96 : vector<2x1x256xi1>, vector<2x1x256xf32>
    %98 = arith.addf %83, %97 : vector<2x1x256xf32>
    %c49_i32 = arith.constant 49 : i32
    %99 = tpu.dynamic_rotate %4 by %c49_i32 dim 2 : vector<2x1x256xf32>, i32 -> vector<2x1x256xf32>
    %c49_i32_14 = arith.constant 49 : i32
    %100 = tpu.dynamic_rotate %6 by %c49_i32_14 dim 2 : vector<2x1x256xf32>, i32 -> vector<2x1x256xf32>
    %c2 = arith.constant 2 : index
    %101 = memref.load %arg2[%c2] : memref<98xf32, #tpu.memory_space<smem>>
    %c51 = arith.constant 51 : index
    %102 = memref.load %arg2[%c51] : memref<98xf32, #tpu.memory_space<smem>>
    %103 = vector.broadcast %101 : f32 to vector<2x1x256xf32>
    %104 = arith.mulf %99, %103 : vector<2x1x256xf32>
    %105 = vector.broadcast %102 : f32 to vector<2x1x256xf32>
    %106 = arith.mulf %100, %105 : vector<2x1x256xf32>
    %107 = arith.addf %104, %106 : vector<2x1x256xf32>
    %108 = arith.andi %68, %38 : vector<1x1x256xi1>
    %cst_15 = arith.constant 0.000000e+00 : f32
    %109 = vector.shape_cast %108 : vector<1x1x256xi1> to vector<1x1x256xi1>
    %110 = vector.broadcast %109 : vector<1x1x256xi1> to vector<2x1x256xi1>
    %111 = vector.broadcast %cst_15 : f32 to vector<2x1x256xf32>
    %112 = arith.select %110, %107, %111 : vector<2x1x256xi1>, vector<2x1x256xf32>
    %113 = arith.addf %98, %112 : vector<2x1x256xf32>
    %c48_i32_16 = arith.constant 48 : i32
    %114 = tpu.dynamic_rotate %4 by %c48_i32_16 dim 2 : vector<2x1x256xf32>, i32 -> vector<2x1x256xf32>
    %c48_i32_17 = arith.constant 48 : i32
    %115 = tpu.dynamic_rotate %6 by %c48_i32_17 dim 2 : vector<2x1x256xf32>, i32 -> vector<2x1x256xf32>
    %c3 = arith.constant 3 : index
    %116 = memref.load %arg2[%c3] : memref<98xf32, #tpu.memory_space<smem>>
    %c52 = arith.constant 52 : index
    %117 = memref.load %arg2[%c52] : memref<98xf32, #tpu.memory_space<smem>>
    %118 = vector.broadcast %116 : f32 to vector<2x1x256xf32>
    %119 = arith.mulf %114, %118 : vector<2x1x256xf32>
    %120 = vector.broadcast %117 : f32 to vector<2x1x256xf32>
    %121 = arith.mulf %115, %120 : vector<2x1x256xf32>
    %122 = arith.addf %119, %121 : vector<2x1x256xf32>
    %cst_18 = arith.constant 0.000000e+00 : f32
    %123 = vector.shape_cast %68 : vector<1x1x256xi1> to vector<1x1x256xi1>
    %124 = vector.broadcast %123 : vector<1x1x256xi1> to vector<2x1x256xi1>
    %125 = vector.broadcast %cst_18 : f32 to vector<2x1x256xf32>
    %126 = arith.select %124, %122, %125 : vector<2x1x256xi1>, vector<2x1x256xf32>
    %127 = arith.addf %113, %126 : vector<2x1x256xf32>
    %c47_i32 = arith.constant 47 : i32
    %128 = tpu.dynamic_rotate %4 by %c47_i32 dim 2 : vector<2x1x256xf32>, i32 -> vector<2x1x256xf32>
    %c47_i32_19 = arith.constant 47 : i32
    %129 = tpu.dynamic_rotate %6 by %c47_i32_19 dim 2 : vector<2x1x256xf32>, i32 -> vector<2x1x256xf32>
    %c4 = arith.constant 4 : index
    %130 = memref.load %arg2[%c4] : memref<98xf32, #tpu.memory_space<smem>>
    %c53 = arith.constant 53 : index
    %131 = memref.load %arg2[%c53] : memref<98xf32, #tpu.memory_space<smem>>
    %132 = vector.broadcast %130 : f32 to vector<2x1x256xf32>
    %133 = arith.mulf %128, %132 : vector<2x1x256xf32>
    %134 = vector.broadcast %131 : f32 to vector<2x1x256xf32>
    %135 = arith.mulf %129, %134 : vector<2x1x256xf32>
    %136 = arith.addf %133, %135 : vector<2x1x256xf32>
    %137 = arith.andi %68, %43 : vector<1x1x256xi1>
    %cst_20 = arith.constant 0.000000e+00 : f32
    %138 = vector.shape_cast %137 : vector<1x1x256xi1> to vector<1x1x256xi1>
    %139 = vector.broadcast %138 : vector<1x1x256xi1> to vector<2x1x256xi1>
    %140 = vector.broadcast %cst_20 : f32 to vector<2x1x256xf32>
    %141 = arith.select %139, %136, %140 : vector<2x1x256xi1>, vector<2x1x256xf32>
    %142 = arith.addf %127, %141 : vector<2x1x256xf32>
    %c46_i32 = arith.constant 46 : i32
    %143 = tpu.dynamic_rotate %4 by %c46_i32 dim 2 : vector<2x1x256xf32>, i32 -> vector<2x1x256xf32>
    %c46_i32_21 = arith.constant 46 : i32
    %144 = tpu.dynamic_rotate %6 by %c46_i32_21 dim 2 : vector<2x1x256xf32>, i32 -> vector<2x1x256xf32>
    %c5 = arith.constant 5 : index
    %145 = memref.load %arg2[%c5] : memref<98xf32, #tpu.memory_space<smem>>
    %c54 = arith.constant 54 : index
    %146 = memref.load %arg2[%c54] : memref<98xf32, #tpu.memory_space<smem>>
    %147 = vector.broadcast %145 : f32 to vector<2x1x256xf32>
    %148 = arith.mulf %143, %147 : vector<2x1x256xf32>
    %149 = vector.broadcast %146 : f32 to vector<2x1x256xf32>
    %150 = arith.mulf %144, %149 : vector<2x1x256xf32>
    %151 = arith.addf %148, %150 : vector<2x1x256xf32>
    %152 = arith.andi %68, %48 : vector<1x1x256xi1>
    %cst_22 = arith.constant 0.000000e+00 : f32
    %153 = vector.shape_cast %152 : vector<1x1x256xi1> to vector<1x1x256xi1>
    %154 = vector.broadcast %153 : vector<1x1x256xi1> to vector<2x1x256xi1>
    %155 = vector.broadcast %cst_22 : f32 to vector<2x1x256xf32>
    %156 = arith.select %154, %151, %155 : vector<2x1x256xi1>, vector<2x1x256xf32>
    %157 = arith.addf %142, %156 : vector<2x1x256xf32>
    %c45_i32 = arith.constant 45 : i32
    %158 = tpu.dynamic_rotate %4 by %c45_i32 dim 2 : vector<2x1x256xf32>, i32 -> vector<2x1x256xf32>
    %c45_i32_23 = arith.constant 45 : i32
    %159 = tpu.dynamic_rotate %6 by %c45_i32_23 dim 2 : vector<2x1x256xf32>, i32 -> vector<2x1x256xf32>
    %c6 = arith.constant 6 : index
    %160 = memref.load %arg2[%c6] : memref<98xf32, #tpu.memory_space<smem>>
    %c55 = arith.constant 55 : index
    %161 = memref.load %arg2[%c55] : memref<98xf32, #tpu.memory_space<smem>>
    %162 = vector.broadcast %160 : f32 to vector<2x1x256xf32>
    %163 = arith.mulf %158, %162 : vector<2x1x256xf32>
    %164 = vector.broadcast %161 : f32 to vector<2x1x256xf32>
    %165 = arith.mulf %159, %164 : vector<2x1x256xf32>
    %166 = arith.addf %163, %165 : vector<2x1x256xf32>
    %167 = arith.andi %68, %53 : vector<1x1x256xi1>
    %cst_24 = arith.constant 0.000000e+00 : f32
    %168 = vector.shape_cast %167 : vector<1x1x256xi1> to vector<1x1x256xi1>
    %169 = vector.broadcast %168 : vector<1x1x256xi1> to vector<2x1x256xi1>
    %170 = vector.broadcast %cst_24 : f32 to vector<2x1x256xf32>
    %171 = arith.select %169, %166, %170 : vector<2x1x256xi1>, vector<2x1x256xf32>
    %172 = arith.addf %157, %171 : vector<2x1x256xf32>
    %c32_i32 = arith.constant 32 : i32
    %173 = vector.broadcast %c32_i32 : i32 to vector<1x1x256xi32>
    %174 = arith.cmpi sge, %7, %173 : vector<1x1x256xi32>
    %c288_i32 = arith.constant 288 : i32
    %175 = vector.broadcast %c288_i32 : i32 to vector<1x1x256xi32>
    %176 = arith.cmpi slt, %7, %175 : vector<1x1x256xi32>
    %177 = arith.andi %174, %176 : vector<1x1x256xi1>
    %c35_i32 = arith.constant 35 : i32
    %178 = tpu.dynamic_rotate %4 by %c35_i32 dim 2 : vector<2x1x256xf32>, i32 -> vector<2x1x256xf32>
    %c35_i32_25 = arith.constant 35 : i32
    %179 = tpu.dynamic_rotate %6 by %c35_i32_25 dim 2 : vector<2x1x256xf32>, i32 -> vector<2x1x256xf32>
    %c7 = arith.constant 7 : index
    %180 = memref.load %arg2[%c7] : memref<98xf32, #tpu.memory_space<smem>>
    %c56 = arith.constant 56 : index
    %181 = memref.load %arg2[%c56] : memref<98xf32, #tpu.memory_space<smem>>
    %182 = vector.broadcast %180 : f32 to vector<2x1x256xf32>
    %183 = arith.mulf %178, %182 : vector<2x1x256xf32>
    %184 = vector.broadcast %181 : f32 to vector<2x1x256xf32>
    %185 = arith.mulf %179, %184 : vector<2x1x256xf32>
    %186 = arith.addf %183, %185 : vector<2x1x256xf32>
    %187 = arith.andi %177, %28 : vector<1x1x256xi1>
    %cst_26 = arith.constant 0.000000e+00 : f32
    %188 = vector.shape_cast %187 : vector<1x1x256xi1> to vector<1x1x256xi1>
    %189 = vector.broadcast %188 : vector<1x1x256xi1> to vector<2x1x256xi1>
    %190 = vector.broadcast %cst_26 : f32 to vector<2x1x256xf32>
    %191 = arith.select %189, %186, %190 : vector<2x1x256xi1>, vector<2x1x256xf32>
    %192 = arith.addf %172, %191 : vector<2x1x256xf32>
    %c34_i32 = arith.constant 34 : i32
    %193 = tpu.dynamic_rotate %4 by %c34_i32 dim 2 : vector<2x1x256xf32>, i32 -> vector<2x1x256xf32>
    %c34_i32_27 = arith.constant 34 : i32
    %194 = tpu.dynamic_rotate %6 by %c34_i32_27 dim 2 : vector<2x1x256xf32>, i32 -> vector<2x1x256xf32>
    %c8 = arith.constant 8 : index
    %195 = memref.load %arg2[%c8] : memref<98xf32, #tpu.memory_space<smem>>
    %c57 = arith.constant 57 : index
    %196 = memref.load %arg2[%c57] : memref<98xf32, #tpu.memory_space<smem>>
    %197 = vector.broadcast %195 : f32 to vector<2x1x256xf32>
    %198 = arith.mulf %193, %197 : vector<2x1x256xf32>
    %199 = vector.broadcast %196 : f32 to vector<2x1x256xf32>
    %200 = arith.mulf %194, %199 : vector<2x1x256xf32>
    %201 = arith.addf %198, %200 : vector<2x1x256xf32>
    %202 = arith.andi %177, %33 : vector<1x1x256xi1>
    %cst_28 = arith.constant 0.000000e+00 : f32
    %203 = vector.shape_cast %202 : vector<1x1x256xi1> to vector<1x1x256xi1>
    %204 = vector.broadcast %203 : vector<1x1x256xi1> to vector<2x1x256xi1>
    %205 = vector.broadcast %cst_28 : f32 to vector<2x1x256xf32>
    %206 = arith.select %204, %201, %205 : vector<2x1x256xi1>, vector<2x1x256xf32>
    %207 = arith.addf %192, %206 : vector<2x1x256xf32>
    %c33_i32 = arith.constant 33 : i32
    %208 = tpu.dynamic_rotate %4 by %c33_i32 dim 2 : vector<2x1x256xf32>, i32 -> vector<2x1x256xf32>
    %c33_i32_29 = arith.constant 33 : i32
    %209 = tpu.dynamic_rotate %6 by %c33_i32_29 dim 2 : vector<2x1x256xf32>, i32 -> vector<2x1x256xf32>
    %c9 = arith.constant 9 : index
    %210 = memref.load %arg2[%c9] : memref<98xf32, #tpu.memory_space<smem>>
    %c58 = arith.constant 58 : index
    %211 = memref.load %arg2[%c58] : memref<98xf32, #tpu.memory_space<smem>>
    %212 = vector.broadcast %210 : f32 to vector<2x1x256xf32>
    %213 = arith.mulf %208, %212 : vector<2x1x256xf32>
    %214 = vector.broadcast %211 : f32 to vector<2x1x256xf32>
    %215 = arith.mulf %209, %214 : vector<2x1x256xf32>
    %216 = arith.addf %213, %215 : vector<2x1x256xf32>
    %217 = arith.andi %177, %38 : vector<1x1x256xi1>
    %cst_30 = arith.constant 0.000000e+00 : f32
    %218 = vector.shape_cast %217 : vector<1x1x256xi1> to vector<1x1x256xi1>
    %219 = vector.broadcast %218 : vector<1x1x256xi1> to vector<2x1x256xi1>
    %220 = vector.broadcast %cst_30 : f32 to vector<2x1x256xf32>
    %221 = arith.select %219, %216, %220 : vector<2x1x256xi1>, vector<2x1x256xf32>
    %222 = arith.addf %207, %221 : vector<2x1x256xf32>
    %c32_i32_31 = arith.constant 32 : i32
    %223 = tpu.dynamic_rotate %4 by %c32_i32_31 dim 2 : vector<2x1x256xf32>, i32 -> vector<2x1x256xf32>
    %c32_i32_32 = arith.constant 32 : i32
    %224 = tpu.dynamic_rotate %6 by %c32_i32_32 dim 2 : vector<2x1x256xf32>, i32 -> vector<2x1x256xf32>
    %c10 = arith.constant 10 : index
    %225 = memref.load %arg2[%c10] : memref<98xf32, #tpu.memory_space<smem>>
    %c59 = arith.constant 59 : index
    %226 = memref.load %arg2[%c59] : memref<98xf32, #tpu.memory_space<smem>>
    %227 = vector.broadcast %225 : f32 to vector<2x1x256xf32>
    %228 = arith.mulf %223, %227 : vector<2x1x256xf32>
    %229 = vector.broadcast %226 : f32 to vector<2x1x256xf32>
    %230 = arith.mulf %224, %229 : vector<2x1x256xf32>
    %231 = arith.addf %228, %230 : vector<2x1x256xf32>
    %cst_33 = arith.constant 0.000000e+00 : f32
    %232 = vector.shape_cast %177 : vector<1x1x256xi1> to vector<1x1x256xi1>
    %233 = vector.broadcast %232 : vector<1x1x256xi1> to vector<2x1x256xi1>
    %234 = vector.broadcast %cst_33 : f32 to vector<2x1x256xf32>
    %235 = arith.select %233, %231, %234 : vector<2x1x256xi1>, vector<2x1x256xf32>
    %236 = arith.addf %222, %235 : vector<2x1x256xf32>
    %c31_i32 = arith.constant 31 : i32
    %237 = tpu.dynamic_rotate %4 by %c31_i32 dim 2 : vector<2x1x256xf32>, i32 -> vector<2x1x256xf32>
    %c31_i32_34 = arith.constant 31 : i32
    %238 = tpu.dynamic_rotate %6 by %c31_i32_34 dim 2 : vector<2x1x256xf32>, i32 -> vector<2x1x256xf32>
    %c11 = arith.constant 11 : index
    %239 = memref.load %arg2[%c11] : memref<98xf32, #tpu.memory_space<smem>>
    %c60 = arith.constant 60 : index
    %240 = memref.load %arg2[%c60] : memref<98xf32, #tpu.memory_space<smem>>
    %241 = vector.broadcast %239 : f32 to vector<2x1x256xf32>
    %242 = arith.mulf %237, %241 : vector<2x1x256xf32>
    %243 = vector.broadcast %240 : f32 to vector<2x1x256xf32>
    %244 = arith.mulf %238, %243 : vector<2x1x256xf32>
    %245 = arith.addf %242, %244 : vector<2x1x256xf32>
    %246 = arith.andi %177, %43 : vector<1x1x256xi1>
    %cst_35 = arith.constant 0.000000e+00 : f32
    %247 = vector.shape_cast %246 : vector<1x1x256xi1> to vector<1x1x256xi1>
    %248 = vector.broadcast %247 : vector<1x1x256xi1> to vector<2x1x256xi1>
    %249 = vector.broadcast %cst_35 : f32 to vector<2x1x256xf32>
    %250 = arith.select %248, %245, %249 : vector<2x1x256xi1>, vector<2x1x256xf32>
    %251 = arith.addf %236, %250 : vector<2x1x256xf32>
    %c30_i32 = arith.constant 30 : i32
    %252 = tpu.dynamic_rotate %4 by %c30_i32 dim 2 : vector<2x1x256xf32>, i32 -> vector<2x1x256xf32>
    %c30_i32_36 = arith.constant 30 : i32
    %253 = tpu.dynamic_rotate %6 by %c30_i32_36 dim 2 : vector<2x1x256xf32>, i32 -> vector<2x1x256xf32>
    %c12 = arith.constant 12 : index
    %254 = memref.load %arg2[%c12] : memref<98xf32, #tpu.memory_space<smem>>
    %c61 = arith.constant 61 : index
    %255 = memref.load %arg2[%c61] : memref<98xf32, #tpu.memory_space<smem>>
    %256 = vector.broadcast %254 : f32 to vector<2x1x256xf32>
    %257 = arith.mulf %252, %256 : vector<2x1x256xf32>
    %258 = vector.broadcast %255 : f32 to vector<2x1x256xf32>
    %259 = arith.mulf %253, %258 : vector<2x1x256xf32>
    %260 = arith.addf %257, %259 : vector<2x1x256xf32>
    %261 = arith.andi %177, %48 : vector<1x1x256xi1>
    %cst_37 = arith.constant 0.000000e+00 : f32
    %262 = vector.shape_cast %261 : vector<1x1x256xi1> to vector<1x1x256xi1>
    %263 = vector.broadcast %262 : vector<1x1x256xi1> to vector<2x1x256xi1>
    %264 = vector.broadcast %cst_37 : f32 to vector<2x1x256xf32>
    %265 = arith.select %263, %260, %264 : vector<2x1x256xi1>, vector<2x1x256xf32>
    %266 = arith.addf %251, %265 : vector<2x1x256xf32>
    %c29_i32 = arith.constant 29 : i32
    %267 = tpu.dynamic_rotate %4 by %c29_i32 dim 2 : vector<2x1x256xf32>, i32 -> vector<2x1x256xf32>
    %c29_i32_38 = arith.constant 29 : i32
    %268 = tpu.dynamic_rotate %6 by %c29_i32_38 dim 2 : vector<2x1x256xf32>, i32 -> vector<2x1x256xf32>
    %c13 = arith.constant 13 : index
    %269 = memref.load %arg2[%c13] : memref<98xf32, #tpu.memory_space<smem>>
    %c62 = arith.constant 62 : index
    %270 = memref.load %arg2[%c62] : memref<98xf32, #tpu.memory_space<smem>>
    %271 = vector.broadcast %269 : f32 to vector<2x1x256xf32>
    %272 = arith.mulf %267, %271 : vector<2x1x256xf32>
    %273 = vector.broadcast %270 : f32 to vector<2x1x256xf32>
    %274 = arith.mulf %268, %273 : vector<2x1x256xf32>
    %275 = arith.addf %272, %274 : vector<2x1x256xf32>
    %276 = arith.andi %177, %53 : vector<1x1x256xi1>
    %cst_39 = arith.constant 0.000000e+00 : f32
    %277 = vector.shape_cast %276 : vector<1x1x256xi1> to vector<1x1x256xi1>
    %278 = vector.broadcast %277 : vector<1x1x256xi1> to vector<2x1x256xi1>
    %279 = vector.broadcast %cst_39 : f32 to vector<2x1x256xf32>
    %280 = arith.select %278, %275, %279 : vector<2x1x256xi1>, vector<2x1x256xf32>
    %281 = arith.addf %266, %280 : vector<2x1x256xf32>
    %c16_i32_40 = arith.constant 16 : i32
    %282 = vector.broadcast %c16_i32_40 : i32 to vector<1x1x256xi32>
    %283 = arith.cmpi sge, %7, %282 : vector<1x1x256xi32>
    %c272_i32 = arith.constant 272 : i32
    %284 = vector.broadcast %c272_i32 : i32 to vector<1x1x256xi32>
    %285 = arith.cmpi slt, %7, %284 : vector<1x1x256xi32>
    %286 = arith.andi %283, %285 : vector<1x1x256xi1>
    %c19_i32_41 = arith.constant 19 : i32
    %287 = tpu.dynamic_rotate %4 by %c19_i32_41 dim 2 : vector<2x1x256xf32>, i32 -> vector<2x1x256xf32>
    %c19_i32_42 = arith.constant 19 : i32
    %288 = tpu.dynamic_rotate %6 by %c19_i32_42 dim 2 : vector<2x1x256xf32>, i32 -> vector<2x1x256xf32>
    %c14 = arith.constant 14 : index
    %289 = memref.load %arg2[%c14] : memref<98xf32, #tpu.memory_space<smem>>
    %c63 = arith.constant 63 : index
    %290 = memref.load %arg2[%c63] : memref<98xf32, #tpu.memory_space<smem>>
    %291 = vector.broadcast %289 : f32 to vector<2x1x256xf32>
    %292 = arith.mulf %287, %291 : vector<2x1x256xf32>
    %293 = vector.broadcast %290 : f32 to vector<2x1x256xf32>
    %294 = arith.mulf %288, %293 : vector<2x1x256xf32>
    %295 = arith.addf %292, %294 : vector<2x1x256xf32>
    %296 = arith.andi %286, %28 : vector<1x1x256xi1>
    %cst_43 = arith.constant 0.000000e+00 : f32
    %297 = vector.shape_cast %296 : vector<1x1x256xi1> to vector<1x1x256xi1>
    %298 = vector.broadcast %297 : vector<1x1x256xi1> to vector<2x1x256xi1>
    %299 = vector.broadcast %cst_43 : f32 to vector<2x1x256xf32>
    %300 = arith.select %298, %295, %299 : vector<2x1x256xi1>, vector<2x1x256xf32>
    %301 = arith.addf %281, %300 : vector<2x1x256xf32>
    %c18_i32_44 = arith.constant 18 : i32
    %302 = tpu.dynamic_rotate %4 by %c18_i32_44 dim 2 : vector<2x1x256xf32>, i32 -> vector<2x1x256xf32>
    %c18_i32_45 = arith.constant 18 : i32
    %303 = tpu.dynamic_rotate %6 by %c18_i32_45 dim 2 : vector<2x1x256xf32>, i32 -> vector<2x1x256xf32>
    %c15 = arith.constant 15 : index
    %304 = memref.load %arg2[%c15] : memref<98xf32, #tpu.memory_space<smem>>
    %c64 = arith.constant 64 : index
    %305 = memref.load %arg2[%c64] : memref<98xf32, #tpu.memory_space<smem>>
    %306 = vector.broadcast %304 : f32 to vector<2x1x256xf32>
    %307 = arith.mulf %302, %306 : vector<2x1x256xf32>
    %308 = vector.broadcast %305 : f32 to vector<2x1x256xf32>
    %309 = arith.mulf %303, %308 : vector<2x1x256xf32>
    %310 = arith.addf %307, %309 : vector<2x1x256xf32>
    %311 = arith.andi %286, %33 : vector<1x1x256xi1>
    %cst_46 = arith.constant 0.000000e+00 : f32
    %312 = vector.shape_cast %311 : vector<1x1x256xi1> to vector<1x1x256xi1>
    %313 = vector.broadcast %312 : vector<1x1x256xi1> to vector<2x1x256xi1>
    %314 = vector.broadcast %cst_46 : f32 to vector<2x1x256xf32>
    %315 = arith.select %313, %310, %314 : vector<2x1x256xi1>, vector<2x1x256xf32>
    %316 = arith.addf %301, %315 : vector<2x1x256xf32>
    %c17_i32_47 = arith.constant 17 : i32
    %317 = tpu.dynamic_rotate %4 by %c17_i32_47 dim 2 : vector<2x1x256xf32>, i32 -> vector<2x1x256xf32>
    %c17_i32_48 = arith.constant 17 : i32
    %318 = tpu.dynamic_rotate %6 by %c17_i32_48 dim 2 : vector<2x1x256xf32>, i32 -> vector<2x1x256xf32>
    %c16 = arith.constant 16 : index
    %319 = memref.load %arg2[%c16] : memref<98xf32, #tpu.memory_space<smem>>
    %c65 = arith.constant 65 : index
    %320 = memref.load %arg2[%c65] : memref<98xf32, #tpu.memory_space<smem>>
    %321 = vector.broadcast %319 : f32 to vector<2x1x256xf32>
    %322 = arith.mulf %317, %321 : vector<2x1x256xf32>
    %323 = vector.broadcast %320 : f32 to vector<2x1x256xf32>
    %324 = arith.mulf %318, %323 : vector<2x1x256xf32>
    %325 = arith.addf %322, %324 : vector<2x1x256xf32>
    %326 = arith.andi %286, %38 : vector<1x1x256xi1>
    %cst_49 = arith.constant 0.000000e+00 : f32
    %327 = vector.shape_cast %326 : vector<1x1x256xi1> to vector<1x1x256xi1>
    %328 = vector.broadcast %327 : vector<1x1x256xi1> to vector<2x1x256xi1>
    %329 = vector.broadcast %cst_49 : f32 to vector<2x1x256xf32>
    %330 = arith.select %328, %325, %329 : vector<2x1x256xi1>, vector<2x1x256xf32>
    %331 = arith.addf %316, %330 : vector<2x1x256xf32>
    %c16_i32_50 = arith.constant 16 : i32
    %332 = tpu.dynamic_rotate %4 by %c16_i32_50 dim 2 : vector<2x1x256xf32>, i32 -> vector<2x1x256xf32>
    %c16_i32_51 = arith.constant 16 : i32
    %333 = tpu.dynamic_rotate %6 by %c16_i32_51 dim 2 : vector<2x1x256xf32>, i32 -> vector<2x1x256xf32>
    %c17 = arith.constant 17 : index
    %334 = memref.load %arg2[%c17] : memref<98xf32, #tpu.memory_space<smem>>
    %c66 = arith.constant 66 : index
    %335 = memref.load %arg2[%c66] : memref<98xf32, #tpu.memory_space<smem>>
    %336 = vector.broadcast %334 : f32 to vector<2x1x256xf32>
    %337 = arith.mulf %332, %336 : vector<2x1x256xf32>
    %338 = vector.broadcast %335 : f32 to vector<2x1x256xf32>
    %339 = arith.mulf %333, %338 : vector<2x1x256xf32>
    %340 = arith.addf %337, %339 : vector<2x1x256xf32>
    %cst_52 = arith.constant 0.000000e+00 : f32
    %341 = vector.shape_cast %286 : vector<1x1x256xi1> to vector<1x1x256xi1>
    %342 = vector.broadcast %341 : vector<1x1x256xi1> to vector<2x1x256xi1>
    %343 = vector.broadcast %cst_52 : f32 to vector<2x1x256xf32>
    %344 = arith.select %342, %340, %343 : vector<2x1x256xi1>, vector<2x1x256xf32>
    %345 = arith.addf %331, %344 : vector<2x1x256xf32>
    %c15_i32_53 = arith.constant 15 : i32
    %346 = tpu.dynamic_rotate %4 by %c15_i32_53 dim 2 : vector<2x1x256xf32>, i32 -> vector<2x1x256xf32>
    %c15_i32_54 = arith.constant 15 : i32
    %347 = tpu.dynamic_rotate %6 by %c15_i32_54 dim 2 : vector<2x1x256xf32>, i32 -> vector<2x1x256xf32>
    %c18 = arith.constant 18 : index
    %348 = memref.load %arg2[%c18] : memref<98xf32, #tpu.memory_space<smem>>
    %c67 = arith.constant 67 : index
    %349 = memref.load %arg2[%c67] : memref<98xf32, #tpu.memory_space<smem>>
    %350 = vector.broadcast %348 : f32 to vector<2x1x256xf32>
    %351 = arith.mulf %346, %350 : vector<2x1x256xf32>
    %352 = vector.broadcast %349 : f32 to vector<2x1x256xf32>
    %353 = arith.mulf %347, %352 : vector<2x1x256xf32>
    %354 = arith.addf %351, %353 : vector<2x1x256xf32>
    %355 = arith.andi %286, %43 : vector<1x1x256xi1>
    %cst_55 = arith.constant 0.000000e+00 : f32
    %356 = vector.shape_cast %355 : vector<1x1x256xi1> to vector<1x1x256xi1>
    %357 = vector.broadcast %356 : vector<1x1x256xi1> to vector<2x1x256xi1>
    %358 = vector.broadcast %cst_55 : f32 to vector<2x1x256xf32>
    %359 = arith.select %357, %354, %358 : vector<2x1x256xi1>, vector<2x1x256xf32>
    %360 = arith.addf %345, %359 : vector<2x1x256xf32>
    %c14_i32_56 = arith.constant 14 : i32
    %361 = tpu.dynamic_rotate %4 by %c14_i32_56 dim 2 : vector<2x1x256xf32>, i32 -> vector<2x1x256xf32>
    %c14_i32_57 = arith.constant 14 : i32
    %362 = tpu.dynamic_rotate %6 by %c14_i32_57 dim 2 : vector<2x1x256xf32>, i32 -> vector<2x1x256xf32>
    %c19 = arith.constant 19 : index
    %363 = memref.load %arg2[%c19] : memref<98xf32, #tpu.memory_space<smem>>
    %c68 = arith.constant 68 : index
    %364 = memref.load %arg2[%c68] : memref<98xf32, #tpu.memory_space<smem>>
    %365 = vector.broadcast %363 : f32 to vector<2x1x256xf32>
    %366 = arith.mulf %361, %365 : vector<2x1x256xf32>
    %367 = vector.broadcast %364 : f32 to vector<2x1x256xf32>
    %368 = arith.mulf %362, %367 : vector<2x1x256xf32>
    %369 = arith.addf %366, %368 : vector<2x1x256xf32>
    %370 = arith.andi %286, %48 : vector<1x1x256xi1>
    %cst_58 = arith.constant 0.000000e+00 : f32
    %371 = vector.shape_cast %370 : vector<1x1x256xi1> to vector<1x1x256xi1>
    %372 = vector.broadcast %371 : vector<1x1x256xi1> to vector<2x1x256xi1>
    %373 = vector.broadcast %cst_58 : f32 to vector<2x1x256xf32>
    %374 = arith.select %372, %369, %373 : vector<2x1x256xi1>, vector<2x1x256xf32>
    %375 = arith.addf %360, %374 : vector<2x1x256xf32>
    %c13_i32_59 = arith.constant 13 : i32
    %376 = tpu.dynamic_rotate %4 by %c13_i32_59 dim 2 : vector<2x1x256xf32>, i32 -> vector<2x1x256xf32>
    %c13_i32_60 = arith.constant 13 : i32
    %377 = tpu.dynamic_rotate %6 by %c13_i32_60 dim 2 : vector<2x1x256xf32>, i32 -> vector<2x1x256xf32>
    %c20 = arith.constant 20 : index
    %378 = memref.load %arg2[%c20] : memref<98xf32, #tpu.memory_space<smem>>
    %c69 = arith.constant 69 : index
    %379 = memref.load %arg2[%c69] : memref<98xf32, #tpu.memory_space<smem>>
    %380 = vector.broadcast %378 : f32 to vector<2x1x256xf32>
    %381 = arith.mulf %376, %380 : vector<2x1x256xf32>
    %382 = vector.broadcast %379 : f32 to vector<2x1x256xf32>
    %383 = arith.mulf %377, %382 : vector<2x1x256xf32>
    %384 = arith.addf %381, %383 : vector<2x1x256xf32>
    %385 = arith.andi %286, %53 : vector<1x1x256xi1>
    %cst_61 = arith.constant 0.000000e+00 : f32
    %386 = vector.shape_cast %385 : vector<1x1x256xi1> to vector<1x1x256xi1>
    %387 = vector.broadcast %386 : vector<1x1x256xi1> to vector<2x1x256xi1>
    %388 = vector.broadcast %cst_61 : f32 to vector<2x1x256xf32>
    %389 = arith.select %387, %384, %388 : vector<2x1x256xi1>, vector<2x1x256xf32>
    %390 = arith.addf %375, %389 : vector<2x1x256xf32>
    %c3_i32_62 = arith.constant 3 : i32
    %391 = tpu.dynamic_rotate %4 by %c3_i32_62 dim 2 : vector<2x1x256xf32>, i32 -> vector<2x1x256xf32>
    %c3_i32_63 = arith.constant 3 : i32
    %392 = tpu.dynamic_rotate %6 by %c3_i32_63 dim 2 : vector<2x1x256xf32>, i32 -> vector<2x1x256xf32>
    %c21 = arith.constant 21 : index
    %393 = memref.load %arg2[%c21] : memref<98xf32, #tpu.memory_space<smem>>
    %c70 = arith.constant 70 : index
    %394 = memref.load %arg2[%c70] : memref<98xf32, #tpu.memory_space<smem>>
    %395 = vector.broadcast %393 : f32 to vector<2x1x256xf32>
    %396 = arith.mulf %391, %395 : vector<2x1x256xf32>
    %397 = vector.broadcast %394 : f32 to vector<2x1x256xf32>
    %398 = arith.mulf %392, %397 : vector<2x1x256xf32>
    %399 = arith.addf %396, %398 : vector<2x1x256xf32>
    %cst_64 = arith.constant 0.000000e+00 : f32
    %400 = vector.shape_cast %28 : vector<1x1x256xi1> to vector<1x1x256xi1>
    %401 = vector.broadcast %400 : vector<1x1x256xi1> to vector<2x1x256xi1>
    %402 = vector.broadcast %cst_64 : f32 to vector<2x1x256xf32>
    %403 = arith.select %401, %399, %402 : vector<2x1x256xi1>, vector<2x1x256xf32>
    %404 = arith.addf %390, %403 : vector<2x1x256xf32>
    %c2_i32_65 = arith.constant 2 : i32
    %405 = tpu.dynamic_rotate %4 by %c2_i32_65 dim 2 : vector<2x1x256xf32>, i32 -> vector<2x1x256xf32>
    %c2_i32_66 = arith.constant 2 : i32
    %406 = tpu.dynamic_rotate %6 by %c2_i32_66 dim 2 : vector<2x1x256xf32>, i32 -> vector<2x1x256xf32>
    %c22 = arith.constant 22 : index
    %407 = memref.load %arg2[%c22] : memref<98xf32, #tpu.memory_space<smem>>
    %c71 = arith.constant 71 : index
    %408 = memref.load %arg2[%c71] : memref<98xf32, #tpu.memory_space<smem>>
    %409 = vector.broadcast %407 : f32 to vector<2x1x256xf32>
    %410 = arith.mulf %405, %409 : vector<2x1x256xf32>
    %411 = vector.broadcast %408 : f32 to vector<2x1x256xf32>
    %412 = arith.mulf %406, %411 : vector<2x1x256xf32>
    %413 = arith.addf %410, %412 : vector<2x1x256xf32>
    %cst_67 = arith.constant 0.000000e+00 : f32
    %414 = vector.shape_cast %33 : vector<1x1x256xi1> to vector<1x1x256xi1>
    %415 = vector.broadcast %414 : vector<1x1x256xi1> to vector<2x1x256xi1>
    %416 = vector.broadcast %cst_67 : f32 to vector<2x1x256xf32>
    %417 = arith.select %415, %413, %416 : vector<2x1x256xi1>, vector<2x1x256xf32>
    %418 = arith.addf %404, %417 : vector<2x1x256xf32>
    %c1_i32_68 = arith.constant 1 : i32
    %419 = tpu.dynamic_rotate %4 by %c1_i32_68 dim 2 : vector<2x1x256xf32>, i32 -> vector<2x1x256xf32>
    %c1_i32_69 = arith.constant 1 : i32
    %420 = tpu.dynamic_rotate %6 by %c1_i32_69 dim 2 : vector<2x1x256xf32>, i32 -> vector<2x1x256xf32>
    %c23 = arith.constant 23 : index
    %421 = memref.load %arg2[%c23] : memref<98xf32, #tpu.memory_space<smem>>
    %c72 = arith.constant 72 : index
    %422 = memref.load %arg2[%c72] : memref<98xf32, #tpu.memory_space<smem>>
    %423 = vector.broadcast %421 : f32 to vector<2x1x256xf32>
    %424 = arith.mulf %419, %423 : vector<2x1x256xf32>
    %425 = vector.broadcast %422 : f32 to vector<2x1x256xf32>
    %426 = arith.mulf %420, %425 : vector<2x1x256xf32>
    %427 = arith.addf %424, %426 : vector<2x1x256xf32>
    %cst_70 = arith.constant 0.000000e+00 : f32
    %428 = vector.shape_cast %38 : vector<1x1x256xi1> to vector<1x1x256xi1>
    %429 = vector.broadcast %428 : vector<1x1x256xi1> to vector<2x1x256xi1>
    %430 = vector.broadcast %cst_70 : f32 to vector<2x1x256xf32>
    %431 = arith.select %429, %427, %430 : vector<2x1x256xi1>, vector<2x1x256xf32>
    %432 = arith.addf %418, %431 : vector<2x1x256xf32>
    %c255_i32 = arith.constant 255 : i32
    %433 = tpu.dynamic_rotate %4 by %c255_i32 dim 2 : vector<2x1x256xf32>, i32 -> vector<2x1x256xf32>
    %c255_i32_71 = arith.constant 255 : i32
    %434 = tpu.dynamic_rotate %6 by %c255_i32_71 dim 2 : vector<2x1x256xf32>, i32 -> vector<2x1x256xf32>
    %c25 = arith.constant 25 : index
    %435 = memref.load %arg2[%c25] : memref<98xf32, #tpu.memory_space<smem>>
    %c74 = arith.constant 74 : index
    %436 = memref.load %arg2[%c74] : memref<98xf32, #tpu.memory_space<smem>>
    %437 = vector.broadcast %435 : f32 to vector<2x1x256xf32>
    %438 = arith.mulf %433, %437 : vector<2x1x256xf32>
    %439 = vector.broadcast %436 : f32 to vector<2x1x256xf32>
    %440 = arith.mulf %434, %439 : vector<2x1x256xf32>
    %441 = arith.addf %438, %440 : vector<2x1x256xf32>
    %cst_72 = arith.constant 0.000000e+00 : f32
    %442 = vector.shape_cast %43 : vector<1x1x256xi1> to vector<1x1x256xi1>
    %443 = vector.broadcast %442 : vector<1x1x256xi1> to vector<2x1x256xi1>
    %444 = vector.broadcast %cst_72 : f32 to vector<2x1x256xf32>
    %445 = arith.select %443, %441, %444 : vector<2x1x256xi1>, vector<2x1x256xf32>
    %446 = arith.addf %432, %445 : vector<2x1x256xf32>
    %c254_i32 = arith.constant 254 : i32
    %447 = tpu.dynamic_rotate %4 by %c254_i32 dim 2 : vector<2x1x256xf32>, i32 -> vector<2x1x256xf32>
    %c254_i32_73 = arith.constant 254 : i32
    %448 = tpu.dynamic_rotate %6 by %c254_i32_73 dim 2 : vector<2x1x256xf32>, i32 -> vector<2x1x256xf32>
    %c26 = arith.constant 26 : index
    %449 = memref.load %arg2[%c26] : memref<98xf32, #tpu.memory_space<smem>>
    %c75 = arith.constant 75 : index
    %450 = memref.load %arg2[%c75] : memref<98xf32, #tpu.memory_space<smem>>
    %451 = vector.broadcast %449 : f32 to vector<2x1x256xf32>
    %452 = arith.mulf %447, %451 : vector<2x1x256xf32>
    %453 = vector.broadcast %450 : f32 to vector<2x1x256xf32>
    %454 = arith.mulf %448, %453 : vector<2x1x256xf32>
    %455 = arith.addf %452, %454 : vector<2x1x256xf32>
    %cst_74 = arith.constant 0.000000e+00 : f32
    %456 = vector.shape_cast %48 : vector<1x1x256xi1> to vector<1x1x256xi1>
    %457 = vector.broadcast %456 : vector<1x1x256xi1> to vector<2x1x256xi1>
    %458 = vector.broadcast %cst_74 : f32 to vector<2x1x256xf32>
    %459 = arith.select %457, %455, %458 : vector<2x1x256xi1>, vector<2x1x256xf32>
    %460 = arith.addf %446, %459 : vector<2x1x256xf32>
    %c253_i32 = arith.constant 253 : i32
    %461 = tpu.dynamic_rotate %4 by %c253_i32 dim 2 : vector<2x1x256xf32>, i32 -> vector<2x1x256xf32>
    %c253_i32_75 = arith.constant 253 : i32
    %462 = tpu.dynamic_rotate %6 by %c253_i32_75 dim 2 : vector<2x1x256xf32>, i32 -> vector<2x1x256xf32>
    %c27 = arith.constant 27 : index
    %463 = memref.load %arg2[%c27] : memref<98xf32, #tpu.memory_space<smem>>
    %c76 = arith.constant 76 : index
    %464 = memref.load %arg2[%c76] : memref<98xf32, #tpu.memory_space<smem>>
    %465 = vector.broadcast %463 : f32 to vector<2x1x256xf32>
    %466 = arith.mulf %461, %465 : vector<2x1x256xf32>
    %467 = vector.broadcast %464 : f32 to vector<2x1x256xf32>
    %468 = arith.mulf %462, %467 : vector<2x1x256xf32>
    %469 = arith.addf %466, %468 : vector<2x1x256xf32>
    %cst_76 = arith.constant 0.000000e+00 : f32
    %470 = vector.shape_cast %53 : vector<1x1x256xi1> to vector<1x1x256xi1>
    %471 = vector.broadcast %470 : vector<1x1x256xi1> to vector<2x1x256xi1>
    %472 = vector.broadcast %cst_76 : f32 to vector<2x1x256xf32>
    %473 = arith.select %471, %469, %472 : vector<2x1x256xi1>, vector<2x1x256xf32>
    %474 = arith.addf %460, %473 : vector<2x1x256xf32>
    %c-16_i32 = arith.constant -16 : i32
    %475 = vector.broadcast %c-16_i32 : i32 to vector<1x1x256xi32>
    %476 = arith.cmpi sge, %7, %475 : vector<1x1x256xi32>
    %c240_i32 = arith.constant 240 : i32
    %477 = vector.broadcast %c240_i32 : i32 to vector<1x1x256xi32>
    %478 = arith.cmpi slt, %7, %477 : vector<1x1x256xi32>
    %479 = arith.andi %476, %478 : vector<1x1x256xi1>
    %c243_i32 = arith.constant 243 : i32
    %480 = tpu.dynamic_rotate %4 by %c243_i32 dim 2 : vector<2x1x256xf32>, i32 -> vector<2x1x256xf32>
    %c243_i32_77 = arith.constant 243 : i32
    %481 = tpu.dynamic_rotate %6 by %c243_i32_77 dim 2 : vector<2x1x256xf32>, i32 -> vector<2x1x256xf32>
    %c28 = arith.constant 28 : index
    %482 = memref.load %arg2[%c28] : memref<98xf32, #tpu.memory_space<smem>>
    %c77 = arith.constant 77 : index
    %483 = memref.load %arg2[%c77] : memref<98xf32, #tpu.memory_space<smem>>
    %484 = vector.broadcast %482 : f32 to vector<2x1x256xf32>
    %485 = arith.mulf %480, %484 : vector<2x1x256xf32>
    %486 = vector.broadcast %483 : f32 to vector<2x1x256xf32>
    %487 = arith.mulf %481, %486 : vector<2x1x256xf32>
    %488 = arith.addf %485, %487 : vector<2x1x256xf32>
    %489 = arith.andi %479, %28 : vector<1x1x256xi1>
    %cst_78 = arith.constant 0.000000e+00 : f32
    %490 = vector.shape_cast %489 : vector<1x1x256xi1> to vector<1x1x256xi1>
    %491 = vector.broadcast %490 : vector<1x1x256xi1> to vector<2x1x256xi1>
    %492 = vector.broadcast %cst_78 : f32 to vector<2x1x256xf32>
    %493 = arith.select %491, %488, %492 : vector<2x1x256xi1>, vector<2x1x256xf32>
    %494 = arith.addf %474, %493 : vector<2x1x256xf32>
    %c242_i32 = arith.constant 242 : i32
    %495 = tpu.dynamic_rotate %4 by %c242_i32 dim 2 : vector<2x1x256xf32>, i32 -> vector<2x1x256xf32>
    %c242_i32_79 = arith.constant 242 : i32
    %496 = tpu.dynamic_rotate %6 by %c242_i32_79 dim 2 : vector<2x1x256xf32>, i32 -> vector<2x1x256xf32>
    %c29 = arith.constant 29 : index
    %497 = memref.load %arg2[%c29] : memref<98xf32, #tpu.memory_space<smem>>
    %c78 = arith.constant 78 : index
    %498 = memref.load %arg2[%c78] : memref<98xf32, #tpu.memory_space<smem>>
    %499 = vector.broadcast %497 : f32 to vector<2x1x256xf32>
    %500 = arith.mulf %495, %499 : vector<2x1x256xf32>
    %501 = vector.broadcast %498 : f32 to vector<2x1x256xf32>
    %502 = arith.mulf %496, %501 : vector<2x1x256xf32>
    %503 = arith.addf %500, %502 : vector<2x1x256xf32>
    %504 = arith.andi %479, %33 : vector<1x1x256xi1>
    %cst_80 = arith.constant 0.000000e+00 : f32
    %505 = vector.shape_cast %504 : vector<1x1x256xi1> to vector<1x1x256xi1>
    %506 = vector.broadcast %505 : vector<1x1x256xi1> to vector<2x1x256xi1>
    %507 = vector.broadcast %cst_80 : f32 to vector<2x1x256xf32>
    %508 = arith.select %506, %503, %507 : vector<2x1x256xi1>, vector<2x1x256xf32>
    %509 = arith.addf %494, %508 : vector<2x1x256xf32>
    %c241_i32 = arith.constant 241 : i32
    %510 = tpu.dynamic_rotate %4 by %c241_i32 dim 2 : vector<2x1x256xf32>, i32 -> vector<2x1x256xf32>
    %c241_i32_81 = arith.constant 241 : i32
    %511 = tpu.dynamic_rotate %6 by %c241_i32_81 dim 2 : vector<2x1x256xf32>, i32 -> vector<2x1x256xf32>
    %c30 = arith.constant 30 : index
    %512 = memref.load %arg2[%c30] : memref<98xf32, #tpu.memory_space<smem>>
    %c79 = arith.constant 79 : index
    %513 = memref.load %arg2[%c79] : memref<98xf32, #tpu.memory_space<smem>>
    %514 = vector.broadcast %512 : f32 to vector<2x1x256xf32>
    %515 = arith.mulf %510, %514 : vector<2x1x256xf32>
    %516 = vector.broadcast %513 : f32 to vector<2x1x256xf32>
    %517 = arith.mulf %511, %516 : vector<2x1x256xf32>
    %518 = arith.addf %515, %517 : vector<2x1x256xf32>
    %519 = arith.andi %479, %38 : vector<1x1x256xi1>
    %cst_82 = arith.constant 0.000000e+00 : f32
    %520 = vector.shape_cast %519 : vector<1x1x256xi1> to vector<1x1x256xi1>
    %521 = vector.broadcast %520 : vector<1x1x256xi1> to vector<2x1x256xi1>
    %522 = vector.broadcast %cst_82 : f32 to vector<2x1x256xf32>
    %523 = arith.select %521, %518, %522 : vector<2x1x256xi1>, vector<2x1x256xf32>
    %524 = arith.addf %509, %523 : vector<2x1x256xf32>
    %c240_i32_83 = arith.constant 240 : i32
    %525 = tpu.dynamic_rotate %4 by %c240_i32_83 dim 2 : vector<2x1x256xf32>, i32 -> vector<2x1x256xf32>
    %c240_i32_84 = arith.constant 240 : i32
    %526 = tpu.dynamic_rotate %6 by %c240_i32_84 dim 2 : vector<2x1x256xf32>, i32 -> vector<2x1x256xf32>
    %c31 = arith.constant 31 : index
    %527 = memref.load %arg2[%c31] : memref<98xf32, #tpu.memory_space<smem>>
    %c80 = arith.constant 80 : index
    %528 = memref.load %arg2[%c80] : memref<98xf32, #tpu.memory_space<smem>>
    %529 = vector.broadcast %527 : f32 to vector<2x1x256xf32>
    %530 = arith.mulf %525, %529 : vector<2x1x256xf32>
    %531 = vector.broadcast %528 : f32 to vector<2x1x256xf32>
    %532 = arith.mulf %526, %531 : vector<2x1x256xf32>
    %533 = arith.addf %530, %532 : vector<2x1x256xf32>
    %cst_85 = arith.constant 0.000000e+00 : f32
    %534 = vector.shape_cast %479 : vector<1x1x256xi1> to vector<1x1x256xi1>
    %535 = vector.broadcast %534 : vector<1x1x256xi1> to vector<2x1x256xi1>
    %536 = vector.broadcast %cst_85 : f32 to vector<2x1x256xf32>
    %537 = arith.select %535, %533, %536 : vector<2x1x256xi1>, vector<2x1x256xf32>
    %538 = arith.addf %524, %537 : vector<2x1x256xf32>
    %c239_i32 = arith.constant 239 : i32
    %539 = tpu.dynamic_rotate %4 by %c239_i32 dim 2 : vector<2x1x256xf32>, i32 -> vector<2x1x256xf32>
    %c239_i32_86 = arith.constant 239 : i32
    %540 = tpu.dynamic_rotate %6 by %c239_i32_86 dim 2 : vector<2x1x256xf32>, i32 -> vector<2x1x256xf32>
    %c32 = arith.constant 32 : index
    %541 = memref.load %arg2[%c32] : memref<98xf32, #tpu.memory_space<smem>>
    %c81 = arith.constant 81 : index
    %542 = memref.load %arg2[%c81] : memref<98xf32, #tpu.memory_space<smem>>
    %543 = vector.broadcast %541 : f32 to vector<2x1x256xf32>
    %544 = arith.mulf %539, %543 : vector<2x1x256xf32>
    %545 = vector.broadcast %542 : f32 to vector<2x1x256xf32>
    %546 = arith.mulf %540, %545 : vector<2x1x256xf32>
    %547 = arith.addf %544, %546 : vector<2x1x256xf32>
    %548 = arith.andi %479, %43 : vector<1x1x256xi1>
    %cst_87 = arith.constant 0.000000e+00 : f32
    %549 = vector.shape_cast %548 : vector<1x1x256xi1> to vector<1x1x256xi1>
    %550 = vector.broadcast %549 : vector<1x1x256xi1> to vector<2x1x256xi1>
    %551 = vector.broadcast %cst_87 : f32 to vector<2x1x256xf32>
    %552 = arith.select %550, %547, %551 : vector<2x1x256xi1>, vector<2x1x256xf32>
    %553 = arith.addf %538, %552 : vector<2x1x256xf32>
    %c238_i32 = arith.constant 238 : i32
    %554 = tpu.dynamic_rotate %4 by %c238_i32 dim 2 : vector<2x1x256xf32>, i32 -> vector<2x1x256xf32>
    %c238_i32_88 = arith.constant 238 : i32
    %555 = tpu.dynamic_rotate %6 by %c238_i32_88 dim 2 : vector<2x1x256xf32>, i32 -> vector<2x1x256xf32>
    %c33 = arith.constant 33 : index
    %556 = memref.load %arg2[%c33] : memref<98xf32, #tpu.memory_space<smem>>
    %c82 = arith.constant 82 : index
    %557 = memref.load %arg2[%c82] : memref<98xf32, #tpu.memory_space<smem>>
    %558 = vector.broadcast %556 : f32 to vector<2x1x256xf32>
    %559 = arith.mulf %554, %558 : vector<2x1x256xf32>
    %560 = vector.broadcast %557 : f32 to vector<2x1x256xf32>
    %561 = arith.mulf %555, %560 : vector<2x1x256xf32>
    %562 = arith.addf %559, %561 : vector<2x1x256xf32>
    %563 = arith.andi %479, %48 : vector<1x1x256xi1>
    %cst_89 = arith.constant 0.000000e+00 : f32
    %564 = vector.shape_cast %563 : vector<1x1x256xi1> to vector<1x1x256xi1>
    %565 = vector.broadcast %564 : vector<1x1x256xi1> to vector<2x1x256xi1>
    %566 = vector.broadcast %cst_89 : f32 to vector<2x1x256xf32>
    %567 = arith.select %565, %562, %566 : vector<2x1x256xi1>, vector<2x1x256xf32>
    %568 = arith.addf %553, %567 : vector<2x1x256xf32>
    %c237_i32 = arith.constant 237 : i32
    %569 = tpu.dynamic_rotate %4 by %c237_i32 dim 2 : vector<2x1x256xf32>, i32 -> vector<2x1x256xf32>
    %c237_i32_90 = arith.constant 237 : i32
    %570 = tpu.dynamic_rotate %6 by %c237_i32_90 dim 2 : vector<2x1x256xf32>, i32 -> vector<2x1x256xf32>
    %c34 = arith.constant 34 : index
    %571 = memref.load %arg2[%c34] : memref<98xf32, #tpu.memory_space<smem>>
    %c83 = arith.constant 83 : index
    %572 = memref.load %arg2[%c83] : memref<98xf32, #tpu.memory_space<smem>>
    %573 = vector.broadcast %571 : f32 to vector<2x1x256xf32>
    %574 = arith.mulf %569, %573 : vector<2x1x256xf32>
    %575 = vector.broadcast %572 : f32 to vector<2x1x256xf32>
    %576 = arith.mulf %570, %575 : vector<2x1x256xf32>
    %577 = arith.addf %574, %576 : vector<2x1x256xf32>
    %578 = arith.andi %479, %53 : vector<1x1x256xi1>
    %cst_91 = arith.constant 0.000000e+00 : f32
    %579 = vector.shape_cast %578 : vector<1x1x256xi1> to vector<1x1x256xi1>
    %580 = vector.broadcast %579 : vector<1x1x256xi1> to vector<2x1x256xi1>
    %581 = vector.broadcast %cst_91 : f32 to vector<2x1x256xf32>
    %582 = arith.select %580, %577, %581 : vector<2x1x256xi1>, vector<2x1x256xf32>
    %583 = arith.addf %568, %582 : vector<2x1x256xf32>
    %c-32_i32 = arith.constant -32 : i32
    %584 = vector.broadcast %c-32_i32 : i32 to vector<1x1x256xi32>
    %585 = arith.cmpi sge, %7, %584 : vector<1x1x256xi32>
    %c224_i32 = arith.constant 224 : i32
    %586 = vector.broadcast %c224_i32 : i32 to vector<1x1x256xi32>
    %587 = arith.cmpi slt, %7, %586 : vector<1x1x256xi32>
    %588 = arith.andi %585, %587 : vector<1x1x256xi1>
    %c227_i32 = arith.constant 227 : i32
    %589 = tpu.dynamic_rotate %4 by %c227_i32 dim 2 : vector<2x1x256xf32>, i32 -> vector<2x1x256xf32>
    %c227_i32_92 = arith.constant 227 : i32
    %590 = tpu.dynamic_rotate %6 by %c227_i32_92 dim 2 : vector<2x1x256xf32>, i32 -> vector<2x1x256xf32>
    %c35 = arith.constant 35 : index
    %591 = memref.load %arg2[%c35] : memref<98xf32, #tpu.memory_space<smem>>
    %c84 = arith.constant 84 : index
    %592 = memref.load %arg2[%c84] : memref<98xf32, #tpu.memory_space<smem>>
    %593 = vector.broadcast %591 : f32 to vector<2x1x256xf32>
    %594 = arith.mulf %589, %593 : vector<2x1x256xf32>
    %595 = vector.broadcast %592 : f32 to vector<2x1x256xf32>
    %596 = arith.mulf %590, %595 : vector<2x1x256xf32>
    %597 = arith.addf %594, %596 : vector<2x1x256xf32>
    %598 = arith.andi %588, %28 : vector<1x1x256xi1>
    %cst_93 = arith.constant 0.000000e+00 : f32
    %599 = vector.shape_cast %598 : vector<1x1x256xi1> to vector<1x1x256xi1>
    %600 = vector.broadcast %599 : vector<1x1x256xi1> to vector<2x1x256xi1>
    %601 = vector.broadcast %cst_93 : f32 to vector<2x1x256xf32>
    %602 = arith.select %600, %597, %601 : vector<2x1x256xi1>, vector<2x1x256xf32>
    %603 = arith.addf %583, %602 : vector<2x1x256xf32>
    %c226_i32 = arith.constant 226 : i32
    %604 = tpu.dynamic_rotate %4 by %c226_i32 dim 2 : vector<2x1x256xf32>, i32 -> vector<2x1x256xf32>
    %c226_i32_94 = arith.constant 226 : i32
    %605 = tpu.dynamic_rotate %6 by %c226_i32_94 dim 2 : vector<2x1x256xf32>, i32 -> vector<2x1x256xf32>
    %c36 = arith.constant 36 : index
    %606 = memref.load %arg2[%c36] : memref<98xf32, #tpu.memory_space<smem>>
    %c85 = arith.constant 85 : index
    %607 = memref.load %arg2[%c85] : memref<98xf32, #tpu.memory_space<smem>>
    %608 = vector.broadcast %606 : f32 to vector<2x1x256xf32>
    %609 = arith.mulf %604, %608 : vector<2x1x256xf32>
    %610 = vector.broadcast %607 : f32 to vector<2x1x256xf32>
    %611 = arith.mulf %605, %610 : vector<2x1x256xf32>
    %612 = arith.addf %609, %611 : vector<2x1x256xf32>
    %613 = arith.andi %588, %33 : vector<1x1x256xi1>
    %cst_95 = arith.constant 0.000000e+00 : f32
    %614 = vector.shape_cast %613 : vector<1x1x256xi1> to vector<1x1x256xi1>
    %615 = vector.broadcast %614 : vector<1x1x256xi1> to vector<2x1x256xi1>
    %616 = vector.broadcast %cst_95 : f32 to vector<2x1x256xf32>
    %617 = arith.select %615, %612, %616 : vector<2x1x256xi1>, vector<2x1x256xf32>
    %618 = arith.addf %603, %617 : vector<2x1x256xf32>
    %c225_i32 = arith.constant 225 : i32
    %619 = tpu.dynamic_rotate %4 by %c225_i32 dim 2 : vector<2x1x256xf32>, i32 -> vector<2x1x256xf32>
    %c225_i32_96 = arith.constant 225 : i32
    %620 = tpu.dynamic_rotate %6 by %c225_i32_96 dim 2 : vector<2x1x256xf32>, i32 -> vector<2x1x256xf32>
    %c37 = arith.constant 37 : index
    %621 = memref.load %arg2[%c37] : memref<98xf32, #tpu.memory_space<smem>>
    %c86 = arith.constant 86 : index
    %622 = memref.load %arg2[%c86] : memref<98xf32, #tpu.memory_space<smem>>
    %623 = vector.broadcast %621 : f32 to vector<2x1x256xf32>
    %624 = arith.mulf %619, %623 : vector<2x1x256xf32>
    %625 = vector.broadcast %622 : f32 to vector<2x1x256xf32>
    %626 = arith.mulf %620, %625 : vector<2x1x256xf32>
    %627 = arith.addf %624, %626 : vector<2x1x256xf32>
    %628 = arith.andi %588, %38 : vector<1x1x256xi1>
    %cst_97 = arith.constant 0.000000e+00 : f32
    %629 = vector.shape_cast %628 : vector<1x1x256xi1> to vector<1x1x256xi1>
    %630 = vector.broadcast %629 : vector<1x1x256xi1> to vector<2x1x256xi1>
    %631 = vector.broadcast %cst_97 : f32 to vector<2x1x256xf32>
    %632 = arith.select %630, %627, %631 : vector<2x1x256xi1>, vector<2x1x256xf32>
    %633 = arith.addf %618, %632 : vector<2x1x256xf32>
    %c224_i32_98 = arith.constant 224 : i32
    %634 = tpu.dynamic_rotate %4 by %c224_i32_98 dim 2 : vector<2x1x256xf32>, i32 -> vector<2x1x256xf32>
    %c224_i32_99 = arith.constant 224 : i32
    %635 = tpu.dynamic_rotate %6 by %c224_i32_99 dim 2 : vector<2x1x256xf32>, i32 -> vector<2x1x256xf32>
    %c38 = arith.constant 38 : index
    %636 = memref.load %arg2[%c38] : memref<98xf32, #tpu.memory_space<smem>>
    %c87 = arith.constant 87 : index
    %637 = memref.load %arg2[%c87] : memref<98xf32, #tpu.memory_space<smem>>
    %638 = vector.broadcast %636 : f32 to vector<2x1x256xf32>
    %639 = arith.mulf %634, %638 : vector<2x1x256xf32>
    %640 = vector.broadcast %637 : f32 to vector<2x1x256xf32>
    %641 = arith.mulf %635, %640 : vector<2x1x256xf32>
    %642 = arith.addf %639, %641 : vector<2x1x256xf32>
    %cst_100 = arith.constant 0.000000e+00 : f32
    %643 = vector.shape_cast %588 : vector<1x1x256xi1> to vector<1x1x256xi1>
    %644 = vector.broadcast %643 : vector<1x1x256xi1> to vector<2x1x256xi1>
    %645 = vector.broadcast %cst_100 : f32 to vector<2x1x256xf32>
    %646 = arith.select %644, %642, %645 : vector<2x1x256xi1>, vector<2x1x256xf32>
    %647 = arith.addf %633, %646 : vector<2x1x256xf32>
    %c223_i32 = arith.constant 223 : i32
    %648 = tpu.dynamic_rotate %4 by %c223_i32 dim 2 : vector<2x1x256xf32>, i32 -> vector<2x1x256xf32>
    %c223_i32_101 = arith.constant 223 : i32
    %649 = tpu.dynamic_rotate %6 by %c223_i32_101 dim 2 : vector<2x1x256xf32>, i32 -> vector<2x1x256xf32>
    %c39 = arith.constant 39 : index
    %650 = memref.load %arg2[%c39] : memref<98xf32, #tpu.memory_space<smem>>
    %c88 = arith.constant 88 : index
    %651 = memref.load %arg2[%c88] : memref<98xf32, #tpu.memory_space<smem>>
    %652 = vector.broadcast %650 : f32 to vector<2x1x256xf32>
    %653 = arith.mulf %648, %652 : vector<2x1x256xf32>
    %654 = vector.broadcast %651 : f32 to vector<2x1x256xf32>
    %655 = arith.mulf %649, %654 : vector<2x1x256xf32>
    %656 = arith.addf %653, %655 : vector<2x1x256xf32>
    %657 = arith.andi %588, %43 : vector<1x1x256xi1>
    %cst_102 = arith.constant 0.000000e+00 : f32
    %658 = vector.shape_cast %657 : vector<1x1x256xi1> to vector<1x1x256xi1>
    %659 = vector.broadcast %658 : vector<1x1x256xi1> to vector<2x1x256xi1>
    %660 = vector.broadcast %cst_102 : f32 to vector<2x1x256xf32>
    %661 = arith.select %659, %656, %660 : vector<2x1x256xi1>, vector<2x1x256xf32>
    %662 = arith.addf %647, %661 : vector<2x1x256xf32>
    %c222_i32 = arith.constant 222 : i32
    %663 = tpu.dynamic_rotate %4 by %c222_i32 dim 2 : vector<2x1x256xf32>, i32 -> vector<2x1x256xf32>
    %c222_i32_103 = arith.constant 222 : i32
    %664 = tpu.dynamic_rotate %6 by %c222_i32_103 dim 2 : vector<2x1x256xf32>, i32 -> vector<2x1x256xf32>
    %c40 = arith.constant 40 : index
    %665 = memref.load %arg2[%c40] : memref<98xf32, #tpu.memory_space<smem>>
    %c89 = arith.constant 89 : index
    %666 = memref.load %arg2[%c89] : memref<98xf32, #tpu.memory_space<smem>>
    %667 = vector.broadcast %665 : f32 to vector<2x1x256xf32>
    %668 = arith.mulf %663, %667 : vector<2x1x256xf32>
    %669 = vector.broadcast %666 : f32 to vector<2x1x256xf32>
    %670 = arith.mulf %664, %669 : vector<2x1x256xf32>
    %671 = arith.addf %668, %670 : vector<2x1x256xf32>
    %672 = arith.andi %588, %48 : vector<1x1x256xi1>
    %cst_104 = arith.constant 0.000000e+00 : f32
    %673 = vector.shape_cast %672 : vector<1x1x256xi1> to vector<1x1x256xi1>
    %674 = vector.broadcast %673 : vector<1x1x256xi1> to vector<2x1x256xi1>
    %675 = vector.broadcast %cst_104 : f32 to vector<2x1x256xf32>
    %676 = arith.select %674, %671, %675 : vector<2x1x256xi1>, vector<2x1x256xf32>
    %677 = arith.addf %662, %676 : vector<2x1x256xf32>
    %c221_i32 = arith.constant 221 : i32
    %678 = tpu.dynamic_rotate %4 by %c221_i32 dim 2 : vector<2x1x256xf32>, i32 -> vector<2x1x256xf32>
    %c221_i32_105 = arith.constant 221 : i32
    %679 = tpu.dynamic_rotate %6 by %c221_i32_105 dim 2 : vector<2x1x256xf32>, i32 -> vector<2x1x256xf32>
    %c41 = arith.constant 41 : index
    %680 = memref.load %arg2[%c41] : memref<98xf32, #tpu.memory_space<smem>>
    %c90 = arith.constant 90 : index
    %681 = memref.load %arg2[%c90] : memref<98xf32, #tpu.memory_space<smem>>
    %682 = vector.broadcast %680 : f32 to vector<2x1x256xf32>
    %683 = arith.mulf %678, %682 : vector<2x1x256xf32>
    %684 = vector.broadcast %681 : f32 to vector<2x1x256xf32>
    %685 = arith.mulf %679, %684 : vector<2x1x256xf32>
    %686 = arith.addf %683, %685 : vector<2x1x256xf32>
    %687 = arith.andi %588, %53 : vector<1x1x256xi1>
    %cst_106 = arith.constant 0.000000e+00 : f32
    %688 = vector.shape_cast %687 : vector<1x1x256xi1> to vector<1x1x256xi1>
    %689 = vector.broadcast %688 : vector<1x1x256xi1> to vector<2x1x256xi1>
    %690 = vector.broadcast %cst_106 : f32 to vector<2x1x256xf32>
    %691 = arith.select %689, %686, %690 : vector<2x1x256xi1>, vector<2x1x256xf32>
    %692 = arith.addf %677, %691 : vector<2x1x256xf32>
    %c-48_i32 = arith.constant -48 : i32
    %693 = vector.broadcast %c-48_i32 : i32 to vector<1x1x256xi32>
    %694 = arith.cmpi sge, %7, %693 : vector<1x1x256xi32>
    %c208_i32 = arith.constant 208 : i32
    %695 = vector.broadcast %c208_i32 : i32 to vector<1x1x256xi32>
    %696 = arith.cmpi slt, %7, %695 : vector<1x1x256xi32>
    %697 = arith.andi %694, %696 : vector<1x1x256xi1>
    %c211_i32 = arith.constant 211 : i32
    %698 = tpu.dynamic_rotate %4 by %c211_i32 dim 2 : vector<2x1x256xf32>, i32 -> vector<2x1x256xf32>
    %c211_i32_107 = arith.constant 211 : i32
    %699 = tpu.dynamic_rotate %6 by %c211_i32_107 dim 2 : vector<2x1x256xf32>, i32 -> vector<2x1x256xf32>
    %c42 = arith.constant 42 : index
    %700 = memref.load %arg2[%c42] : memref<98xf32, #tpu.memory_space<smem>>
    %c91 = arith.constant 91 : index
    %701 = memref.load %arg2[%c91] : memref<98xf32, #tpu.memory_space<smem>>
    %702 = vector.broadcast %700 : f32 to vector<2x1x256xf32>
    %703 = arith.mulf %698, %702 : vector<2x1x256xf32>
    %704 = vector.broadcast %701 : f32 to vector<2x1x256xf32>
    %705 = arith.mulf %699, %704 : vector<2x1x256xf32>
    %706 = arith.addf %703, %705 : vector<2x1x256xf32>
    %707 = arith.andi %697, %28 : vector<1x1x256xi1>
    %cst_108 = arith.constant 0.000000e+00 : f32
    %708 = vector.shape_cast %707 : vector<1x1x256xi1> to vector<1x1x256xi1>
    %709 = vector.broadcast %708 : vector<1x1x256xi1> to vector<2x1x256xi1>
    %710 = vector.broadcast %cst_108 : f32 to vector<2x1x256xf32>
    %711 = arith.select %709, %706, %710 : vector<2x1x256xi1>, vector<2x1x256xf32>
    %712 = arith.addf %692, %711 : vector<2x1x256xf32>
    %c210_i32 = arith.constant 210 : i32
    %713 = tpu.dynamic_rotate %4 by %c210_i32 dim 2 : vector<2x1x256xf32>, i32 -> vector<2x1x256xf32>
    %c210_i32_109 = arith.constant 210 : i32
    %714 = tpu.dynamic_rotate %6 by %c210_i32_109 dim 2 : vector<2x1x256xf32>, i32 -> vector<2x1x256xf32>
    %c43 = arith.constant 43 : index
    %715 = memref.load %arg2[%c43] : memref<98xf32, #tpu.memory_space<smem>>
    %c92 = arith.constant 92 : index
    %716 = memref.load %arg2[%c92] : memref<98xf32, #tpu.memory_space<smem>>
    %717 = vector.broadcast %715 : f32 to vector<2x1x256xf32>
    %718 = arith.mulf %713, %717 : vector<2x1x256xf32>
    %719 = vector.broadcast %716 : f32 to vector<2x1x256xf32>
    %720 = arith.mulf %714, %719 : vector<2x1x256xf32>
    %721 = arith.addf %718, %720 : vector<2x1x256xf32>
    %722 = arith.andi %697, %33 : vector<1x1x256xi1>
    %cst_110 = arith.constant 0.000000e+00 : f32
    %723 = vector.shape_cast %722 : vector<1x1x256xi1> to vector<1x1x256xi1>
    %724 = vector.broadcast %723 : vector<1x1x256xi1> to vector<2x1x256xi1>
    %725 = vector.broadcast %cst_110 : f32 to vector<2x1x256xf32>
    %726 = arith.select %724, %721, %725 : vector<2x1x256xi1>, vector<2x1x256xf32>
    %727 = arith.addf %712, %726 : vector<2x1x256xf32>
    %c209_i32 = arith.constant 209 : i32
    %728 = tpu.dynamic_rotate %4 by %c209_i32 dim 2 : vector<2x1x256xf32>, i32 -> vector<2x1x256xf32>
    %c209_i32_111 = arith.constant 209 : i32
    %729 = tpu.dynamic_rotate %6 by %c209_i32_111 dim 2 : vector<2x1x256xf32>, i32 -> vector<2x1x256xf32>
    %c44 = arith.constant 44 : index
    %730 = memref.load %arg2[%c44] : memref<98xf32, #tpu.memory_space<smem>>
    %c93 = arith.constant 93 : index
    %731 = memref.load %arg2[%c93] : memref<98xf32, #tpu.memory_space<smem>>
    %732 = vector.broadcast %730 : f32 to vector<2x1x256xf32>
    %733 = arith.mulf %728, %732 : vector<2x1x256xf32>
    %734 = vector.broadcast %731 : f32 to vector<2x1x256xf32>
    %735 = arith.mulf %729, %734 : vector<2x1x256xf32>
    %736 = arith.addf %733, %735 : vector<2x1x256xf32>
    %737 = arith.andi %697, %38 : vector<1x1x256xi1>
    %cst_112 = arith.constant 0.000000e+00 : f32
    %738 = vector.shape_cast %737 : vector<1x1x256xi1> to vector<1x1x256xi1>
    %739 = vector.broadcast %738 : vector<1x1x256xi1> to vector<2x1x256xi1>
    %740 = vector.broadcast %cst_112 : f32 to vector<2x1x256xf32>
    %741 = arith.select %739, %736, %740 : vector<2x1x256xi1>, vector<2x1x256xf32>
    %742 = arith.addf %727, %741 : vector<2x1x256xf32>
    %c208_i32_113 = arith.constant 208 : i32
    %743 = tpu.dynamic_rotate %4 by %c208_i32_113 dim 2 : vector<2x1x256xf32>, i32 -> vector<2x1x256xf32>
    %c208_i32_114 = arith.constant 208 : i32
    %744 = tpu.dynamic_rotate %6 by %c208_i32_114 dim 2 : vector<2x1x256xf32>, i32 -> vector<2x1x256xf32>
    %c45 = arith.constant 45 : index
    %745 = memref.load %arg2[%c45] : memref<98xf32, #tpu.memory_space<smem>>
    %c94 = arith.constant 94 : index
    %746 = memref.load %arg2[%c94] : memref<98xf32, #tpu.memory_space<smem>>
    %747 = vector.broadcast %745 : f32 to vector<2x1x256xf32>
    %748 = arith.mulf %743, %747 : vector<2x1x256xf32>
    %749 = vector.broadcast %746 : f32 to vector<2x1x256xf32>
    %750 = arith.mulf %744, %749 : vector<2x1x256xf32>
    %751 = arith.addf %748, %750 : vector<2x1x256xf32>
    %cst_115 = arith.constant 0.000000e+00 : f32
    %752 = vector.shape_cast %697 : vector<1x1x256xi1> to vector<1x1x256xi1>
    %753 = vector.broadcast %752 : vector<1x1x256xi1> to vector<2x1x256xi1>
    %754 = vector.broadcast %cst_115 : f32 to vector<2x1x256xf32>
    %755 = arith.select %753, %751, %754 : vector<2x1x256xi1>, vector<2x1x256xf32>
    %756 = arith.addf %742, %755 : vector<2x1x256xf32>
    %c207_i32 = arith.constant 207 : i32
    %757 = tpu.dynamic_rotate %4 by %c207_i32 dim 2 : vector<2x1x256xf32>, i32 -> vector<2x1x256xf32>
    %c207_i32_116 = arith.constant 207 : i32
    %758 = tpu.dynamic_rotate %6 by %c207_i32_116 dim 2 : vector<2x1x256xf32>, i32 -> vector<2x1x256xf32>
    %c46 = arith.constant 46 : index
    %759 = memref.load %arg2[%c46] : memref<98xf32, #tpu.memory_space<smem>>
    %c95 = arith.constant 95 : index
    %760 = memref.load %arg2[%c95] : memref<98xf32, #tpu.memory_space<smem>>
    %761 = vector.broadcast %759 : f32 to vector<2x1x256xf32>
    %762 = arith.mulf %757, %761 : vector<2x1x256xf32>
    %763 = vector.broadcast %760 : f32 to vector<2x1x256xf32>
    %764 = arith.mulf %758, %763 : vector<2x1x256xf32>
    %765 = arith.addf %762, %764 : vector<2x1x256xf32>
    %766 = arith.andi %697, %43 : vector<1x1x256xi1>
    %cst_117 = arith.constant 0.000000e+00 : f32
    %767 = vector.shape_cast %766 : vector<1x1x256xi1> to vector<1x1x256xi1>
    %768 = vector.broadcast %767 : vector<1x1x256xi1> to vector<2x1x256xi1>
    %769 = vector.broadcast %cst_117 : f32 to vector<2x1x256xf32>
    %770 = arith.select %768, %765, %769 : vector<2x1x256xi1>, vector<2x1x256xf32>
    %771 = arith.addf %756, %770 : vector<2x1x256xf32>
    %c206_i32 = arith.constant 206 : i32
    %772 = tpu.dynamic_rotate %4 by %c206_i32 dim 2 : vector<2x1x256xf32>, i32 -> vector<2x1x256xf32>
    %c206_i32_118 = arith.constant 206 : i32
    %773 = tpu.dynamic_rotate %6 by %c206_i32_118 dim 2 : vector<2x1x256xf32>, i32 -> vector<2x1x256xf32>
    %c47 = arith.constant 47 : index
    %774 = memref.load %arg2[%c47] : memref<98xf32, #tpu.memory_space<smem>>
    %c96 = arith.constant 96 : index
    %775 = memref.load %arg2[%c96] : memref<98xf32, #tpu.memory_space<smem>>
    %776 = vector.broadcast %774 : f32 to vector<2x1x256xf32>
    %777 = arith.mulf %772, %776 : vector<2x1x256xf32>
    %778 = vector.broadcast %775 : f32 to vector<2x1x256xf32>
    %779 = arith.mulf %773, %778 : vector<2x1x256xf32>
    %780 = arith.addf %777, %779 : vector<2x1x256xf32>
    %781 = arith.andi %697, %48 : vector<1x1x256xi1>
    %cst_119 = arith.constant 0.000000e+00 : f32
    %782 = vector.shape_cast %781 : vector<1x1x256xi1> to vector<1x1x256xi1>
    %783 = vector.broadcast %782 : vector<1x1x256xi1> to vector<2x1x256xi1>
    %784 = vector.broadcast %cst_119 : f32 to vector<2x1x256xf32>
    %785 = arith.select %783, %780, %784 : vector<2x1x256xi1>, vector<2x1x256xf32>
    %786 = arith.addf %771, %785 : vector<2x1x256xf32>
    %c205_i32 = arith.constant 205 : i32
    %787 = tpu.dynamic_rotate %4 by %c205_i32 dim 2 : vector<2x1x256xf32>, i32 -> vector<2x1x256xf32>
    %c205_i32_120 = arith.constant 205 : i32
    %788 = tpu.dynamic_rotate %6 by %c205_i32_120 dim 2 : vector<2x1x256xf32>, i32 -> vector<2x1x256xf32>
    %c48 = arith.constant 48 : index
    %789 = memref.load %arg2[%c48] : memref<98xf32, #tpu.memory_space<smem>>
    %c97 = arith.constant 97 : index
    %790 = memref.load %arg2[%c97] : memref<98xf32, #tpu.memory_space<smem>>
    %791 = vector.broadcast %789 : f32 to vector<2x1x256xf32>
    %792 = arith.mulf %787, %791 : vector<2x1x256xf32>
    %793 = vector.broadcast %790 : f32 to vector<2x1x256xf32>
    %794 = arith.mulf %788, %793 : vector<2x1x256xf32>
    %795 = arith.addf %792, %794 : vector<2x1x256xf32>
    %796 = arith.andi %697, %53 : vector<1x1x256xi1>
    %cst_121 = arith.constant 0.000000e+00 : f32
    %797 = vector.shape_cast %796 : vector<1x1x256xi1> to vector<1x1x256xi1>
    %798 = vector.broadcast %797 : vector<1x1x256xi1> to vector<2x1x256xi1>
    %799 = vector.broadcast %cst_121 : f32 to vector<2x1x256xf32>
    %800 = arith.select %798, %795, %799 : vector<2x1x256xi1>, vector<2x1x256xf32>
    %801 = arith.addf %786, %800 : vector<2x1x256xf32>
    %802 = arith.negf %801 : vector<2x1x256xf32>
    %803 = math.exp %802 : vector<2x1x256xf32>
    %cst_122 = arith.constant 1.000000e+00 : f32
    %804 = vector.broadcast %cst_122 : f32 to vector<2x1x256xf32>
    %805 = arith.addf %804, %803 : vector<2x1x256xf32>
    %806 = arith.divf %804, %805 : vector<2x1x256xf32>
    %c0_123 = arith.constant 0 : index
    %c0_124 = arith.constant 0 : index
    %c0_125 = arith.constant 0 : index
    %807 = vector.load %arg4[%c0_123, %c0_124, %c0_125] : memref<2x1x256xf32, #tpu.memory_space<vmem>>, vector<2x1x256xf32>
    tpu.vector_store %arg4[%c0_123, %c0_124, %c0_125], %806 {strides = array<i32>} : memref<2x1x256xf32, #tpu.memory_space<vmem>>, vector<2x1x256xf32>,
    return
  }
  func.func @transform_0(%arg0: i32) -> (i32, i32, i32) {
    %c0_i32 = arith.constant 0 : i32
    %c0_i32_0 = arith.constant 0 : i32
    %c0_i32_1 = arith.constant 0 : i32
    return %arg0, %c0_i32, %c0_i32_0 : i32, i32, i32
  }
  func.func @transform_1(%arg0: i32) -> i32 {
    %c0_i32 = arith.constant 0 : i32
    %c0_i32_0 = arith.constant 0 : i32
    return %c0_i32 : i32
  }
  func.func @transform_2(%arg0: i32) -> i32 {
    %c0_i32 = arith.constant 0 : i32
    %c0_i32_0 = arith.constant 0 : i32
    return %c0_i32 : i32
  }
  func.func @transform_3(%arg0: i32) -> (i32, i32, i32) {
    %c0_i32 = arith.constant 0 : i32
    %c0_i32_0 = arith.constant 0 : i32
    %c0_i32_1 = arith.constant 0 : i32
    return %arg0, %c0_i32, %c0_i32_0 : i32, i32, i32
  }
}

</mosaic_0001>

<bundles_post_ra>
// kernel: tpu_custom_call.1
= control target key start
LH: loop header
LB: loop body
LE: loop exit
PB: predicated region body
PF: predicated region fallthrough
CT: control target
= control target key end

     0   :  { %9 = vsyncpa [#allocation4], 0  ;;  %s7269_s0 = inlined_call_operand.hbm [shape: f32[2,4,256], index: 0, kind: input, shape index: {}]   ;;  %s7270_s1 = inlined_call_operand.vmem [shape: f32[98], index: 1, kind: input, shape index: {}]   ;;  %s7271_s2 = inlined_call_operand.<no memory space> [shape: f32[1], index: 2, kind: input, shape index: {}]   ;;  %s7272_s3 = inlined_call_operand.hbm [shape: f32[2,1,256], index: 3, kind: output, shape index: {}]  }
   0x1   :  { %10 = vsyncpa [#allocation6], 0 }
   0x2   :  { %11 = vsyncpa [#allocation5], 0  ;;  %s3169_s12 = smov [#allocation3]   ;;  %s30_s16 = sshll.u32 %s7270_s1, 4  ;;  %s31_s16 = int_to_ptr.vmem [resolvable:$true] %s30_s16 }
   0x3   :  { %s17_s13 = sshll.u32 %s3169_s12, 4  ;;  %s3107_s19 = scalar_lea.hbm %s7269_s0, 256  ;;  %s18_s13 = int_to_ptr.vmem [resolvable:$true] %s17_s13 }
   0x4   :  { %p3108_p0 = scmp.ne.s32.totalorder %s7269_s0, %s3107_s19  ;;  %p3111_p1 = scmp.lt.u32.totalorder %s3107_s19, %s7269_s0 }
   0x6   :  { %p3113_p2 = pnand %p3111_p1, %p3108_p0 }
   0x8   :  { %3116 = shalt.err (!%p3113_p2)
}
   0x9   :  { %s3117_s24 = scalar_lea.vmem %s18_s13, 256  ;;  %p3122_p4 = scmp.lt.s32.totalorder %s18_s13, %s18_s13 }
   0xa   :  { %p3118_p3 = scmp.ne.s32.totalorder %s18_s13, %s3117_s24  ;;  %p3123_p5 = scmp.lt.s32.totalorder %s3117_s24, %s3117_s24 }
   0xc   :  { %p3124_p6 = por %p3123_p5, %p3122_p4 }
   0xe   :  { %p3125_p7 = pnand %p3124_p6, %p3118_p3 }
  0x10   :  { %3128 = shalt.err (!%p3125_p7)
}
  0x11   :  { %s3170_s1 = smov 128   ;;  %s3171_s25 = smov 8  }
  0x12   :  { %23 = dma.hbm_to_vmem [thread:$0]  %s7269_s0, 256, %s18_s13, [#allocation4], %s3170_s1, %s3170_s1, %s3171_s25  }
  0x13   :  { %s3129_s28 = scalar_lea.vmem %s31_s16, 16  ;;  %p3134_p9 = scmp.lt.s32.totalorder %s31_s16, %s31_s16 }
  0x14   :  { %p3130_p8 = scmp.ne.s32.totalorder %s31_s16, %s3129_s28  ;;  %p3135_p10 = scmp.lt.s32.totalorder %s3129_s28, %s3129_s28 }
  0x16   :  { %p3136_p11 = por %p3135_p10, %p3134_p9 }
  0x18   :  { %p3137_p12 = pnand %p3136_p11, %p3130_p8 }
  0x1a   :  { %3140 = shalt.err (!%p3137_p12)
}
  0x1b   :  { %s3172_s29 = smov [#allocation7]  }
  0x1c   :  { %33 = dma.vmem_to_smem %s31_s16, 16, %s3172_s29, [#allocation6]  }
  0x1d   :  { %3163 = dma.done.wait [#allocation4], 256  }
  0x1e   :  { %3164 = vsyncadd [#allocation4], 4294967040 }
  0x1f   :  { %3165 = dma.done.wait [#allocation6], 16  }
  0x20   :  { %3166 = vsyncadd [#allocation6], 4294967280 }
  0x21   :  { %42 = sfence }
  0x22   :  { %v44_v0 = vld [vmem:[#allocation3 + $0x8] sm:$0xff]  ;;  %vm51_vm0 = vcmask 1043456   ;;  %v43_v1 = vld [vmem:[#allocation3] sm:$0xff]  ;;  %s3173_s0 = smov 51   ;;  %s3174_s30 = smov 50  }
  0x23   :  { %v99_v2 = vsel %vm51_vm0, %v44_v0, -inf  ;;  %v85_v3 = vsel %vm51_vm0, %v43_v1, -inf  ;;  %v48_v4 = vcombine.high %v44_v0, %v44_v0  ;;  %v52_v5 = vsel %vm51_vm0, %v43_v1, 0.0  ;;  %s3175_s4 = smov 49   ;;  %s3176_s5 = smov 48  }
  0x24   :  { %v100_v6 = vrot.slane %v99_v2, 4  ;;  %v86_v7 = vrot.slane %v85_v3, 4  ;;  %v53_v8 = vrot.slane %v52_v5, 4  ;;  %v66_v9 = vsel %vm51_vm0, %v44_v0, 0.0  ;;  %s3177_s6 = smov 47   ;;  %s3178_s7 = smov 46  }
  0x25   :  { %v106_v10 = vsel %vm51_vm0, %v48_v4, -inf  ;;  %v67_v11 = vrot.slane %v66_v9, 4  ;;  %v47_v12 = vcombine.high %v43_v1, %v43_v1  ;;  %v73_v13 = vsel %vm51_vm0, %v48_v4, 0.0  ;;  %s3179_s8 = smov 45   ;;  %s3180_s9 = smov 35  }
  0x26   :  { %v101_v14 = vmax.f32 %v99_v2, %v100_v6  ;;  %v87_v15 = vmax.f32 %v85_v3, %v86_v7  ;;  %v107_v16 = vrot.slane %v106_v10, 4  ;;  %v54_v17 = vadd.f32 %v53_v8, %v52_v5  ;;  %s3181_s10 = smov 34   ;;  %s3182_s11 = smov 33  }
  0x27   :  { %v68_v18 = vadd.f32 %v67_v11, %v66_v9  ;;  %v92_v19 = vsel %vm51_vm0, %v47_v12, -inf  ;;  %v59_v20 = vsel %vm51_vm0, %v47_v12, 0.0  ;;  %v74_v21 = vrot.slane %v73_v13, 4  ;;  %s3183_s12 = smov 32   ;;  %s3184_s13 = smov 31  }
  0x28   :  { %v102_v22 = vrot.slane %v101_v14, 2  ;;  %v88_v23 = vrot.slane %v87_v15, 2  ;;  %v108_v24 = vmax.f32 %v106_v10, %v107_v16  ;;  %v55_v25 = vrot.slane %v54_v17, 2  ;;  %s3185_s14 = smov 30   ;;  %s3186_s15 = smov 29  }
  0x29   :  { %v69_v26 = vrot.slane %v68_v18, 2  ;;  %v93_v27 = vrot.slane %v92_v19, 4  ;;  %v60_v28 = vrot.slane %v59_v20, 4  ;;  %v75_v29 = vadd.f32 %v74_v21, %v73_v13  ;;  %s3187_s16 = smov 19   ;;  %s3188_s17 = smov 18  }
  0x2a   :  { %v103_v30 = vmax.f32 %v101_v14, %v102_v22  ;;  %v89_v31 = vmax.f32 %v87_v15, %v88_v23  ;;  %v109_v32 = vrot.slane %v108_v24, 2  ;;  %v56_v33 = vadd.f32 %v55_v25, %v54_v17  ;;  %s3189_s18 = smov 17   ;;  %s3190_s19 = smov 16  }
  0x2b   :  { %v70_v34 = vadd.f32 %v69_v26, %v68_v18  ;;  %v94_v35 = vmax.f32 %v92_v19, %v93_v27  ;;  %v61_v36 = vadd.f32 %v60_v28, %v59_v20  ;;  %v76_v37 = vrot.slane %v75_v29, 2  ;;  %s3191_s20 = smov 15   ;;  %s3192_s21 = smov 14  }
  0x2c   :  { %v104_v38 = vrot.slane %v103_v30, 1  ;;  %v90_v39 = vrot.slane %v89_v31, 1  ;;  %v110_v40 = vmax.f32 %v108_v24, %v109_v32  ;;  %v57_v41 = vrot.slane %v56_v33, 1  ;;  %s3193_s22 = smov 13   ;;  %s3194_s23 = smov 3  }
  0x2d   :  { %v71_v42 = vrot.slane %v70_v34, 1  ;;  %v95_v43 = vrot.slane %v94_v35, 2  ;;  %v62_v44 = vrot.slane %v61_v36, 2  ;;  %v77_v50 = vadd.f32 %v76_v37, %v75_v29  ;;  %s3195_s24 = smov 2   ;;  %s3196_s1 = smov 1  }
  0x2e   :  { %v3266_v45 = vmax.f32 %v103_v30, %v104_v38  ;;  %v3268_v46 = vmax.f32 %v89_v31, %v90_v39  ;;  %v111_v47 = vrot.slane %v110_v40, 1  ;;  %v58_v48 = vadd.f32 %v57_v41, %v56_v33  ;;  %s3197_s25 = smov 127   ;;  %s3198_s26 = smov 126  }
  0x2f   :  { %v63_v49 = vadd.f32 %v62_v44, %v61_v36  ;;  %v72_v53 = vadd.f32 %v71_v42, %v70_v34  ;;  %v96_v54 = vmax.f32 %v94_v35, %v95_v43  ;;  %v78_v59 = vrot.slane %v77_v50, 1  ;;  %s2934_s27 = sld [smem:[#allocation7 + $0x18]]  ;;  %s3199_s28 = smov 125  }
  0x30   :  { %219 = vrot.lane.b32.xlu1 %v3266_v45, %s3173_s0  ;;  %217 = vrot.lane.b32.xlu0 %v3268_v46, %s3173_s0  ;;  %v3272_v51 = vmax.f32 %v110_v40, %v111_v47  ;;  %v3274_v52 = vmul.f32 0.25, %v58_v48  ;;  %s2935_s29 = sld [smem:[#allocation7 + $0x49]] }
  0x31   :  { %v64_v55 = vrot.slane %v63_v49, 1  ;;  %v3278_v56 = vmul.f32 0.25, %v72_v53  ;;  %v97_v57 = vrot.slane %v96_v54, 1  ;;  %v79_v62 = vadd.f32 %v78_v59, %v77_v50 }
  0x33   :  { %v65_v58 = vadd.f32 %v64_v55, %v63_v49  ;;  %v3282_v60 = vmax.f32 %v96_v54, %v97_v57  ;;  %v3288_v63 = vmul.f32 0.25, %v79_v62 }
  0x34   :  { %223 = vrot.lane.b32.xlu1 %v3272_v51, %s3173_s0  ;;  %204 = vrot.lane.b32.xlu0 %v3274_v52, %s3173_s0 }
  0x35   :  { %v3284_v61 = vmul.f32 0.25, %v65_v58 }
  0x38   :  { %261 = vrot.lane.b32.xlu1 %v3278_v56, %s3174_s30  ;;  %206 = vrot.lane.b32.xlu0 %v3278_v56, %s3173_s0 }
  0x3c   :  { %221 = vrot.lane.b32.xlu0 %v3282_v60, %s3173_s0  ;;  %208 = vrot.lane.b32.xlu1 %v3284_v61, %s3173_s0 }
  0x40   :  { %259 = vrot.lane.b32.xlu0 %v3274_v52, %s3174_s30  ;;  %210 = vrot.lane.b32.xlu1 %v3288_v63, %s3173_s0  ;;  %s3824_s0 = sld [smem:[#allocation7]] }
  0x44   :  { %263 = vrot.lane.b32.xlu0 %v3284_v61, %s3174_s30  ;;  %265 = vrot.lane.b32.xlu1 %v3288_v63, %s3174_s30 }
  0x48   :  { %272 = vrot.lane.b32.xlu0 %v3268_v46, %s3174_s30  ;;  %274 = vrot.lane.b32.xlu1 %v3266_v45, %s3174_s30 }
  0x4c   :  { %276 = vrot.lane.b32.xlu0 %v3282_v60, %s3174_s30  ;;  %278 = vrot.lane.b32.xlu1 %v3272_v51, %s3174_s30  ;;  %s3833_s30 = sld [smem:[#allocation7 + $0x31]] }
  0x50   :  { %314 = vrot.lane.b32.xlu0 %v3274_v52, %s3175_s4  ;;  %316 = vrot.lane.b32.xlu1 %v3278_v56, %s3175_s4 }
  0x54   :  { %318 = vrot.lane.b32.xlu0 %v3284_v61, %s3175_s4  ;;  %320 = vrot.lane.b32.xlu1 %v3288_v63, %s3175_s4 }
  0x58   :  { %327 = vrot.lane.b32.xlu0 %v3268_v46, %s3175_s4  ;;  %329 = vrot.lane.b32.xlu1 %v3266_v45, %s3175_s4 }
  0x5c   :  { %331 = vrot.lane.b32.xlu0 %v3282_v60, %s3175_s4  ;;  %333 = vrot.lane.b32.xlu1 %v3272_v51, %s3175_s4  ;;  %s3841_s4 = sld [smem:[#allocation7 + $0x1]] }
  0x60   :  { %369 = vrot.lane.b32.xlu0 %v3274_v52, %s3176_s5  ;;  %371 = vrot.lane.b32.xlu1 %v3278_v56, %s3176_s5 }
  0x64   :  { %373 = vrot.lane.b32.xlu0 %v3284_v61, %s3176_s5  ;;  %375 = vrot.lane.b32.xlu1 %v3288_v63, %s3176_s5 }
  0x68   :  { %382 = vrot.lane.b32.xlu0 %v3268_v46, %s3176_s5  ;;  %384 = vrot.lane.b32.xlu1 %v3266_v45, %s3176_s5 }
  0x6c   :  { %386 = vrot.lane.b32.xlu0 %v3282_v60, %s3176_s5  ;;  %388 = vrot.lane.b32.xlu1 %v3272_v51, %s3176_s5  ;;  %s4409_s5 = sld [smem:[#allocation7 + $0xd]] }
  0x70   :  { %422 = vrot.lane.b32.xlu0 %v3274_v52, %s3177_s6  ;;  %424 = vrot.lane.b32.xlu1 %v3278_v56, %s3177_s6 }
  0x74   :  { %426 = vrot.lane.b32.xlu0 %v3284_v61, %s3177_s6  ;;  %428 = vrot.lane.b32.xlu1 %v3288_v63, %s3177_s6 }
  0x78   :  { %435 = vrot.lane.b32.xlu0 %v3268_v46, %s3177_s6  ;;  %437 = vrot.lane.b32.xlu1 %v3266_v45, %s3177_s6 }
  0x7c   :  { %439 = vrot.lane.b32.xlu0 %v3282_v60, %s3177_s6  ;;  %441 = vrot.lane.b32.xlu1 %v3272_v51, %s3177_s6  ;;  %s4411_s6 = sld [smem:[#allocation7 + $0x3e]] }
  0x80   :  { %477 = vrot.lane.b32.xlu0 %v3274_v52, %s3178_s7  ;;  %479 = vrot.lane.b32.xlu1 %v3278_v56, %s3178_s7 }
  0x84   :  { %481 = vrot.lane.b32.xlu0 %v3284_v61, %s3178_s7  ;;  %483 = vrot.lane.b32.xlu1 %v3288_v63, %s3178_s7 }
  0x88   :  { %490 = vrot.lane.b32.xlu0 %v3268_v46, %s3178_s7  ;;  %492 = vrot.lane.b32.xlu1 %v3266_v45, %s3178_s7 }
  0x8c   :  { %494 = vrot.lane.b32.xlu0 %v3282_v60, %s3178_s7  ;;  %496 = vrot.lane.b32.xlu1 %v3272_v51, %s3178_s7  ;;  %s3849_s7 = sld [smem:[#allocation7 + $0x32]] }
  0x90   :  { %532 = vrot.lane.b32.xlu0 %v3274_v52, %s3179_s8  ;;  %534 = vrot.lane.b32.xlu1 %v3278_v56, %s3179_s8 }
  0x94   :  { %536 = vrot.lane.b32.xlu0 %v3284_v61, %s3179_s8  ;;  %538 = vrot.lane.b32.xlu1 %v3288_v63, %s3179_s8 }
  0x98   :  { %545 = vrot.lane.b32.xlu0 %v3268_v46, %s3179_s8  ;;  %547 = vrot.lane.b32.xlu1 %v3266_v45, %s3179_s8 }
  0x9c   :  { %549 = vrot.lane.b32.xlu0 %v3282_v60, %s3179_s8  ;;  %551 = vrot.lane.b32.xlu1 %v3272_v51, %s3179_s8  ;;  %s3851_s8 = sld [smem:[#allocation7 + $0x2]] }
  0xa0   :  { %593 = vrot.lane.b32.xlu0 %v3274_v52, %s3180_s9  ;;  %595 = vrot.lane.b32.xlu1 %v3278_v56, %s3180_s9 }
  0xa2   :  { %v3340_v0 = vpop.permute.xlu1 %219  ;;  %v3342_v1 = vpop.permute.xlu0 %217 }
  0xa4   :  { %597 = vrot.lane.b32.xlu0 %v3284_v61, %s3180_s9  ;;  %599 = vrot.lane.b32.xlu1 %v3288_v63, %s3180_s9 }
  0xa6   :  { %v3346_v2 = vpop.permute.xlu1 %223  ;;  %v3348_v3 = vpop.permute.xlu0 %204 }
  0xa8   :  { %606 = vrot.lane.b32.xlu0 %v3268_v46, %s3180_s9  ;;  %608 = vrot.lane.b32.xlu1 %v3266_v45, %s3180_s9 }
  0xaa   :  { %v3352_v4 = vpop.permute.xlu1 %261  ;;  %v3354_v5 = vpop.permute.xlu0 %206 }
  0xac   :  { %610 = vrot.lane.b32.xlu0 %v3282_v60, %s3180_s9  ;;  %612 = vrot.lane.b32.xlu1 %v3272_v51, %s3180_s9  ;;  %s3857_s9 = sld [smem:[#allocation7 + $0x33]] }
  0xae   :  { %v3358_v6 = vpop.permute.xlu0 %221  ;;  %v3360_v7 = vpop.permute.xlu1 %208 }
  0xb0   :  { %648 = vrot.lane.b32.xlu0 %v3274_v52, %s3181_s10  ;;  %650 = vrot.lane.b32.xlu1 %v3278_v56, %s3181_s10 }
  0xb2   :  { %v3364_v8 = vpop.permute.xlu0 %259  ;;  %v3366_v9 = vpop.permute.xlu1 %210 }
  0xb4   :  { %652 = vrot.lane.b32.xlu0 %v3284_v61, %s3181_s10  ;;  %654 = vrot.lane.b32.xlu1 %v3288_v63, %s3181_s10 }
  0xb6   :  { %v3370_v10 = vpop.permute.xlu0 %263  ;;  %v3372_v11 = vpop.permute.xlu1 %265 }
  0xb8   :  { %661 = vrot.lane.b32.xlu0 %v3268_v46, %s3181_s10  ;;  %663 = vrot.lane.b32.xlu1 %v3266_v45, %s3181_s10 }
  0xba   :  { %v3376_v12 = vpop.permute.xlu0 %272  ;;  %v3378_v13 = vpop.permute.xlu1 %274 }
  0xbc   :  { %665 = vrot.lane.b32.xlu0 %v3282_v60, %s3181_s10  ;;  %667 = vrot.lane.b32.xlu1 %v3272_v51, %s3181_s10  ;;  %s3859_s10 = sld [smem:[#allocation7 + $0x3]] }
  0xbe   :  { %v3382_v14 = vpop.permute.xlu0 %276  ;;  %v3384_v15 = vpop.permute.xlu1 %278 }
  0xc0   :  { %703 = vrot.lane.b32.xlu0 %v3274_v52, %s3182_s11  ;;  %705 = vrot.lane.b32.xlu1 %v3278_v56, %s3182_s11 }
  0xc2   :  { %v3388_v16 = vpop.permute.xlu0 %314  ;;  %v3390_v17 = vpop.permute.xlu1 %316 }
  0xc4   :  { %707 = vrot.lane.b32.xlu0 %v3284_v61, %s3182_s11  ;;  %709 = vrot.lane.b32.xlu1 %v3288_v63, %s3182_s11 }
  0xc6   :  { %v3394_v18 = vpop.permute.xlu0 %318  ;;  %v3396_v19 = vpop.permute.xlu1 %320 }
  0xc8   :  { %716 = vrot.lane.b32.xlu0 %v3268_v46, %s3182_s11  ;;  %718 = vrot.lane.b32.xlu1 %v3266_v45, %s3182_s11 }
  0xca   :  { %v3400_v20 = vpop.permute.xlu0 %327  ;;  %v3402_v21 = vpop.permute.xlu1 %329 }
  0xcc   :  { %720 = vrot.lane.b32.xlu0 %v3282_v60, %s3182_s11  ;;  %722 = vrot.lane.b32.xlu1 %v3272_v51, %s3182_s11  ;;  %s3876_s11 = sld [smem:[#allocation7 + $0x4]] }
  0xce   :  { %v3406_v22 = vpop.permute.xlu0 %331  ;;  %v3408_v23 = vpop.permute.xlu1 %333 }
  0xd0   :  { %758 = vrot.lane.b32.xlu0 %v3274_v52, %s3183_s12  ;;  %760 = vrot.lane.b32.xlu1 %v3278_v56, %s3183_s12 }
  0xd2   :  { %v3414_v24 = vpop.permute.xlu0 %369  ;;  %v3416_v25 = vpop.permute.xlu1 %371 }
  0xd4   :  { %762 = vrot.lane.b32.xlu0 %v3284_v61, %s3183_s12  ;;  %764 = vrot.lane.b32.xlu1 %v3288_v63, %s3183_s12 }
  0xd6   :  { %v3422_v26 = vpop.permute.xlu0 %373  ;;  %v3424_v27 = vpop.permute.xlu1 %375 }
  0xd8   :  { %771 = vrot.lane.b32.xlu0 %v3268_v46, %s3183_s12  ;;  %773 = vrot.lane.b32.xlu1 %v3266_v45, %s3183_s12 }
  0xda   :  { %v3430_v28 = vpop.permute.xlu0 %382  ;;  %v3432_v29 = vpop.permute.xlu1 %384 }
  0xdc   :  { %775 = vrot.lane.b32.xlu0 %v3282_v60, %s3183_s12  ;;  %777 = vrot.lane.b32.xlu1 %v3272_v51, %s3183_s12 }
  0xde   :  { %v3438_v30 = vpop.permute.xlu0 %386  ;;  %v3440_v31 = vpop.permute.xlu1 %388 }
  0xe0   :  { %811 = vrot.lane.b32.xlu0 %v3274_v52, %s3184_s13  ;;  %813 = vrot.lane.b32.xlu1 %v3278_v56, %s3184_s13 }
  0xe2   :  { %v3444_v32 = vpop.permute.xlu0 %422  ;;  %v3446_v33 = vpop.permute.xlu1 %424 }
  0xe3   :  { %7500 = vst [vmem:[#allocation12_spill] sm:$0xff] %v3444_v32  ;;  %7501 = vst [vmem:[#allocation13_spill] sm:$0xff] %v3446_v33  ;;  %v3944_v32 = vstv %s3851_s8  ;;  %s4459_s8 = sld [smem:[#allocation7 + $0x3f]] }
  0xe4   :  { %815 = vrot.lane.b32.xlu0 %v3284_v61, %s3184_s13  ;;  %817 = vrot.lane.b32.xlu1 %v3288_v63, %s3184_s13 }
  0xe6   :  { %v3450_v34 = vpop.permute.xlu0 %426  ;;  %v3452_v35 = vpop.permute.xlu1 %428 }
  0xe7   :  { %7502 = vst [vmem:[#allocation14_spill] sm:$0xff] %v3450_v34  ;;  %7503 = vst [vmem:[#allocation15_spill] sm:$0xff] %v3452_v35 }
  0xe8   :  { %824 = vrot.lane.b32.xlu0 %v3268_v46, %s3184_s13  ;;  %826 = vrot.lane.b32.xlu1 %v3266_v45, %s3184_s13 }
  0xea   :  { %v3456_v36 = vpop.permute.xlu0 %435  ;;  %v3458_v37 = vpop.permute.xlu1 %437 }
  0xeb   :  { %7504 = vst [vmem:[#allocation16_spill] sm:$0xff] %v3456_v36  ;;  %7505 = vst [vmem:[#allocation17_spill] sm:$0xff] %v3458_v37 }
  0xec   :  { %828 = vrot.lane.b32.xlu0 %v3282_v60, %s3184_s13  ;;  %830 = vrot.lane.b32.xlu1 %v3272_v51, %s3184_s13  ;;  %s3878_s13 = sld [smem:[#allocation7 + $0x35]] }
  0xee   :  { %v3462_v38 = vpop.permute.xlu0 %439  ;;  %v3464_v39 = vpop.permute.xlu1 %441 }
  0xef   :  { %7506 = vst [vmem:[#allocation18_spill] sm:$0xff] %v3462_v38  ;;  %7507 = vst [vmem:[#allocation19_spill] sm:$0xff] %v3464_v39 }
  0xf0   :  { %866 = vrot.lane.b32.xlu0 %v3274_v52, %s3185_s14  ;;  %868 = vrot.lane.b32.xlu1 %v3278_v56, %s3185_s14 }
  0xf2   :  { %v3468_v40 = vpop.permute.xlu0 %477  ;;  %v3470_v41 = vpop.permute.xlu1 %479 }
  0xf3   :  { %7508 = vst [vmem:[#allocation20_spill] sm:$0xff] %v3468_v40  ;;  %7509 = vst [vmem:[#allocation21_spill] sm:$0xff] %v3470_v41 }
  0xf4   :  { %870 = vrot.lane.b32.xlu0 %v3284_v61, %s3185_s14  ;;  %872 = vrot.lane.b32.xlu1 %v3288_v63, %s3185_s14 }
  0xf6   :  { %v3474_v42 = vpop.permute.xlu0 %481  ;;  %v3476_v43 = vpop.permute.xlu1 %483 }
  0xf7   :  { %7510 = vst [vmem:[#allocation22_spill] sm:$0xff] %v3474_v42  ;;  %7511 = vst [vmem:[#allocation23_spill] sm:$0xff] %v3476_v43 }
  0xf8   :  { %879 = vrot.lane.b32.xlu0 %v3268_v46, %s3185_s14  ;;  %881 = vrot.lane.b32.xlu1 %v3266_v45, %s3185_s14 }
  0xfa   :  { %v3480_v44 = vpop.permute.xlu0 %490  ;;  %v3482_v47 = vpop.permute.xlu1 %492 }
  0xfb   :  { %7512 = vst [vmem:[#allocation24_spill] sm:$0xff] %v3480_v44  ;;  %7513 = vst [vmem:[#allocation25_spill] sm:$0xff] %v3482_v47  ;;  %v3883_v44 = vstv %s3824_s0  ;;  %s3202_s0 = smov 113  }
  0xfc   :  { %883 = vrot.lane.b32.xlu0 %v3282_v60, %s3185_s14  ;;  %885 = vrot.lane.b32.xlu1 %v3272_v51, %s3185_s14  ;;  %s3887_s14 = sld [smem:[#allocation7 + $0x5]] }
  0xfe   :  { %v3486_v48 = vpop.permute.xlu0 %494  ;;  %v3488_v49 = vpop.permute.xlu1 %496 }
  0xff   :  { %7514 = vst [vmem:[#allocation26_spill] sm:$0xff] %v3486_v48  ;;  %7515 = vst [vmem:[#allocation27_spill] sm:$0xff] %v3488_v49 }
 0x100   :  { %921 = vrot.lane.b32.xlu0 %v3274_v52, %s3186_s15  ;;  %923 = vrot.lane.b32.xlu1 %v3278_v56, %s3186_s15 }
 0x102   :  { %v3492_v50 = vpop.permute.xlu0 %532  ;;  %v3494_v53 = vpop.permute.xlu1 %534 }
 0x103   :  { %7516 = vst [vmem:[#allocation28_spill] sm:$0xff] %v3492_v50  ;;  %7517 = vst [vmem:[#allocation29_spill] sm:$0xff] %v3494_v53 }
 0x104   :  { %925 = vrot.lane.b32.xlu0 %v3284_v61, %s3186_s15  ;;  %927 = vrot.lane.b32.xlu1 %v3288_v63, %s3186_s15 }
 0x106   :  { %v3498_v54 = vpop.permute.xlu0 %536  ;;  %v3500_v55 = vpop.permute.xlu1 %538 }
 0x107   :  { %7518 = vst [vmem:[#allocation30_spill] sm:$0xff] %v3498_v54  ;;  %7519 = vst [vmem:[#allocation31_spill] sm:$0xff] %v3500_v55 }
 0x108   :  { %934 = vrot.lane.b32.xlu0 %v3268_v46, %s3186_s15  ;;  %936 = vrot.lane.b32.xlu1 %v3266_v45, %s3186_s15 }
 0x10a   :  { %v3504_v57 = vpop.permute.xlu0 %545  ;;  %v3506_v58 = vpop.permute.xlu1 %547 }
 0x10b   :  { %7520 = vst [vmem:[#allocation32_spill] sm:$0xff] %v3504_v57  ;;  %7521 = vst [vmem:[#allocation33_spill] sm:$0xff] %v3506_v58 }
 0x10c   :  { %938 = vrot.lane.b32.xlu0 %v3282_v60, %s3186_s15  ;;  %940 = vrot.lane.b32.xlu1 %v3272_v51, %s3186_s15  ;;  %s3889_s15 = sld [smem:[#allocation7 + $0x36]] }
 0x10e   :  { %v3510_v59 = vpop.permute.xlu0 %549  ;;  %v3512_v62 = vpop.permute.xlu1 %551 }
 0x10f   :  { %7522 = vst [vmem:[#allocation34_spill] sm:$0xff] %v3510_v59  ;;  %7523 = vst [vmem:[#allocation35_spill] sm:$0xff] %v3512_v62 }
 0x110   :  { %982 = vrot.lane.b32.xlu0 %v3274_v52, %s3187_s16  ;;  %984 = vrot.lane.b32.xlu1 %v3278_v56, %s3187_s16 }
 0x112   :  { %v3516_v53 = vpop.permute.xlu0 %593  ;;  %v3518_v55 = vpop.permute.xlu1 %595  ;;  %v3983_v38 = vstv %s3889_s15  ;;  %s4700_s15 = sld [smem:[#allocation7 + $0x11]] }
 0x113   :  { %7524 = vst [vmem:[#allocation36_spill] sm:$0xff] %v3516_v53  ;;  %7525 = vst [vmem:[#allocation37_spill] sm:$0xff] %v3518_v55 }
 0x114   :  { %986 = vrot.lane.b32.xlu0 %v3284_v61, %s3187_s16  ;;  %988 = vrot.lane.b32.xlu1 %v3288_v63, %s3187_s16 }
 0x116   :  { %v3522_v54 = vpop.permute.xlu0 %597  ;;  %v3524_v50 = vpop.permute.xlu1 %599 }
 0x117   :  { %7526 = vst [vmem:[#allocation38_spill] sm:$0xff] %v3522_v54  ;;  %7527 = vst [vmem:[#allocation39_spill] sm:$0xff] %v3524_v50 }
 0x118   :  { %995 = vrot.lane.b32.xlu0 %v3268_v46, %s3187_s16  ;;  %997 = vrot.lane.b32.xlu1 %v3266_v45, %s3187_s16 }
 0x11a   :  { %v3528_v58 = vpop.permute.xlu0 %606  ;;  %v3530_v62 = vpop.permute.xlu1 %608 }
 0x11b   :  { %7528 = vst [vmem:[#allocation40_spill] sm:$0xff] %v3528_v58  ;;  %7529 = vst [vmem:[#allocation41_spill] sm:$0xff] %v3530_v62 }
 0x11c   :  { %999 = vrot.lane.b32.xlu0 %v3282_v60, %s3187_s16  ;;  %1001 = vrot.lane.b32.xlu1 %v3272_v51, %s3187_s16  ;;  %s3901_s16 = sld [smem:[#allocation7 + $0x6]] }
 0x11e   :  { %v3534_v55 = vpop.permute.xlu0 %610  ;;  %v3536_v53 = vpop.permute.xlu1 %612 }
 0x11f   :  { %7530 = vst [vmem:[#allocation42_spill] sm:$0xff] %v3534_v55  ;;  %7531 = vst [vmem:[#allocation43_spill] sm:$0xff] %v3536_v53 }
 0x120   :  { %1037 = vrot.lane.b32.xlu0 %v3274_v52, %s3188_s17  ;;  %1039 = vrot.lane.b32.xlu1 %v3278_v56, %s3188_s17 }
 0x122   :  { %v3540_v50 = vpop.permute.xlu0 %648  ;;  %v3542_v54 = vpop.permute.xlu1 %650 }
 0x123   :  { %7532 = vst [vmem:[#allocation44_spill] sm:$0xff] %v3540_v50  ;;  %7533 = vst [vmem:[#allocation45_spill] sm:$0xff] %v3542_v54 }
 0x124   :  { %1041 = vrot.lane.b32.xlu0 %v3284_v61, %s3188_s17  ;;  %1043 = vrot.lane.b32.xlu1 %v3288_v63, %s3188_s17 }
 0x126   :  { %v3546_v62 = vpop.permute.xlu0 %652  ;;  %v3548_v58 = vpop.permute.xlu1 %654 }
 0x127   :  { %7534 = vst [vmem:[#allocation46_spill] sm:$0xff] %v3546_v62  ;;  %7535 = vst [vmem:[#allocation47_spill] sm:$0xff] %v3548_v58 }
 0x128   :  { %1050 = vrot.lane.b32.xlu0 %v3268_v46, %s3188_s17  ;;  %1052 = vrot.lane.b32.xlu1 %v3266_v45, %s3188_s17 }
 0x12a   :  { %v3552_v53 = vpop.permute.xlu0 %661  ;;  %v3554_v55 = vpop.permute.xlu1 %663 }
 0x12b   :  { %7536 = vst [vmem:[#allocation48_spill] sm:$0xff] %v3552_v53  ;;  %7537 = vst [vmem:[#allocation49_spill] sm:$0xff] %v3554_v55 }
 0x12c   :  { %1054 = vrot.lane.b32.xlu0 %v3282_v60, %s3188_s17  ;;  %1056 = vrot.lane.b32.xlu1 %v3272_v51, %s3188_s17  ;;  %s3903_s17 = sld [smem:[#allocation7 + $0x37]] }
 0x12e   :  { %v3558_v54 = vpop.permute.xlu0 %665  ;;  %v3560_v50 = vpop.permute.xlu1 %667 }
 0x12f   :  { %7538 = vst [vmem:[#allocation50_spill] sm:$0xff] %v3558_v54  ;;  %7539 = vst [vmem:[#allocation51_spill] sm:$0xff] %v3560_v50 }
 0x130   :  { %1092 = vrot.lane.b32.xlu0 %v3274_v52, %s3189_s18  ;;  %1094 = vrot.lane.b32.xlu1 %v3278_v56, %s3189_s18 }
 0x132   :  { %v3564_v58 = vpop.permute.xlu0 %703  ;;  %v3566_v62 = vpop.permute.xlu1 %705 }
 0x133   :  { %7540 = vst [vmem:[#allocation52_spill] sm:$0xff] %v3564_v58  ;;  %7541 = vst [vmem:[#allocation53_spill] sm:$0xff] %v3566_v62 }
 0x134   :  { %1096 = vrot.lane.b32.xlu0 %v3284_v61, %s3189_s18  ;;  %1098 = vrot.lane.b32.xlu1 %v3288_v63, %s3189_s18 }
 0x136   :  { %v3570_v55 = vpop.permute.xlu0 %707  ;;  %v3572_v53 = vpop.permute.xlu1 %709 }
 0x137   :  { %7542 = vst [vmem:[#allocation54_spill] sm:$0xff] %v3570_v55  ;;  %7543 = vst [vmem:[#allocation55_spill] sm:$0xff] %v3572_v53 }
 0x138   :  { %1105 = vrot.lane.b32.xlu0 %v3268_v46, %s3189_s18  ;;  %1107 = vrot.lane.b32.xlu1 %v3266_v45, %s3189_s18 }
 0x13a   :  { %v3576_v50 = vpop.permute.xlu0 %716  ;;  %v3578_v54 = vpop.permute.xlu1 %718 }
 0x13b   :  { %7544 = vst [vmem:[#allocation56_spill] sm:$0xff] %v3576_v50  ;;  %7545 = vst [vmem:[#allocation57_spill] sm:$0xff] %v3578_v54 }
 0x13c   :  { %1109 = vrot.lane.b32.xlu0 %v3282_v60, %s3189_s18  ;;  %1111 = vrot.lane.b32.xlu1 %v3272_v51, %s3189_s18  ;;  %s3200_s18 = smov 115  }
 0x13e   :  { %v3582_v62 = vpop.permute.xlu0 %720  ;;  %v3584_v58 = vpop.permute.xlu1 %722 }
 0x13f   :  { %7546 = vst [vmem:[#allocation58_spill] sm:$0xff] %v3582_v62  ;;  %7547 = vst [vmem:[#allocation59_spill] sm:$0xff] %v3584_v58 }
 0x140   :  { %1147 = vrot.lane.b32.xlu0 %v3274_v52, %s3190_s19  ;;  %1149 = vrot.lane.b32.xlu1 %v3278_v56, %s3190_s19 }
 0x142   :  { %v3588_v53 = vpop.permute.xlu0 %758  ;;  %v3590_v55 = vpop.permute.xlu1 %760 }
 0x143   :  { %7548 = vst [vmem:[#allocation60_spill] sm:$0xff] %v3588_v53  ;;  %7549 = vst [vmem:[#allocation61_spill] sm:$0xff] %v3590_v55 }
 0x144   :  { %1151 = vrot.lane.b32.xlu0 %v3284_v61, %s3190_s19  ;;  %1153 = vrot.lane.b32.xlu1 %v3288_v63, %s3190_s19 }
 0x146   :  { %v3594_v54 = vpop.permute.xlu0 %762  ;;  %v3596_v50 = vpop.permute.xlu1 %764 }
 0x147   :  { %7550 = vst [vmem:[#allocation62_spill] sm:$0xff] %v3594_v54  ;;  %7551 = vst [vmem:[#allocation63_spill] sm:$0xff] %v3596_v50 }
 0x148   :  { %1160 = vrot.lane.b32.xlu0 %v3268_v46, %s3190_s19  ;;  %1162 = vrot.lane.b32.xlu1 %v3266_v45, %s3190_s19 }
 0x14a   :  { %v3600_v58 = vpop.permute.xlu0 %771  ;;  %v3602_v62 = vpop.permute.xlu1 %773 }
 0x14b   :  { %7552 = vst [vmem:[#allocation64_spill] sm:$0xff] %v3600_v58  ;;  %7553 = vst [vmem:[#allocation65_spill] sm:$0xff] %v3602_v62 }
 0x14c   :  { %1164 = vrot.lane.b32.xlu0 %v3282_v60, %s3190_s19  ;;  %1166 = vrot.lane.b32.xlu1 %v3272_v51, %s3190_s19  ;;  %s3910_s19 = sld [smem:[#allocation7 + $0x7]] }
 0x14e   :  { %v3606_v55 = vpop.permute.xlu0 %775  ;;  %v3608_v53 = vpop.permute.xlu1 %777 }
 0x14f   :  { %7554 = vst [vmem:[#allocation66_spill] sm:$0xff] %v3606_v55  ;;  %7555 = vst [vmem:[#allocation67_spill] sm:$0xff] %v3608_v53 }
 0x150   :  { %1200 = vrot.lane.b32.xlu0 %v3274_v52, %s3191_s20  ;;  %1202 = vrot.lane.b32.xlu1 %v3278_v56, %s3191_s20 }
 0x152   :  { %v3612_v50 = vpop.permute.xlu0 %811  ;;  %v3614_v54 = vpop.permute.xlu1 %813 }
 0x153   :  { %7556 = vst [vmem:[#allocation68_spill] sm:$0xff] %v3612_v50  ;;  %7557 = vst [vmem:[#allocation69_spill] sm:$0xff] %v3614_v54 }
 0x154   :  { %1204 = vrot.lane.b32.xlu0 %v3284_v61, %s3191_s20  ;;  %1206 = vrot.lane.b32.xlu1 %v3288_v63, %s3191_s20 }
 0x156   :  { %v3618_v62 = vpop.permute.xlu0 %815  ;;  %v3620_v58 = vpop.permute.xlu1 %817 }
 0x157   :  { %7558 = vst [vmem:[#allocation70_spill] sm:$0xff] %v3618_v62  ;;  %7559 = vst [vmem:[#allocation71_spill] sm:$0xff] %v3620_v58 }
 0x158   :  { %1213 = vrot.lane.b32.xlu0 %v3268_v46, %s3191_s20  ;;  %1215 = vrot.lane.b32.xlu1 %v3266_v45, %s3191_s20 }
 0x15a   :  { %v3624_v53 = vpop.permute.xlu0 %824  ;;  %v3626_v55 = vpop.permute.xlu1 %826 }
 0x15b   :  { %7560 = vst [vmem:[#allocation72_spill] sm:$0xff] %v3624_v53  ;;  %7561 = vst [vmem:[#allocation73_spill] sm:$0xff] %v3626_v55 }
 0x15c   :  { %1217 = vrot.lane.b32.xlu0 %v3282_v60, %s3191_s20  ;;  %1219 = vrot.lane.b32.xlu1 %v3272_v51, %s3191_s20  ;;  %s3912_s20 = sld [smem:[#allocation7 + $0x38]] }
 0x15e   :  { %v3630_v54 = vpop.permute.xlu0 %828  ;;  %v3632_v50 = vpop.permute.xlu1 %830 }
 0x15f   :  { %7562 = vst [vmem:[#allocation74_spill] sm:$0xff] %v3630_v54  ;;  %7563 = vst [vmem:[#allocation75_spill] sm:$0xff] %v3632_v50 }
 0x160   :  { %1255 = vrot.lane.b32.xlu0 %v3274_v52, %s3192_s21  ;;  %1257 = vrot.lane.b32.xlu1 %v3278_v56, %s3192_s21 }
 0x162   :  { %v3636_v58 = vpop.permute.xlu0 %866  ;;  %v3638_v62 = vpop.permute.xlu1 %868 }
 0x163   :  { %7564 = vst [vmem:[#allocation76_spill] sm:$0xff] %v3636_v58  ;;  %7565 = vst [vmem:[#allocation77_spill] sm:$0xff] %v3638_v62 }
 0x164   :  { %1259 = vrot.lane.b32.xlu0 %v3284_v61, %s3192_s21  ;;  %1261 = vrot.lane.b32.xlu1 %v3288_v63, %s3192_s21 }
 0x166   :  { %v3642_v55 = vpop.permute.xlu0 %870  ;;  %v3644_v53 = vpop.permute.xlu1 %872 }
 0x167   :  { %7566 = vst [vmem:[#allocation78_spill] sm:$0xff] %v3642_v55  ;;  %7567 = vst [vmem:[#allocation79_spill] sm:$0xff] %v3644_v53 }
 0x168   :  { %1268 = vrot.lane.b32.xlu0 %v3268_v46, %s3192_s21  ;;  %1270 = vrot.lane.b32.xlu1 %v3266_v45, %s3192_s21 }
 0x16a   :  { %v3648_v50 = vpop.permute.xlu0 %879  ;;  %v3650_v54 = vpop.permute.xlu1 %881 }
 0x16b   :  { %7568 = vst [vmem:[#allocation80_spill] sm:$0xff] %v3648_v50  ;;  %7569 = vst [vmem:[#allocation81_spill] sm:$0xff] %v3650_v54 }
 0x16c   :  { %1272 = vrot.lane.b32.xlu0 %v3282_v60, %s3192_s21  ;;  %1274 = vrot.lane.b32.xlu1 %v3272_v51, %s3192_s21  ;;  %s4063_s21 = sld [smem:[#allocation7 + $0x8]] }
 0x16e   :  { %v3654_v62 = vpop.permute.xlu0 %883  ;;  %v3656_v58 = vpop.permute.xlu1 %885 }
 0x16f   :  { %7570 = vst [vmem:[#allocation82_spill] sm:$0xff] %v3654_v62  ;;  %7571 = vst [vmem:[#allocation83_spill] sm:$0xff] %v3656_v58 }
 0x170   :  { %1310 = vrot.lane.b32.xlu0 %v3274_v52, %s3193_s22  ;;  %1312 = vrot.lane.b32.xlu1 %v3278_v56, %s3193_s22 }
 0x172   :  { %v3660_v53 = vpop.permute.xlu0 %921  ;;  %v3662_v55 = vpop.permute.xlu1 %923 }
 0x173   :  { %7572 = vst [vmem:[#allocation84_spill] sm:$0xff] %v3660_v53  ;;  %7573 = vst [vmem:[#allocation85_spill] sm:$0xff] %v3662_v55 }
 0x174   :  { %1314 = vrot.lane.b32.xlu0 %v3284_v61, %s3193_s22  ;;  %1316 = vrot.lane.b32.xlu1 %v3288_v63, %s3193_s22 }
 0x176   :  { %v3666_v54 = vpop.permute.xlu0 %925  ;;  %v3668_v50 = vpop.permute.xlu1 %927 }
 0x177   :  { %7574 = vst [vmem:[#allocation86_spill] sm:$0xff] %v3666_v54  ;;  %7575 = vst [vmem:[#allocation87_spill] sm:$0xff] %v3668_v50 }
 0x178   :  { %1323 = vrot.lane.b32.xlu0 %v3268_v46, %s3193_s22  ;;  %1325 = vrot.lane.b32.xlu1 %v3266_v45, %s3193_s22 }
 0x17a   :  { %v3672_v58 = vpop.permute.xlu0 %934  ;;  %v3674_v62 = vpop.permute.xlu1 %936 }
 0x17b   :  { %7576 = vst [vmem:[#allocation88_spill] sm:$0xff] %v3672_v58  ;;  %7577 = vst [vmem:[#allocation89_spill] sm:$0xff] %v3674_v62 }
 0x17c   :  { %1327 = vrot.lane.b32.xlu0 %v3282_v60, %s3193_s22  ;;  %1329 = vrot.lane.b32.xlu1 %v3272_v51, %s3193_s22  ;;  %s4100_s22 = sld [smem:[#allocation7 + $0x39]] }
 0x17e   :  { %v3678_v55 = vpop.permute.xlu0 %938  ;;  %v3680_v53 = vpop.permute.xlu1 %940 }
 0x17f   :  { %7578 = vst [vmem:[#allocation90_spill] sm:$0xff] %v3678_v55  ;;  %7579 = vst [vmem:[#allocation91_spill] sm:$0xff] %v3680_v53 }
 0x180   :  { %1365 = vrot.lane.b32.xlu0 %v3274_v52, %s3194_s23  ;;  %1367 = vrot.lane.b32.xlu1 %v3278_v56, %s3194_s23 }
 0x182   :  { %v3684_v50 = vpop.permute.xlu0 %982  ;;  %v3686_v54 = vpop.permute.xlu1 %984 }
 0x183   :  { %7580 = vst [vmem:[#allocation92_spill] sm:$0xff] %v3684_v50  ;;  %7581 = vst [vmem:[#allocation93_spill] sm:$0xff] %v3686_v54 }
 0x184   :  { %1369 = vrot.lane.b32.xlu0 %v3284_v61, %s3194_s23  ;;  %1371 = vrot.lane.b32.xlu1 %v3288_v63, %s3194_s23 }
 0x186   :  { %v3690_v62 = vpop.permute.xlu0 %986  ;;  %v3692_v58 = vpop.permute.xlu1 %988 }
 0x187   :  { %7582 = vst [vmem:[#allocation94_spill] sm:$0xff] %v3690_v62  ;;  %7583 = vst [vmem:[#allocation95_spill] sm:$0xff] %v3692_v58 }
 0x188   :  { %1378 = vrot.lane.b32.xlu0 %v3268_v46, %s3194_s23  ;;  %1380 = vrot.lane.b32.xlu1 %v3266_v45, %s3194_s23 }
 0x18a   :  { %v3696_v53 = vpop.permute.xlu0 %995  ;;  %v3698_v55 = vpop.permute.xlu1 %997 }
 0x18b   :  { %7584 = vst [vmem:[#allocation96_spill] sm:$0xff] %v3696_v53  ;;  %7585 = vst [vmem:[#allocation97_spill] sm:$0xff] %v3698_v55 }
 0x18c   :  { %1382 = vrot.lane.b32.xlu0 %v3282_v60, %s3194_s23  ;;  %1384 = vrot.lane.b32.xlu1 %v3272_v51, %s3194_s23  ;;  %s4102_s23 = sld [smem:[#allocation7 + $0x9]] }
 0x18e   :  { %v3702_v54 = vpop.permute.xlu0 %999  ;;  %v3704_v50 = vpop.permute.xlu1 %1001 }
 0x18f   :  { %7586 = vst [vmem:[#allocation98_spill] sm:$0xff] %v3702_v54  ;;  %7587 = vst [vmem:[#allocation99_spill] sm:$0xff] %v3704_v50 }
 0x190   :  { %1418 = vrot.lane.b32.xlu0 %v3274_v52, %s3195_s24  ;;  %1420 = vrot.lane.b32.xlu1 %v3278_v56, %s3195_s24 }
 0x192   :  { %v3710_v58 = vpop.permute.xlu0 %1037  ;;  %v3712_v62 = vpop.permute.xlu1 %1039 }
 0x193   :  { %7588 = vst [vmem:[#allocation100_spill] sm:$0xff] %v3710_v58  ;;  %7589 = vst [vmem:[#allocation101_spill] sm:$0xff] %v3712_v62 }
 0x194   :  { %1422 = vrot.lane.b32.xlu0 %v3284_v61, %s3195_s24  ;;  %1424 = vrot.lane.b32.xlu1 %v3288_v63, %s3195_s24 }
 0x196   :  { %v3718_v55 = vpop.permute.xlu0 %1041  ;;  %v3720_v50 = vpop.permute.xlu1 %1043 }
 0x197   :  { %7590 = vst [vmem:[#allocation102_spill] sm:$0xff] %v3718_v55  ;;  %7591 = vst [vmem:[#allocation103_spill] sm:$0xff] %v3720_v50 }
 0x198   :  { %1431 = vrot.lane.b32.xlu0 %v3268_v46, %s3195_s24  ;;  %1433 = vrot.lane.b32.xlu1 %v3266_v45, %s3195_s24 }
 0x19a   :  { %v3726_v54 = vpop.permute.xlu0 %1050  ;;  %v3728_v58 = vpop.permute.xlu1 %1052 }
 0x19b   :  { %7592 = vst [vmem:[#allocation104_spill] sm:$0xff] %v3726_v54  ;;  %7593 = vst [vmem:[#allocation105_spill] sm:$0xff] %v3728_v58 }
 0x19c   :  { %1435 = vrot.lane.b32.xlu0 %v3282_v60, %s3195_s24  ;;  %1437 = vrot.lane.b32.xlu1 %v3272_v51, %s3195_s24 }
 0x19e   :  { %v3734_v62 = vpop.permute.xlu0 %1054  ;;  %v3736_v55 = vpop.permute.xlu1 %1056 }
 0x19f   :  { %7594 = vst [vmem:[#allocation106_spill] sm:$0xff] %v3734_v62  ;;  %7595 = vst [vmem:[#allocation107_spill] sm:$0xff] %v3736_v55 }
 0x1a0   :  { %1471 = vrot.lane.b32.xlu0 %v3274_v52, %s3196_s1  ;;  %1473 = vrot.lane.b32.xlu1 %v3278_v56, %s3196_s1 }
 0x1a2   :  { %v3740_v50 = vpop.permute.xlu0 %1092  ;;  %v3742_v54 = vpop.permute.xlu1 %1094 }
 0x1a3   :  { %7596 = vst [vmem:[#allocation108_spill] sm:$0xff] %v3740_v50  ;;  %7597 = vst [vmem:[#allocation109_spill] sm:$0xff] %v3742_v54 }
 0x1a4   :  { %1475 = vrot.lane.b32.xlu0 %v3284_v61, %s3196_s1  ;;  %1477 = vrot.lane.b32.xlu1 %v3288_v63, %s3196_s1 }
 0x1a6   :  { %v3746_v58 = vpop.permute.xlu0 %1096  ;;  %v3748_v53 = vpop.permute.xlu1 %1098 }
 0x1a7   :  { %7598 = vst [vmem:[#allocation110_spill] sm:$0xff] %v3746_v58  ;;  %7599 = vst [vmem:[#allocation111_spill] sm:$0xff] %v3748_v53 }
 0x1a8   :  { %1484 = vrot.lane.b32.xlu0 %v3268_v46, %s3196_s1  ;;  %1486 = vrot.lane.b32.xlu1 %v3266_v45, %s3196_s1 }
 0x1aa   :  { %v3752_v55 = vpop.permute.xlu0 %1105  ;;  %v3754_v62 = vpop.permute.xlu1 %1107 }
 0x1ab   :  { %7600 = vst [vmem:[#allocation112_spill] sm:$0xff] %v3752_v55  ;;  %7601 = vst [vmem:[#allocation113_spill] sm:$0xff] %v3754_v62 }
 0x1ac   :  { %1488 = vrot.lane.b32.xlu0 %v3282_v60, %s3196_s1  ;;  %1490 = vrot.lane.b32.xlu1 %v3272_v51, %s3196_s1  ;;  %s3201_s1 = smov 114  }
 0x1ae   :  { %v3758_v54 = vpop.permute.xlu0 %1109  ;;  %v3760_v50 = vpop.permute.xlu1 %1111 }
 0x1af   :  { %7602 = vst [vmem:[#allocation114_spill] sm:$0xff] %v3758_v54  ;;  %7603 = vst [vmem:[#allocation115_spill] sm:$0xff] %v3760_v50 }
 0x1b0   :  { %1524 = vrot.lane.b32.xlu0 %v3274_v52, %s3197_s25  ;;  %1526 = vrot.lane.b32.xlu1 %v3278_v56, %s3197_s25 }
 0x1b2   :  { %v3764_v53 = vpop.permute.xlu0 %1147  ;;  %v3766_v58 = vpop.permute.xlu1 %1149 }
 0x1b3   :  { %7604 = vst [vmem:[#allocation116_spill] sm:$0xff] %v3764_v53  ;;  %7605 = vst [vmem:[#allocation117_spill] sm:$0xff] %v3766_v58 }
 0x1b4   :  { %1528 = vrot.lane.b32.xlu0 %v3284_v61, %s3197_s25  ;;  %1530 = vrot.lane.b32.xlu1 %v3288_v63, %s3197_s25 }
 0x1b6   :  { %v3770_v62 = vpop.permute.xlu0 %1151  ;;  %v3772_v55 = vpop.permute.xlu1 %1153 }
 0x1b7   :  { %7606 = vst [vmem:[#allocation118_spill] sm:$0xff] %v3770_v62  ;;  %7607 = vst [vmem:[#allocation119_spill] sm:$0xff] %v3772_v55 }
 0x1b8   :  { %1537 = vrot.lane.b32.xlu0 %v3268_v46, %s3197_s25  ;;  %1539 = vrot.lane.b32.xlu1 %v3266_v45, %s3197_s25 }
 0x1ba   :  { %v3776_v50 = vpop.permute.xlu0 %1160  ;;  %v3778_v54 = vpop.permute.xlu1 %1162 }
 0x1bb   :  { %7608 = vst [vmem:[#allocation120_spill] sm:$0xff] %v3776_v50  ;;  %7609 = vst [vmem:[#allocation121_spill] sm:$0xff] %v3778_v54 }
 0x1bc   :  { %1541 = vrot.lane.b32.xlu0 %v3282_v60, %s3197_s25  ;;  %1543 = vrot.lane.b32.xlu1 %v3272_v51, %s3197_s25  ;;  %s4108_s25 = sld [smem:[#allocation7 + $0x3a]] }
 0x1be   :  { %v3782_v58 = vpop.permute.xlu0 %1164  ;;  %v3784_v53 = vpop.permute.xlu1 %1166 }
 0x1bf   :  { %7610 = vst [vmem:[#allocation122_spill] sm:$0xff] %v3782_v58  ;;  %7611 = vst [vmem:[#allocation123_spill] sm:$0xff] %v3784_v53 }
 0x1c0   :  { %1577 = vrot.lane.b32.xlu0 %v3274_v52, %s3198_s26  ;;  %1579 = vrot.lane.b32.xlu1 %v3278_v56, %s3198_s26 }
 0x1c2   :  { %v3788_v55 = vpop.permute.xlu0 %1200  ;;  %v3790_v62 = vpop.permute.xlu1 %1202 }
 0x1c3   :  { %7612 = vst [vmem:[#allocation124_spill] sm:$0xff] %v3788_v55  ;;  %7613 = vst [vmem:[#allocation125_spill] sm:$0xff] %v3790_v62 }
 0x1c4   :  { %1581 = vrot.lane.b32.xlu0 %v3284_v61, %s3198_s26  ;;  %1583 = vrot.lane.b32.xlu1 %v3288_v63, %s3198_s26 }
 0x1c6   :  { %v3794_v54 = vpop.permute.xlu0 %1204  ;;  %v3796_v50 = vpop.permute.xlu1 %1206 }
 0x1c7   :  { %7614 = vst [vmem:[#allocation126_spill] sm:$0xff] %v3794_v54  ;;  %7615 = vst [vmem:[#allocation127_spill] sm:$0xff] %v3796_v50 }
 0x1c8   :  { %1590 = vrot.lane.b32.xlu0 %v3268_v46, %s3198_s26  ;;  %1592 = vrot.lane.b32.xlu1 %v3266_v45, %s3198_s26 }
 0x1ca   :  { %v3800_v53 = vpop.permute.xlu0 %1213  ;;  %v3802_v58 = vpop.permute.xlu1 %1215 }
 0x1cb   :  { %7616 = vst [vmem:[#allocation128_spill] sm:$0xff] %v3800_v53  ;;  %7617 = vst [vmem:[#allocation129_spill] sm:$0xff] %v3802_v58  ;;  %v7379_v58 = vlaneseq  ;;  %v178_v53 = vstv %s2934_s27  ;;  %s4140_s27 = sld [smem:[#allocation7 + $0x3b]] }
 0x1cc   :  { %1594 = vrot.lane.b32.xlu0 %v3282_v60, %s3198_s26  ;;  %1596 = vrot.lane.b32.xlu1 %v3272_v51, %s3198_s26  ;;  %v181_v57 = vmul.f32 %v178_v53, %v3278_v56  ;;  %v180_v41 = vmul.f32 %v178_v53, %v3284_v61  ;;  %v182_v49 = vmul.f32 %v178_v53, %v3288_v63  ;;  %s4124_s26 = sld [smem:[#allocation7 + $0xa]] }
 0x1cd   :  { %v3829_v59 = vand.u32 127, %v7379_v58  ;;  %v183_v58 = vstv %s7271_s2  ;;  %s3867_s2 = sld [smem:[#allocation7 + $0x34]] }
 0x1ce   :  { %v3806_v62 = vpop.permute.xlu0 %1217  ;;  %v3808_v55 = vpop.permute.xlu1 %1219  ;;  %v186_v48 = vadd.f32 %v183_v58, %v181_v57  ;;  %v187_v39 = vadd.f32 %v183_v58, %v182_v49 }
 0x1cf   :  { %7618 = vst [vmem:[#allocation130_spill] sm:$0xff] %v3806_v62  ;;  %7619 = vst [vmem:[#allocation131_spill] sm:$0xff] %v3808_v55  ;;  %vm212_vm1 = vcmp.lt.s32.totalorder %v3829_v59, 51  ;;  %vm198_vm3 = vcmp.ge.s32.totalorder %v3829_v59, 48  ;;  %vm267_vm5 = vcmp.lt.s32.totalorder %v3829_v59, 50  ;;  %vm322_vm6 = vcmp.lt.s32.totalorder %v3829_v59, 49 }
 0x1d0   :  { %1630 = vrot.lane.b32.xlu0 %v3274_v52, %s3199_s28  ;;  %1632 = vrot.lane.b32.xlu1 %v3278_v56, %s3199_s28  ;;  %v227_v33 = vsel %vm212_vm1, %v3358_v6, %v3342_v1  ;;  %v215_v57 = vsel %vm212_vm1, %v3360_v7, %v3348_v3  ;;  %vm377_vm12 = vcmp.lt.s32.totalorder %v3829_v59, 48  ;;  %vm430_vm15 = vcmp.lt.s32.totalorder %v3829_v59, 47 }
 0x1d1   :  { %v232_v34 = vmul.f32 %v3883_v44, %v215_v57  ;;  %v3954_v57 = vstv %s3859_s10  ;;  %s4590_s10 = sld [smem:[#allocation7 + $0xf]] }
 0x1d2   :  { %v3814_v50 = vpop.permute.xlu0 %1255  ;;  %v3816_v54 = vpop.permute.xlu1 %1257 }
 0x1d3   :  { %7620 = vst [vmem:[#allocation132_spill] sm:$0xff] %v3814_v50  ;;  %7621 = vst [vmem:[#allocation133_spill] sm:$0xff] %v3816_v54  ;;  %v3838_v54 = vadd.s32 128, %v3829_v59 }
 0x1d4   :  { %1634 = vrot.lane.b32.xlu0 %v3284_v61, %s3199_s28  ;;  %1636 = vrot.lane.b32.xlu1 %v3288_v63, %s3199_s28 }
 0x1d5   :  { %7624 = vst [vmem:[#allocation136_spill] sm:$0xff] %v3838_v54 }
 0x1d6   :  { %v3822_v55 = vpop.permute.xlu0 %1259  ;;  %v3826_v62 = vpop.permute.xlu1 %1261 }
 0x1d7   :  { %7622 = vst [vmem:[#allocation134_spill] sm:$0xff] %v3822_v55  ;;  %7623 = vst [vmem:[#allocation135_spill] sm:$0xff] %v3826_v62  ;;  %v179_v55 = vmul.f32 %v178_v53, %v3274_v52  ;;  %v189_v62 = vstv %s2935_s29  ;;  %s4235_s29 = sld [smem:[#allocation7 + $0x3c]] }
 0x1d8   :  { %1643 = vrot.lane.b32.xlu0 %v3268_v46, %s3199_s28  ;;  %1645 = vrot.lane.b32.xlu1 %v3266_v45, %s3199_s28  ;;  %v190_v47 = vmul.f32 %v189_v62, %v3268_v46  ;;  %v191_v40 = vmul.f32 %v189_v62, %v3282_v60  ;;  %v192_v35 = vmul.f32 %v189_v62, %v3266_v45 }
 0x1d9   :  { %v184_v53 = vadd.f32 %v183_v58, %v179_v55 }
 0x1da   :  { %v3843_v50 = vpop.permute.xlu0 %1268  ;;  %v3853_v43 = vpop.permute.xlu1 %1270 }
 0x1db   :  { %7625 = vst [vmem:[#allocation137_spill] sm:$0xff] %v3843_v50  ;;  %7626 = vst [vmem:[#allocation138_spill] sm:$0xff] %v3853_v43  ;;  %v3865_v50 = vand.u32 15, %v3829_v59  ;;  %v3872_v43 = vand.u32 15, %v3838_v54  ;;  %v193_v54 = vmul.f32 %v189_v62, %v3272_v51  ;;  %v236_v62 = vstv %s3833_s30  ;;  %s4330_s30 = sld [smem:[#allocation7 + $0xc]] }
 0x1dc   :  { %1647 = vrot.lane.b32.xlu0 %v3282_v60, %s3199_s28  ;;  %1649 = vrot.lane.b32.xlu1 %v3272_v51, %s3199_s28  ;;  %v3921_v49 = vadd.f32 %v190_v47, %v184_v53  ;;  %v237_v37 = vmul.f32 %v236_v62, %v227_v33  ;;  %s4205_s28 = sld [smem:[#allocation7 + $0xb]] }
 0x1dd   :  { %vm140_vm2 = vcmp.ge.s32.totalorder %v3865_v50, 3  ;;  %vm141_vm4 = vcmp.ge.s32.totalorder %v3872_v43, 3  ;;  %vm146_vm8 = vcmp.ge.s32.totalorder %v3865_v50, 2  ;;  %vm147_vm9 = vcmp.ge.s32.totalorder %v3872_v43, 2 }
 0x1de   :  { %v3880_v42 = vpop.permute.xlu0 %1272  ;;  %v3891_v55 = vpop.permute.xlu1 %1274  ;;  %vm3999_vm7 = vmand %vm198_vm3, %vm140_vm2  ;;  %vm152_vm10 = vcmp.ge.s32.totalorder %v3865_v50, 1  ;;  %vm153_vm11 = vcmp.ge.s32.totalorder %v3872_v43, 1  ;;  %vm160_vm0 = vcmp.lt.s32.totalorder %v3865_v50, 15 }
 0x1df   :  { %7627 = vst [vmem:[#allocation139_spill] sm:$0xff] %v3880_v42  ;;  %7628 = vst [vmem:[#allocation140_spill] sm:$0xff] %v3891_v55  ;;  %v185_v42 = vadd.f32 %v183_v58, %v180_v41  ;;  %v225_v41 = vsel %vm212_vm1, %v3342_v1, %v3358_v6  ;;  %v213_v58 = vsel %vm212_vm1, %v3348_v3, %v3360_v7  ;;  %v3934_v6 = vstv %s3841_s4  ;;  %s4345_s4 = sld [smem:[#allocation7 + $0x3d]] }
 0x1e0   :  { %1689 = vrot.lane.b32.xlu0 %v3274_v52, %s3200_s18  ;;  %1691 = vrot.lane.b32.xlu1 %v3278_v56, %s3200_s18  ;;  %v3931_v1 = vadd.f32 %v192_v35, %v186_v48  ;;  %v3940_v3 = vadd.f32 %v193_v54, %v187_v39  ;;  %v291_v7 = vstv %s3849_s7  ;;  %v238_v33 = vmul.f32 %v236_v62, %v225_v41  ;;  %vm4132_vm13 = vmand %vm198_vm3, %vm146_vm8  ;;  %s4457_s7 = sld [smem:[#allocation7 + $0xe]] }
 0x1e1   :  { %v3938_v53 = vadd.f32 %v191_v40, %v185_v42  ;;  %v233_v35 = vmul.f32 %v3883_v44, %v213_v58  ;;  %v3951_v48 = vstv %s3857_s9  ;;  %v216_v39 = vsel %vm212_vm1, %v3366_v9, %v3354_v5  ;;  %vm4170_vm14 = vmand %vm198_vm3, %vm152_vm10  ;;  %s3203_s9 = smov 112  }
 0x1e2   :  { %v3928_v55 = vpop.permute.xlu0 %1310  ;;  %v3936_v47 = vpop.permute.xlu1 %1312  ;;  %v3963_v40 = vstv %s3867_s2  ;;  %v3966_v42 = vstv %s3876_s11  ;;  %v3969_v54 = vstv %s3878_s13  ;;  %v3973_v58 = vadd.f32 %v237_v37, %v232_v34  ;;  %s4592_s2 = sld [smem:[#allocation7 + $0x40]]  ;;  %s3204_s11 = smov 111  }
 0x1e3   :  { %7629 = vst [vmem:[#allocation141_spill] sm:$0xff] %v3928_v55  ;;  %7630 = vst [vmem:[#allocation142_spill] sm:$0xff] %v3936_v47  ;;  %v214_v47 = vsel %vm212_vm1, %v3354_v5, %v3366_v9  ;;  %v3980_v55 = vstv %s3887_s14  ;;  %v228_v34 = vsel %vm212_vm1, %v3346_v2, %v3340_v0  ;;  %v4005_v9 = vstv %s3901_s16  ;;  %s4653_s13 = sld [smem:[#allocation7 + $0x10]]  ;;  %s4655_s14 = sld [smem:[#allocation7 + $0x41]] }
 0x1e4   :  { %1693 = vrot.lane.b32.xlu0 %v3284_v61, %s3200_s18  ;;  %1695 = vrot.lane.b32.xlu1 %v3288_v63, %s3200_s18  ;;  %7631 = vst [vmem:[#allocation143_spill] sm:$0xff] %v3966_v42  ;;  %7633 = vst [vmem:[#allocation145_spill] sm:$0xff] %v3980_v55  ;;  %v226_v42 = vsel %vm212_vm1, %v3340_v0, %v3346_v2  ;;  %v4008_v37 = vstv %s3903_s17  ;;  %v234_v0 = vmul.f32 %v3883_v44, %v216_v39  ;;  %s4721_s16 = sld [smem:[#allocation7 + $0x42]]  ;;  %s3205_s17 = smov 110  }
 0x1e5   :  { %7637 = vst [vmem:[#allocation147_spill] sm:$0xff] %v4005_v9  ;;  %7638 = vst [vmem:[#allocation148_spill] sm:$0xff] %v4008_v37  ;;  %v4014_v2 = vstv %s3910_s19  ;;  %v235_v55 = vmul.f32 %v3883_v44, %v214_v47  ;;  %v280_v9 = vsel %vm267_vm5, %v3376_v12, %v3382_v14  ;;  %v251_v44 = vsel %vm3999_vm7, %v3973_v58, 0.0  ;;  %s4831_s19 = sld [smem:[#allocation7 + $0x43]] }
 0x1e6   :  { %v3971_v41 = vpop.permute.xlu0 %1314  ;;  %v3985_v36 = vpop.permute.xlu1 %1316  ;;  %7639 = vst [vmem:[#allocation149_spill] sm:$0xff] %v4014_v2  ;;  %v239_v2 = vmul.f32 %v236_v62, %v228_v34  ;;  %v270_v47 = vsel %vm267_vm5, %v3370_v10, %v3364_v8  ;;  %vm485_vm1 = vcmp.lt.s32.totalorder %v3829_v59, 46 }
 0x1e7   :  { %7632 = vst [vmem:[#allocation144_spill] sm:$0xff] %v3971_v41  ;;  %7634 = vst [vmem:[#allocation146_spill] sm:$0xff] %v3985_v36  ;;  %v242_v36 = vadd.f32 %v238_v33, %v233_v35  ;;  %v4017_v41 = vstv %s3912_s20  ;;  %v282_v33 = vsel %vm267_vm5, %v3382_v14, %v3376_v12  ;;  %v283_v35 = vsel %vm267_vm5, %v3384_v15, %v3378_v13  ;;  %s4852_s20 = sld [smem:[#allocation7 + $0x13]] }
 0x1e8   :  { %1702 = vrot.lane.b32.xlu0 %v3268_v46, %s3200_s18  ;;  %7640 = vst [vmem:[#allocation150_spill] sm:$0xff] %v4017_v41  ;;  %1704 = vrot.lane.b32.xlu1 %v3266_v45, %s3200_s18  ;;  %v240_v41 = vmul.f32 %v236_v62, %v226_v42  ;;  %v281_v12 = vsel %vm267_vm5, %v3378_v13, %v3384_v15 }
 0x1e9   :  { %v268_v62 = vsel %vm267_vm5, %v3364_v8, %v3370_v10  ;;  %v269_v42 = vsel %vm267_vm5, %v3352_v4, %v3372_v11  ;;  %v271_v13 = vsel %vm267_vm5, %v3372_v11, %v3352_v4  ;;  %v252_v15 = vsel %vm141_vm4, %v242_v36, 0.0 }
 0x1ea   :  { %v4034_v39 = vpop.permute.xlu0 %1323  ;;  %v4045_v14 = vpop.permute.xlu1 %1325  ;;  %v292_v58 = vmul.f32 %v291_v7, %v282_v33  ;;  %v293_v8 = vmul.f32 %v291_v7, %v280_v9  ;;  %v294_v10 = vmul.f32 %v291_v7, %v283_v35  ;;  %v243_v34 = vadd.f32 %v239_v2, %v234_v0 }
 0x1eb   :  { %7641 = vst [vmem:[#allocation151_spill] sm:$0xff] %v4034_v39  ;;  %7642 = vst [vmem:[#allocation152_spill] sm:$0xff] %v4045_v14  ;;  %v244_v14 = vadd.f32 %v240_v41, %v235_v55  ;;  %v295_v39 = vmul.f32 %v291_v7, %v281_v12  ;;  %v337_v4 = vsel %vm322_vm6, %v3406_v22, %v3400_v20  ;;  %vm7452_vm5 = vcmp.lt.s32.totalorder %v3872_v43, 15 }
 0x1ec   :  { %1706 = vrot.lane.b32.xlu0 %v3282_v60, %s3200_s18  ;;  %1708 = vrot.lane.b32.xlu1 %v3272_v51, %s3200_s18  ;;  %v287_v37 = vmul.f32 %v3934_v6, %v270_v47  ;;  %v288_v36 = vmul.f32 %v3934_v6, %v268_v62  ;;  %v289_v9 = vmul.f32 %v3934_v6, %v271_v13  ;;  %v253_v13 = vsel %vm3999_vm7, %v243_v34, 0.0  ;;  %s4817_s18 = sld [smem:[#allocation7 + $0x12]] }
 0x1ed   :  { %v290_v33 = vmul.f32 %v3934_v6, %v269_v42  ;;  %v325_v55 = vsel %vm322_vm6, %v3394_v18, %v3388_v16  ;;  %v335_v7 = vsel %vm322_vm6, %v3400_v20, %v3406_v22  ;;  %v336_v41 = vsel %vm322_vm6, %v3402_v21, %v3408_v23 }
 0x1ee   :  { %v4075_v11 = vpop.permute.xlu0 %1327  ;;  %v4081_v35 = vpop.permute.xlu1 %1329  ;;  %v338_v6 = vsel %vm322_vm6, %v3408_v23, %v3402_v21  ;;  %v296_v0 = vadd.f32 %v292_v58, %v287_v37  ;;  %v297_v20 = vadd.f32 %v293_v8, %v288_v36  ;;  %v298_v22 = vadd.f32 %v294_v10, %v289_v9 }
 0x1ef   :  { %v347_v2 = vmul.f32 %v3951_v48, %v337_v4  ;;  %v299_v21 = vadd.f32 %v295_v39, %v290_v33  ;;  %v323_v23 = vsel %vm322_vm6, %v3388_v16, %v3394_v18  ;;  %v324_v37 = vsel %vm322_vm6, %v3390_v17, %v3396_v19 }
 0x1f0   :  { %1744 = vrot.lane.b32.xlu0 %v3274_v52, %s3201_s1  ;;  %1746 = vrot.lane.b32.xlu1 %v3278_v56, %s3201_s1  ;;  %v326_v12 = vsel %vm322_vm6, %v3396_v19, %v3390_v17  ;;  %v342_v18 = vmul.f32 %v3944_v32, %v325_v55  ;;  %v348_v39 = vmul.f32 %v3951_v48, %v335_v7  ;;  %v254_v58 = vsel %vm141_vm4, %v244_v14, 0.0 }
 0x1f1   :  { %v349_v47 = vmul.f32 %v3951_v48, %v338_v6  ;;  %v350_v17 = vmul.f32 %v3951_v48, %v336_v41  ;;  %v255_v42 = vadd.f32 %v251_v44, %v3921_v49  ;;  %v4150_v8 = vstv %s4063_s21  ;;  %s4887_s21 = sld [smem:[#allocation7 + $0x44]] }
 0x1f2   :  { %v4126_v62 = vpop.permute.xlu0 %1365  ;;  %v4142_v19 = vpop.permute.xlu1 %1367  ;;  %v343_v10 = vmul.f32 %v3944_v32, %v323_v23  ;;  %v344_v48 = vmul.f32 %v3944_v32, %v326_v12  ;;  %v345_v4 = vmul.f32 %v3944_v32, %v324_v37  ;;  %v351_v36 = vadd.f32 %v347_v2, %v342_v18  ;;  %v7650_v32 = vld [vmem:[#allocation18_spill] sm:$0xff] }
 0x1f3   :  { %7645 = vst [vmem:[#allocation153_spill] sm:$0xff] %v4142_v19  ;;  %v256_v49 = vadd.f32 %v252_v15, %v3938_v53  ;;  %v306_v5 = vsel %vm4132_vm13, %v296_v0, 0.0  ;;  %v307_v44 = vsel %vm147_vm9, %v297_v20, 0.0  ;;  %v308_v14 = vsel %vm4132_vm13, %v298_v22, 0.0  ;;  %vm4356_vm13 = vmand %vm198_vm3, %vm160_vm0 }
 0x1f4   :  { %1748 = vrot.lane.b32.xlu0 %v3284_v61, %s3201_s1  ;;  %1750 = vrot.lane.b32.xlu1 %v3288_v63, %s3201_s1  ;;  %v309_v15 = vsel %vm147_vm9, %v299_v21, 0.0  ;;  %v352_v34 = vadd.f32 %v348_v39, %v343_v10  ;;  %v353_v9 = vadd.f32 %v349_v47, %v344_v48  ;;  %v354_v33 = vadd.f32 %v350_v17, %v345_v4 }
 0x1f5   :  { %v257_v7 = vadd.f32 %v253_v13, %v3931_v1  ;;  %v258_v41 = vadd.f32 %v254_v58, %v3940_v3  ;;  %v4184_v6 = vstv %s4100_s22  ;;  %v4187_v0 = vstv %s4102_s23  ;;  %s4955_s22 = sld [smem:[#allocation7 + $0x14]]  ;;  %s3206_s23 = smov 109  }
 0x1f6   :  { %v4175_v53 = vpop.permute.xlu0 %1369  ;;  %v4179_v55 = vpop.permute.xlu1 %1371  ;;  %v310_v20 = vadd.f32 %v306_v5, %v255_v42  ;;  %v311_v22 = vadd.f32 %v307_v44, %v256_v49  ;;  %v361_v2 = vsel %vm4170_vm14, %v351_v36, 0.0  ;;  %v4194_v21 = vstv %s4108_s25  ;;  %s5055_s25 = sld [smem:[#allocation7 + $0x15]] }
 0x1f7   :  { %7648 = vst [vmem:[#allocation154_spill] sm:$0xff] %v4179_v55  ;;  %v312_v1 = vadd.f32 %v308_v14, %v257_v7  ;;  %v313_v3 = vadd.f32 %v309_v15, %v258_v41  ;;  %v392_v23 = vsel %vm377_vm12, %v3438_v30, %v3430_v28  ;;  %v4203_v37 = vstv %s4124_s26  ;;  %v7649_v14 = vld [vmem:[#allocation16_spill] sm:$0xff]  ;;  %s5066_s26 = sld [smem:[#allocation7 + $0x46]]  ;;  %v7797_v55 = vld [vmem:[#allocation99_spill] sm:$0xff] }
 0x1f8   :  { %1757 = vrot.lane.b32.xlu0 %v3268_v46, %s3201_s1  ;;  %1759 = vrot.lane.b32.xlu1 %v3266_v45, %s3201_s1  ;;  %v362_v16 = vsel %vm153_vm11, %v352_v34, 0.0  ;;  %v363_v18 = vsel %vm4170_vm14, %v353_v9, 0.0  ;;  %v364_v39 = vsel %vm153_vm11, %v354_v33, 0.0  ;;  %v4216_v47 = vstv %s4140_s27  ;;  %s5107_s27 = sld [smem:[#allocation7 + $0x16]] }
 0x1f9   :  { %v4220_v42 = vadd.f32 %v361_v2, %v310_v20  ;;  %v380_v13 = vsel %vm377_vm12, %v3422_v26, %v3414_v24  ;;  %v390_v58 = vsel %vm377_vm12, %v3430_v28, %v3438_v30  ;;  %v393_v10 = vsel %vm377_vm12, %v3440_v31, %v3432_v29  ;;  %v7651_v20 = vld [vmem:[#allocation12_spill] sm:$0xff] }
 0x1fa   :  { %v4207_v12 = vpop.permute.xlu0 %1378  ;;  %v4218_v17 = vpop.permute.xlu1 %1380  ;;  %v378_v48 = vsel %vm377_vm12, %v3414_v24, %v3422_v26  ;;  %v379_v28 = vsel %vm377_vm12, %v3416_v25, %v3424_v27  ;;  %v381_v30 = vsel %vm377_vm12, %v3424_v27, %v3416_v25  ;;  %v402_v4 = vmul.f32 %v3963_v40, %v392_v23  ;;  %v7655_v23 = vld [vmem:[#allocation13_spill] sm:$0xff] }
 0x1fb   :  { %v366_v36 = vadd.f32 %v362_v16, %v311_v22  ;;  %v4255_v49 = vadd.f32 %v363_v18, %v312_v1  ;;  %v368_v24 = vadd.f32 %v364_v39, %v313_v3  ;;  %v391_v26 = vsel %vm377_vm12, %v3432_v29, %v3440_v31  ;;  %v7652_v22 = vld [vmem:[#allocation14_spill] sm:$0xff]  ;;  %v7654_v1 = vld [vmem:[#allocation19_spill] sm:$0xff] }
 0x1fc   :  { %1761 = vrot.lane.b32.xlu0 %v3282_v60, %s3201_s1  ;;  %1763 = vrot.lane.b32.xlu1 %v3272_v51, %s3201_s1  ;;  %v397_v25 = vmul.f32 %v3954_v57, %v380_v13  ;;  %v403_v27 = vmul.f32 %v3963_v40, %v390_v58  ;;  %v404_v44 = vmul.f32 %v3963_v40, %v393_v10  ;;  %v7656_v16 = vld [vmem:[#allocation15_spill] sm:$0xff]  ;;  %v4303_v13 = vstv %s4205_s28  ;;  %s4985_s1 = sld [smem:[#allocation7 + $0x45]]  ;;  %s5133_s28 = sld [smem:[#allocation7 + $0x47]] }
 0x1fd   :  { %v445_v15 = vsel %vm430_vm15, %v7650_v32, %v7649_v14  ;;  %v398_v9 = vmul.f32 %v3954_v57, %v378_v48  ;;  %v399_v29 = vmul.f32 %v3954_v57, %v381_v30  ;;  %v400_v31 = vmul.f32 %v3954_v57, %v379_v28  ;;  %v7653_v57 = vld [vmem:[#allocation17_spill] sm:$0xff] }
 0x1fe   :  { %v4261_v5 = vpop.permute.xlu0 %1382  ;;  %v4270_v34 = vpop.permute.xlu1 %1384  ;;  %v443_v33 = vsel %vm430_vm15, %v7649_v14, %v7650_v32  ;;  %v406_v7 = vadd.f32 %v402_v4, %v397_v25  ;;  %v405_v41 = vmul.f32 %v3963_v40, %v391_v26  ;;  %v433_v2 = vsel %vm430_vm15, %v7652_v22, %v7651_v20  ;;  %v7659_v26 = vld [vmem:[#allocation143_spill] sm:$0xff] }
 0x1ff   :  { %v446_v3 = vsel %vm430_vm15, %v7654_v1, %v7653_v57  ;;  %v431_v40 = vsel %vm430_vm15, %v7651_v20, %v7652_v22  ;;  %v434_v18 = vsel %vm430_vm15, %v7656_v16, %v7655_v23  ;;  %v455_v39 = vmul.f32 %v3969_v54, %v445_v15  ;;  %v7660_v22 = vld [vmem:[#allocation26_spill] sm:$0xff] }
 0x200   :  { %1799 = vrot.lane.b32.xlu0 %v3274_v52, %s3202_s0  ;;  %1801 = vrot.lane.b32.xlu1 %v3278_v56, %s3202_s0  ;;  %v407_v10 = vadd.f32 %v403_v27, %v398_v9  ;;  %v408_v48 = vadd.f32 %v404_v44, %v399_v29  ;;  %v456_v28 = vmul.f32 %v3969_v54, %v443_v33  ;;  %vm7418_vm6 = vcmp.lt.s32.totalorder %v3865_v50, 14 }
 0x201   :  { %v444_v30 = vsel %vm430_vm15, %v7653_v57, %v7654_v1  ;;  %v450_v25 = vmul.f32 %v7659_v26, %v433_v2  ;;  %v432_v14 = vsel %vm430_vm15, %v7655_v23, %v7656_v16  ;;  %v457_v27 = vmul.f32 %v3969_v54, %v446_v3  ;;  %v7661_v2 = vld [vmem:[#allocation24_spill] sm:$0xff] }
 0x202   :  { %v4305_v58 = vpop.permute.xlu0 %1418  ;;  %v4313_v4 = vpop.permute.xlu1 %1420  ;;  %v4322_v44 = vstv %s4235_s29  ;;  %v414_v32 = vsel %vm198_vm3, %v406_v7, 0.0  ;;  %v409_v15 = vadd.f32 %v405_v41, %v400_v31  ;;  %v451_v9 = vmul.f32 %v7659_v26, %v431_v40  ;;  %s3207_s29 = smov 99  }
 0x203   :  { %7657 = vst [vmem:[#allocation16_spill] sm:$0xff] %v4305_v58  ;;  %7658 = vst [vmem:[#allocation18_spill] sm:$0xff] %v4313_v4  ;;  %v452_v29 = vmul.f32 %v7659_v26, %v434_v18  ;;  %v459_v33 = vadd.f32 %v455_v39, %v450_v25  ;;  %v458_v20 = vmul.f32 %v3969_v54, %v444_v30  ;;  %vm167_vm7 = vcmp.lt.s32.totalorder %v3872_v43, 14  ;;  %v7666_v18 = vld [vmem:[#allocation22_spill] sm:$0xff]  ;;  %v7667_v39 = vld [vmem:[#allocation20_spill] sm:$0xff] }
 0x204   :  { %1803 = vrot.lane.b32.xlu0 %v3284_v61, %s3202_s0  ;;  %1805 = vrot.lane.b32.xlu1 %v3288_v63, %s3202_s0  ;;  %v498_v7 = vsel %vm485_vm1, %v7661_v2, %v7660_v22  ;;  %v500_v31 = vsel %vm485_vm1, %v7660_v22, %v7661_v2  ;;  %vm540_vm12 = vcmp.lt.s32.totalorder %v3829_v59, 45  ;;  %v419_v57 = vadd.f32 %v407_v10, %v366_v36  ;;  %v7669_v30 = vld [vmem:[#allocation27_spill] sm:$0xff]  ;;  %v7670_v2 = vld [vmem:[#allocation21_spill] sm:$0xff]  ;;  %v7692_v58 = vld [vmem:[#allocation42_spill] sm:$0xff] }
 0x205   :  { %v416_v54 = vsel %vm198_vm3, %v408_v48, 0.0  ;;  %v453_v1 = vmul.f32 %v7659_v26, %v432_v14  ;;  %v460_v40 = vadd.f32 %v456_v28, %v451_v9  ;;  %v461_v16 = vadd.f32 %v457_v27, %v452_v29  ;;  %v7668_v48 = vld [vmem:[#allocation25_spill] sm:$0xff] }
 0x206   :  { %v4347_v41 = vpop.permute.xlu0 %1422  ;;  %v4360_v23 = vpop.permute.xlu1 %1424  ;;  %v486_v36 = vsel %vm485_vm1, %v7667_v39, %v7666_v18  ;;  %v488_v10 = vsel %vm485_vm1, %v7666_v18, %v7667_v39  ;;  %v501_v26 = vsel %vm485_vm1, %v7669_v30, %v7668_v48  ;;  %v421_v28 = vadd.f32 %v409_v15, %v368_v24  ;;  %v7671_v24 = vld [vmem:[#allocation23_spill] sm:$0xff] }
 0x207   :  { %7662 = vst [vmem:[#allocation12_spill] sm:$0xff] %v4347_v41  ;;  %7665 = vst [vmem:[#allocation14_spill] sm:$0xff] %v4360_v23  ;;  %v510_v25 = vmul.f32 %v3983_v38, %v500_v31  ;;  %v511_v14 = vmul.f32 %v3983_v38, %v498_v7  ;;  %v499_v27 = vsel %vm485_vm1, %v7668_v48, %v7669_v30  ;;  %v469_v29 = vsel %vm4356_vm13, %v459_v33, 0.0  ;;  %v7673_v31 = vld [vmem:[#allocation145_spill] sm:$0xff] }
 0x208   :  { %1812 = vrot.lane.b32.xlu0 %v3268_v46, %s3202_s0  ;;  %1814 = vrot.lane.b32.xlu1 %v3266_v45, %s3202_s0  ;;  %v418_v9 = vadd.f32 %v414_v32, %v4220_v42  ;;  %v462_v22 = vadd.f32 %v458_v20, %v453_v1  ;;  %v489_v15 = vsel %vm485_vm1, %v7671_v24, %v7670_v2  ;;  %v470_v1 = vsel %vm7452_vm5, %v460_v40, 0.0 }
 0x209   :  { %v505_v18 = vmul.f32 %v7673_v31, %v488_v10  ;;  %v506_v39 = vmul.f32 %v7673_v31, %v486_v36  ;;  %v487_v42 = vsel %vm485_vm1, %v7670_v2, %v7671_v24  ;;  %v512_v32 = vmul.f32 %v3983_v38, %v501_v26  ;;  %vm4429_vm1 = vmand %vm198_vm3, %vm7418_vm6  ;;  %v7679_v2 = vld [vmem:[#allocation34_spill] sm:$0xff] }
 0x20a   :  { %v4391_v7 = vpop.permute.xlu0 %1431  ;;  %v4400_v33 = vpop.permute.xlu1 %1433  ;;  %v420_v20 = vadd.f32 %v416_v54, %v4255_v49  ;;  %v471_v10 = vsel %vm4356_vm13, %v461_v16, 0.0  ;;  %v513_v36 = vmul.f32 %v3983_v38, %v499_v27  ;;  %vm172_vm14 = vcmp.lt.s32.totalorder %v3865_v50, 13 }
 0x20b   :  { %7672 = vst [vmem:[#allocation17_spill] sm:$0xff] %v4391_v7  ;;  %7674 = vst [vmem:[#allocation19_spill] sm:$0xff] %v4400_v33  ;;  %v507_v49 = vmul.f32 %v7673_v31, %v489_v15  ;;  %v514_v54 = vadd.f32 %v510_v25, %v505_v18  ;;  %v515_v48 = vadd.f32 %v511_v14, %v506_v39  ;;  %vm601_vm15 = vcmp.lt.s32.totalorder %v3829_v59, 35  ;;  %v7681_v18 = vld [vmem:[#allocation35_spill] sm:$0xff]  ;;  %v7682_v39 = vld [vmem:[#allocation33_spill] sm:$0xff] }
 0x20c   :  { %1816 = vrot.lane.b32.xlu0 %v3282_v60, %s3202_s0  ;;  %v4418_v3 = vstv %s4330_s30  ;;  %1818 = vrot.lane.b32.xlu1 %v3272_v51, %s3202_s0  ;;  %v473_v38 = vadd.f32 %v469_v29, %v418_v9  ;;  %v472_v40 = vsel %vm7452_vm5, %v462_v22, 0.0  ;;  %v508_v16 = vmul.f32 %v7673_v31, %v487_v42  ;;  %v7678_v29 = vld [vmem:[#allocation32_spill] sm:$0xff]  ;;  %v7705_v33 = vld [vmem:[#allocation149_spill] sm:$0xff]  ;;  %s5198_s0 = sld [smem:[#allocation7 + $0x17]]  ;;  %s5231_s30 = sld [smem:[#allocation7 + $0x48]] }
 0x20d   :  { %v4434_v26 = vstv %s4345_s4  ;;  %v474_v14 = vadd.f32 %v470_v1, %v419_v57  ;;  %v475_v27 = vadd.f32 %v471_v10, %v420_v20  ;;  %v516_v9 = vadd.f32 %v512_v32, %v507_v49  ;;  %v7683_v10 = vld [vmem:[#allocation28_spill] sm:$0xff]  ;;  %s5296_s4 = sld [smem:[#allocation7 + $0x19]] }
 0x20e   :  { %v4436_v25 = vpop.permute.xlu0 %1435  ;;  %v555_v22 = vsel %vm540_vm12, %v7679_v2, %v7678_v29  ;;  %v4442_v24 = vpop.permute.xlu1 %1437  ;;  %v517_v15 = vadd.f32 %v513_v36, %v508_v16  ;;  %vm173_vm13 = vcmp.lt.s32.totalorder %v3872_v43, 13  ;;  %v553_v31 = vsel %vm540_vm12, %v7678_v29, %v7679_v2  ;;  %v7684_v36 = vld [vmem:[#allocation30_spill] sm:$0xff]  ;;  %v7687_v29 = vld [vmem:[#allocation148_spill] sm:$0xff] }
 0x20f   :  { %7677 = vst [vmem:[#allocation13_spill] sm:$0xff] %v4436_v25  ;;  %7680 = vst [vmem:[#allocation15_spill] sm:$0xff] %v4442_v24  ;;  %v554_v57 = vsel %vm540_vm12, %v7682_v39, %v7681_v18  ;;  %v556_v42 = vsel %vm540_vm12, %v7681_v18, %v7682_v39  ;;  %v476_v32 = vadd.f32 %v472_v40, %v421_v28  ;;  %v524_v20 = vsel %vm4429_vm1, %v514_v54, 0.0  ;;  %v7685_v40 = vld [vmem:[#allocation31_spill] sm:$0xff]  ;;  %v7686_v54 = vld [vmem:[#allocation29_spill] sm:$0xff] }
 0x210   :  { %1854 = vrot.lane.b32.xlu0 %v3274_v52, %s3203_s9  ;;  %v525_v1 = vsel %vm167_vm7, %v515_v48, 0.0  ;;  %v543_v49 = vsel %vm540_vm12, %v7684_v36, %v7683_v10  ;;  %1856 = vrot.lane.b32.xlu1 %v3278_v56, %s3203_s9  ;;  %v541_v28 = vsel %vm540_vm12, %v7683_v10, %v7684_v36  ;;  %v542_v48 = vsel %vm540_vm12, %v7686_v54, %v7685_v40  ;;  %v7708_v25 = vld [vmem:[#allocation50_spill] sm:$0xff] }
 0x211   :  { %v544_v16 = vsel %vm540_vm12, %v7685_v40, %v7686_v54  ;;  %v565_v2 = vmul.f32 %v7687_v29, %v555_v22  ;;  %v526_v39 = vsel %vm4429_vm1, %v516_v9, 0.0  ;;  %v566_v4 = vmul.f32 %v7687_v29, %v553_v31  ;;  %v7690_v54 = vld [vmem:[#allocation147_spill] sm:$0xff]  ;;  %vm4523_vm1 = vmand %vm198_vm3, %vm172_vm14 }
 0x212   :  { %v4486_v18 = vpop.permute.xlu0 %1471  ;;  %v567_v10 = vmul.f32 %v7687_v29, %v556_v42  ;;  %v568_v36 = vmul.f32 %v7687_v29, %v554_v57  ;;  %vm656_vm6 = vcmp.lt.s32.totalorder %v3829_v59, 34  ;;  %v4494_v23 = vpop.permute.xlu1 %1473  ;;  %v527_v40 = vsel %vm167_vm7, %v517_v15, 0.0 }
 0x213   :  { %7688 = vst [vmem:[#allocation143_spill] sm:$0xff] %v4486_v18  ;;  %7689 = vst [vmem:[#allocation26_spill] sm:$0xff] %v4494_v23  ;;  %v560_v22 = vmul.f32 %v7690_v54, %v543_v49  ;;  %vm587_vm12 = vcmp.ge.s32.totalorder %v3829_v59, 32  ;;  %v4501_v18 = vstv %s4409_s5  ;;  %v4504_v30 = vstv %s4411_s6  ;;  %v7691_v23 = vld [vmem:[#allocation40_spill] sm:$0xff]  ;;  %s5308_s5 = sld [smem:[#allocation7 + $0x4a]]  ;;  %s3208_s6 = smov 98  }
 0x214   :  { %1858 = vrot.lane.b32.xlu0 %v3284_v61, %s3203_s9  ;;  %v528_v9 = vadd.f32 %v524_v20, %v473_v38  ;;  %v561_v31 = vmul.f32 %v7690_v54, %v541_v28  ;;  %v562_v57 = vmul.f32 %v7690_v54, %v544_v16  ;;  %v563_v42 = vmul.f32 %v7690_v54, %v542_v48 }
 0x215   :  { %1860 = vrot.lane.b32.xlu1 %v3288_v63, %s3203_s9  ;;  %v529_v15 = vadd.f32 %v525_v1, %v474_v14  ;;  %v530_v49 = vadd.f32 %v526_v39, %v475_v27  ;;  %v569_v29 = vadd.f32 %v565_v2, %v560_v22  ;;  %v616_v41 = vsel %vm601_vm15, %v7692_v58, %v7691_v23  ;;  %v7697_v2 = vld [vmem:[#allocation36_spill] sm:$0xff]  ;;  %v7698_v39 = vld [vmem:[#allocation38_spill] sm:$0xff] }
 0x216   :  { %v4517_v38 = vpop.permute.xlu0 %1475  ;;  %v570_v28 = vadd.f32 %v566_v4, %v561_v31  ;;  %v571_v48 = vadd.f32 %v567_v10, %v562_v57  ;;  %v572_v14 = vadd.f32 %v568_v36, %v563_v42  ;;  %v614_v27 = vsel %vm601_vm15, %v7691_v23, %v7692_v58  ;;  %v4531_v1 = vpop.permute.xlu1 %1477  ;;  %v7699_v4 = vld [vmem:[#allocation150_spill] sm:$0xff]  ;;  %v7701_v10 = vld [vmem:[#allocation41_spill] sm:$0xff]  ;;  %v7702_v57 = vld [vmem:[#allocation39_spill] sm:$0xff] }
 0x217   :  { %7693 = vst [vmem:[#allocation24_spill] sm:$0xff] %v4517_v38  ;;  %7696 = vst [vmem:[#allocation22_spill] sm:$0xff] %v4531_v1  ;;  %v531_v16 = vadd.f32 %v527_v40, %v476_v32  ;;  %v604_v54 = vsel %vm601_vm15, %v7698_v39, %v7697_v2  ;;  %v4538_v22 = vstv %s4457_s7  ;;  %v4541_v38 = vstv %s4459_s8  ;;  %v7700_v32 = vld [vmem:[#allocation43_spill] sm:$0xff]  ;;  %v7703_v42 = vld [vmem:[#allocation37_spill] sm:$0xff]  ;;  %s5373_s7 = sld [smem:[#allocation7 + $0x1a]]  ;;  %s5375_s8 = sld [smem:[#allocation7 + $0x4b]] }
 0x218   :  { %1867 = vrot.lane.b32.xlu0 %v3268_v46, %s3203_s9  ;;  %v602_v58 = vsel %vm601_vm15, %v7697_v2, %v7698_v39  ;;  %v626_v23 = vmul.f32 %v7699_v4, %v616_v41  ;;  %v615_v36 = vsel %vm601_vm15, %v7701_v10, %v7700_v32  ;;  %v617_v40 = vsel %vm601_vm15, %v7700_v32, %v7701_v10 }
 0x219   :  { %1869 = vrot.lane.b32.xlu1 %v3266_v45, %s3203_s9  ;;  %v579_v31 = vsel %vm4523_vm1, %v569_v29, 0.0  ;;  %v603_v41 = vsel %vm601_vm15, %v7703_v42, %v7702_v57  ;;  %v605_v2 = vsel %vm601_vm15, %v7702_v57, %v7703_v42  ;;  %v627_v39 = vmul.f32 %v7699_v4, %v614_v27  ;;  %vm4618_vm15 = vmand %vm587_vm12, %vm140_vm2 }
 0x21a   :  { %vm711_vm3 = vcmp.lt.s32.totalorder %v3829_v59, 33  ;;  %v4572_v32 = vpop.permute.xlu0 %1484  ;;  %v580_v10 = vsel %vm173_vm13, %v570_v28, 0.0  ;;  %v581_v29 = vsel %vm4523_vm1, %v571_v48, 0.0  ;;  %v582_v1 = vsel %vm173_vm13, %v572_v14, 0.0  ;;  %v4581_v7 = vpop.permute.xlu1 %1486 }
 0x21b   :  { %7704 = vst [vmem:[#allocation20_spill] sm:$0xff] %v4572_v32  ;;  %v621_v24 = vmul.f32 %v7705_v33, %v604_v54  ;;  %7706 = vst [vmem:[#allocation25_spill] sm:$0xff] %v4581_v7  ;;  %v622_v57 = vmul.f32 %v7705_v33, %v602_v58  ;;  %v628_v27 = vmul.f32 %v7699_v4, %v617_v40  ;;  %v7707_v32 = vld [vmem:[#allocation48_spill] sm:$0xff]  ;;  %vm766_vm1 = vcmp.lt.s32.totalorder %v3829_v59, 32 }
 0x21c   :  { %v629_v42 = vmul.f32 %v7699_v4, %v615_v36  ;;  %v671_v28 = vsel %vm656_vm6, %v7708_v25, %v7707_v32  ;;  %1871 = vrot.lane.b32.xlu0 %v3282_v60, %s3203_s9  ;;  %v583_v20 = vadd.f32 %v579_v31, %v528_v9  ;;  %v623_v48 = vmul.f32 %v7705_v33, %v605_v2  ;;  %v7709_v4 = vld [vmem:[#allocation44_spill] sm:$0xff]  ;;  %v7710_v36 = vld [vmem:[#allocation46_spill] sm:$0xff]  ;;  %v7711_v9 = vld [vmem:[#allocation49_spill] sm:$0xff] }
 0x21d   :  { %v624_v14 = vmul.f32 %v7705_v33, %v603_v41  ;;  %v630_v54 = vadd.f32 %v626_v23, %v621_v24  ;;  %1873 = vrot.lane.b32.xlu1 %v3272_v51, %s3203_s9  ;;  %v631_v58 = vadd.f32 %v627_v39, %v622_v57  ;;  %v659_v40 = vsel %vm656_vm6, %v7710_v36, %v7709_v4  ;;  %v7712_v31 = vld [vmem:[#allocation51_spill] sm:$0xff]  ;;  %s5420_s9 = sld [smem:[#allocation7 + $0x1b]] }
 0x21e   :  { %v669_v7 = vsel %vm656_vm6, %v7707_v32, %v7708_v25  ;;  %v672_v33 = vsel %vm656_vm6, %v7712_v31, %v7711_v9  ;;  %v4612_v24 = vpop.permute.xlu0 %1488  ;;  %v584_v23 = vadd.f32 %v580_v10, %v529_v15  ;;  %v585_v41 = vadd.f32 %v581_v29, %v530_v49  ;;  %v4627_v32 = vpop.permute.xlu1 %1490  ;;  %v7717_v49 = vld [vmem:[#allocation45_spill] sm:$0xff]  ;;  %v7718_v10 = vld [vmem:[#allocation47_spill] sm:$0xff] }
 0x21f   :  { %7713 = vst [vmem:[#allocation27_spill] sm:$0xff] %v4612_v24  ;;  %v657_v25 = vsel %vm656_vm6, %v7709_v4, %v7710_v36  ;;  %v681_v39 = vmul.f32 %v4184_v6, %v671_v28  ;;  %7716 = vst [vmem:[#allocation21_spill] sm:$0xff] %v4627_v32  ;;  %v632_v57 = vadd.f32 %v628_v27, %v623_v48  ;;  %v640_v48 = vsel %vm4618_vm15, %v630_v54, 0.0 }
 0x220   :  { %v633_v15 = vadd.f32 %v629_v42, %v624_v14  ;;  %v660_v29 = vsel %vm656_vm6, %v7718_v10, %v7717_v49  ;;  %v670_v24 = vsel %vm656_vm6, %v7711_v9, %v7712_v31  ;;  %1907 = vrot.lane.b32.xlu0 %v3274_v52, %s3204_s11  ;;  %v586_v4 = vadd.f32 %v582_v1, %v531_v16  ;;  %v7721_v9 = vld [vmem:[#allocation58_spill] sm:$0xff] }
 0x221   :  { %v676_v28 = vmul.f32 %v4150_v8, %v659_v40  ;;  %v682_v27 = vmul.f32 %v4184_v6, %v669_v7  ;;  %v683_v42 = vmul.f32 %v4184_v6, %v672_v33  ;;  %1909 = vrot.lane.b32.xlu1 %v3278_v56, %s3204_s11  ;;  %v641_v14 = vsel %vm141_vm4, %v631_v58, 0.0  ;;  %v7720_v58 = vld [vmem:[#allocation56_spill] sm:$0xff] }
 0x222   :  { %v677_v36 = vmul.f32 %v4150_v8, %v657_v25  ;;  %v658_v7 = vsel %vm656_vm6, %v7717_v49, %v7718_v10  ;;  %v4657_v1 = vpop.permute.xlu0 %1524  ;;  %v678_v16 = vmul.f32 %v4150_v8, %v660_v29  ;;  %v684_v40 = vmul.f32 %v4184_v6, %v670_v24  ;;  %v4666_v33 = vpop.permute.xlu1 %1526  ;;  %vm4676_vm6 = vmand %vm587_vm12, %vm146_vm8  ;;  %v7726_v29 = vld [vmem:[#allocation54_spill] sm:$0xff] }
 0x223   :  { %7719 = vst [vmem:[#allocation23_spill] sm:$0xff] %v4657_v1  ;;  %v685_v54 = vadd.f32 %v681_v39, %v676_v28  ;;  %v726_v31 = vsel %vm711_vm3, %v7721_v9, %v7720_v58  ;;  %7722 = vst [vmem:[#allocation145_spill] sm:$0xff] %v4666_v33  ;;  %v642_v25 = vsel %vm4618_vm15, %v632_v57, 0.0  ;;  %v643_v49 = vsel %vm141_vm4, %v633_v15, 0.0  ;;  %v7725_v15 = vld [vmem:[#allocation52_spill] sm:$0xff] }
 0x224   :  { %v4681_v24 = vstv %s4590_s10  ;;  %v4684_v39 = vstv %s4592_s2  ;;  %1911 = vrot.lane.b32.xlu0 %v3284_v61, %s3204_s11  ;;  %v679_v2 = vmul.f32 %v4150_v8, %v658_v7  ;;  %v686_v57 = vadd.f32 %v682_v27, %v677_v36  ;;  %s3209_s10 = smov 97   ;;  %s5552_s2 = sld [smem:[#allocation7 + $0x4c]] }
 0x225   :  { %v687_v10 = vadd.f32 %v683_v42, %v678_v16  ;;  %v714_v28 = vsel %vm711_vm3, %v7726_v29, %v7725_v15  ;;  %1913 = vrot.lane.b32.xlu1 %v3288_v63, %s3204_s11  ;;  %v644_v33 = vadd.f32 %v640_v48, %v583_v20  ;;  %v645_v1 = vadd.f32 %v641_v14, %v584_v23  ;;  %v7729_v14 = vld [vmem:[#allocation59_spill] sm:$0xff]  ;;  %v7730_v16 = vld [vmem:[#allocation57_spill] sm:$0xff] }
 0x226   :  { %v724_v32 = vsel %vm711_vm3, %v7720_v58, %v7721_v9  ;;  %v736_v19 = vmul.f32 %v4194_v21, %v726_v31  ;;  %v4702_v8 = vpop.permute.xlu0 %1528  ;;  %v646_v27 = vadd.f32 %v642_v25, %v585_v41  ;;  %v647_v42 = vadd.f32 %v643_v49, %v586_v4  ;;  %v4706_v20 = vpop.permute.xlu1 %1530  ;;  %v7731_v58 = vld [vmem:[#allocation53_spill] sm:$0xff]  ;;  %v7732_v9 = vld [vmem:[#allocation55_spill] sm:$0xff] }
 0x227   :  { %7727 = vst [vmem:[#allocation32_spill] sm:$0xff] %v4702_v8  ;;  %v695_v36 = vsel %vm4676_vm6, %v685_v54, 0.0  ;;  %v688_v7 = vadd.f32 %v684_v40, %v679_v2  ;;  %7728 = vst [vmem:[#allocation34_spill] sm:$0xff] %v4706_v20  ;;  %v712_v23 = vsel %vm711_vm3, %v7725_v15, %v7726_v29  ;;  %v731_v48 = vmul.f32 %v4187_v0, %v714_v28  ;;  %v7737_v20 = vld [vmem:[#allocation64_spill] sm:$0xff]  ;;  %v7738_v8 = vld [vmem:[#allocation66_spill] sm:$0xff] }
 0x228   :  { %v725_v41 = vsel %vm711_vm3, %v7730_v16, %v7729_v14  ;;  %v727_v4 = vsel %vm711_vm3, %v7729_v14, %v7730_v16  ;;  %1920 = vrot.lane.b32.xlu0 %v3268_v46, %s3204_s11  ;;  %v696_v54 = vsel %vm147_vm9, %v686_v57, 0.0  ;;  %v697_v40 = vsel %vm4676_vm6, %v687_v10, 0.0  ;;  %vm4756_vm6 = vmand %vm587_vm12, %vm152_vm10  ;;  %v7751_v29 = vld [vmem:[#allocation68_spill] sm:$0xff] }
 0x229   :  { %v715_v31 = vsel %vm711_vm3, %v7732_v9, %v7731_v58  ;;  %v737_v25 = vmul.f32 %v4194_v21, %v724_v32  ;;  %vm819_vm15 = vcmp.lt.s32.totalorder %v3829_v59, 31  ;;  %1922 = vrot.lane.b32.xlu1 %v3266_v45, %s3204_s11  ;;  %v713_v49 = vsel %vm711_vm3, %v7731_v58, %v7732_v9 }
 0x22a   :  { %v740_v2 = vadd.f32 %v736_v19, %v731_v48  ;;  %v4742_v6 = vstv %s4653_s13  ;;  %v4745_v57 = vstv %s4655_s14  ;;  %v4747_v10 = vpop.permute.xlu0 %1537  ;;  %v698_v32 = vsel %vm147_vm9, %v688_v7, 0.0  ;;  %v4762_v48 = vpop.permute.xlu1 %1539  ;;  %s5571_s13 = sld [smem:[#allocation7 + $0x4d]] }
 0x22b   :  { %7733 = vst [vmem:[#allocation35_spill] sm:$0xff] %v4747_v10  ;;  %v732_v15 = vmul.f32 %v4187_v0, %v712_v23  ;;  %v738_v19 = vmul.f32 %v4194_v21, %v727_v4  ;;  %v739_v28 = vmul.f32 %v4194_v21, %v725_v41  ;;  %7736 = vst [vmem:[#allocation33_spill] sm:$0xff] %v4762_v48  ;;  %v7739_v10 = vld [vmem:[#allocation65_spill] sm:$0xff]  ;;  %v7740_v21 = vld [vmem:[#allocation67_spill] sm:$0xff]  ;;  %vm874_vm3 = vcmp.lt.s32.totalorder %v3829_v59, 30  ;;  %s5602_s14 = sld [smem:[#allocation7 + $0x1d]] }
 0x22c   :  { %v699_v14 = vadd.f32 %v695_v36, %v644_v33  ;;  %v700_v16 = vadd.f32 %v696_v54, %v645_v1  ;;  %v701_v7 = vadd.f32 %v697_v40, %v646_v27  ;;  %v733_v23 = vmul.f32 %v4187_v0, %v715_v31  ;;  %1924 = vrot.lane.b32.xlu0 %v3282_v60, %s3204_s11  ;;  %v7742_v36 = vld [vmem:[#allocation62_spill] sm:$0xff] }
 0x22d   :  { %v734_v58 = vmul.f32 %v4187_v0, %v713_v49  ;;  %v741_v9 = vadd.f32 %v737_v25, %v732_v15  ;;  %v781_v4 = vsel %vm766_vm1, %v7738_v8, %v7737_v20  ;;  %v782_v1 = vsel %vm766_vm1, %v7740_v21, %v7739_v10  ;;  %1926 = vrot.lane.b32.xlu1 %v3272_v51, %s3204_s11  ;;  %v7741_v0 = vld [vmem:[#allocation60_spill] sm:$0xff]  ;;  %v7744_v49 = vld [vmem:[#allocation61_spill] sm:$0xff]  ;;  %v7745_v15 = vld [vmem:[#allocation63_spill] sm:$0xff]  ;;  %s5569_s11 = sld [smem:[#allocation7 + $0x1c]] }
 0x22e   :  { %v702_v33 = vadd.f32 %v698_v32, %v647_v42  ;;  %v750_v27 = vsel %vm4756_vm6, %v740_v2, 0.0  ;;  %v769_v41 = vsel %vm766_vm1, %v7742_v36, %v7741_v0  ;;  %v4785_v54 = vstv %s4700_s15  ;;  %v4787_v40 = vpop.permute.xlu0 %1541  ;;  %v4797_v2 = vpop.permute.xlu1 %1543  ;;  %s5623_s15 = sld [smem:[#allocation7 + $0x4e]] }
 0x22f   :  { %7743 = vst [vmem:[#allocation28_spill] sm:$0xff] %v4787_v40  ;;  %v742_v31 = vadd.f32 %v738_v19, %v733_v23  ;;  %v743_v25 = vadd.f32 %v739_v28, %v734_v58  ;;  %v770_v48 = vsel %vm766_vm1, %v7745_v15, %v7744_v49  ;;  %v779_v42 = vsel %vm766_vm1, %v7737_v20, %v7738_v8 }
 0x230   :  { %7746 = vst [vmem:[#allocation30_spill] sm:$0xff] %v4797_v2  ;;  %v791_v32 = vmul.f32 %v4216_v47, %v781_v4  ;;  %v780_v19 = vsel %vm766_vm1, %v7739_v10, %v7740_v21  ;;  %v793_v28 = vmul.f32 %v4216_v47, %v782_v1  ;;  %v4806_v23 = vstv %s4721_s16  ;;  %1962 = vrot.lane.b32.xlu0 %v3274_v52, %s3205_s17  ;;  %v7747_v21 = vld [vmem:[#allocation72_spill] sm:$0xff]  ;;  %v7748_v1 = vld [vmem:[#allocation74_spill] sm:$0xff]  ;;  %s5677_s16 = sld [smem:[#allocation7 + $0x1e]] }
 0x231   :  { %v751_v8 = vsel %vm153_vm11, %v741_v9, 0.0  ;;  %v754_v20 = vadd.f32 %v750_v27, %v699_v14  ;;  %v767_v58 = vsel %vm766_vm1, %v7741_v0, %v7742_v36  ;;  %v786_v4 = vmul.f32 %v4203_v37, %v769_v41  ;;  %1964 = vrot.lane.b32.xlu1 %v3278_v56, %s3205_s17 }
 0x232   :  { %v768_v10 = vsel %vm766_vm1, %v7744_v49, %v7745_v15  ;;  %v788_v9 = vmul.f32 %v4203_v37, %v770_v48  ;;  %v792_v14 = vmul.f32 %v4216_v47, %v779_v42  ;;  %v834_v27 = vsel %vm819_vm15, %v7748_v1, %v7747_v21  ;;  %v4833_v0 = vpop.permute.xlu0 %1577  ;;  %v4845_v15 = vpop.permute.xlu1 %1579 }
 0x233   :  { %7749 = vst [vmem:[#allocation31_spill] sm:$0xff] %v4833_v0  ;;  %v752_v36 = vsel %vm4756_vm6, %v742_v31, 0.0  ;;  %v753_v41 = vsel %vm153_vm11, %v743_v25, 0.0  ;;  %v794_v49 = vmul.f32 %v4216_v47, %v780_v19  ;;  %v832_v48 = vsel %vm819_vm15, %v7747_v21, %v7748_v1  ;;  %7750 = vst [vmem:[#allocation29_spill] sm:$0xff] %v4845_v15  ;;  %v7752_v31 = vld [vmem:[#allocation70_spill] sm:$0xff]  ;;  %v7753_v21 = vld [vmem:[#allocation73_spill] sm:$0xff] }
 0x234   :  { %v787_v42 = vmul.f32 %v4203_v37, %v767_v58  ;;  %v795_v0 = vadd.f32 %v791_v32, %v786_v4  ;;  %v797_v2 = vadd.f32 %v793_v28, %v788_v9  ;;  %v822_v25 = vsel %vm819_vm15, %v7752_v31, %v7751_v29  ;;  %1966 = vrot.lane.b32.xlu0 %v3284_v61, %s3205_s17  ;;  %v7754_v1 = vld [vmem:[#allocation75_spill] sm:$0xff]  ;;  %vm4906_vm6 = vmand %vm587_vm12, %vm160_vm0  ;;  %v7763_v15 = vld [vmem:[#allocation82_spill] sm:$0xff] }
 0x235   :  { %v755_v47 = vadd.f32 %v751_v8, %v700_v16  ;;  %v789_v19 = vmul.f32 %v4203_v37, %v768_v10  ;;  %v820_v58 = vsel %vm819_vm15, %v7751_v29, %v7752_v31  ;;  %v844_v32 = vmul.f32 %v4322_v44, %v834_v27  ;;  %1968 = vrot.lane.b32.xlu1 %v3288_v63, %s3205_s17 }
 0x236   :  { %v756_v28 = vadd.f32 %v752_v36, %v701_v7  ;;  %v796_v4 = vadd.f32 %v792_v14, %v787_v42  ;;  %v845_v9 = vmul.f32 %v4322_v44, %v832_v48  ;;  %v835_v16 = vsel %vm819_vm15, %v7754_v1, %v7753_v21  ;;  %v4869_v37 = vpop.permute.xlu0 %1581  ;;  %v4876_v14 = vpop.permute.xlu1 %1583 }
 0x237   :  { %7755 = vst [vmem:[#allocation148_spill] sm:$0xff] %v4869_v37  ;;  %v757_v8 = vadd.f32 %v753_v41, %v702_v33  ;;  %v798_v10 = vadd.f32 %v794_v49, %v789_v19  ;;  %v839_v29 = vmul.f32 %v4303_v13, %v822_v25  ;;  %v833_v7 = vsel %vm819_vm15, %v7753_v21, %v7754_v1  ;;  %v7757_v33 = vld [vmem:[#allocation69_spill] sm:$0xff]  ;;  %v7758_v41 = vld [vmem:[#allocation71_spill] sm:$0xff] }
 0x238   :  { %7756 = vst [vmem:[#allocation147_spill] sm:$0xff] %v4876_v14  ;;  %v803_v27 = vsel %vm587_vm12, %v795_v0, 0.0  ;;  %v805_v36 = vsel %vm587_vm12, %v797_v2, 0.0  ;;  %v840_v48 = vmul.f32 %v4303_v13, %v820_v58  ;;  %v823_v49 = vsel %vm819_vm15, %v7758_v41, %v7757_v33  ;;  %1975 = vrot.lane.b32.xlu0 %v3268_v46, %s3205_s17  ;;  %v7764_v14 = vld [vmem:[#allocation80_spill] sm:$0xff] }
 0x239   :  { %v821_v0 = vsel %vm819_vm15, %v7757_v33, %v7758_v41  ;;  %v848_v42 = vadd.f32 %v844_v32, %v839_v29  ;;  %v846_v2 = vmul.f32 %v4322_v44, %v835_v16  ;;  %vm929_vm1 = vcmp.lt.s32.totalorder %v3829_v59, 29  ;;  %1977 = vrot.lane.b32.xlu1 %v3266_v45, %s3205_s17 }
 0x23a   :  { %v4898_v31 = vstv %s4817_s18  ;;  %v808_v25 = vadd.f32 %v796_v4, %v755_v47  ;;  %v849_v58 = vadd.f32 %v845_v9, %v840_v48  ;;  %v847_v32 = vmul.f32 %v4322_v44, %v833_v7  ;;  %v4914_v1 = vpop.permute.xlu0 %1590  ;;  %v4917_v4 = vpop.permute.xlu1 %1592  ;;  %v7768_v48 = vld [vmem:[#allocation76_spill] sm:$0xff]  ;;  %s3210_s18 = smov 96  }
 0x23b   :  { %v4912_v21 = vstv %s4831_s19  ;;  %7761 = vst [vmem:[#allocation40_spill] sm:$0xff] %v4914_v1  ;;  %v807_v16 = vadd.f32 %v803_v27, %v754_v20  ;;  %v809_v29 = vadd.f32 %v805_v36, %v756_v28  ;;  %v810_v33 = vadd.f32 %v798_v10, %v757_v8  ;;  %7762 = vst [vmem:[#allocation42_spill] sm:$0xff] %v4917_v4  ;;  %v7766_v8 = vld [vmem:[#allocation81_spill] sm:$0xff]  ;;  %v7767_v36 = vld [vmem:[#allocation78_spill] sm:$0xff]  ;;  %s5812_s19 = sld [smem:[#allocation7 + $0x1f]] }
 0x23c   :  { %v841_v47 = vmul.f32 %v4303_v13, %v823_v49  ;;  %v842_v41 = vmul.f32 %v4303_v13, %v821_v0  ;;  %v887_v9 = vsel %vm874_vm3, %v7764_v14, %v7763_v15  ;;  %v889_v44 = vsel %vm874_vm3, %v7763_v15, %v7764_v14  ;;  %1979 = vrot.lane.b32.xlu0 %v3282_v60, %s3205_s17  ;;  %v7765_v13 = vld [vmem:[#allocation83_spill] sm:$0xff]  ;;  %v7789_v1 = vld [vmem:[#allocation98_spill] sm:$0xff] }
 0x23d   :  { %v4929_v7 = vstv %s4852_s20  ;;  %v858_v20 = vsel %vm4906_vm6, %v848_v42, 0.0  ;;  %v888_v10 = vsel %vm874_vm3, %v7766_v8, %v7765_v13  ;;  %v890_v27 = vsel %vm874_vm3, %v7765_v13, %v7766_v8  ;;  %1981 = vrot.lane.b32.xlu1 %v3272_v51, %s3205_s17  ;;  %s5679_s17 = sld [smem:[#allocation7 + $0x4f]]  ;;  %s5826_s20 = sld [smem:[#allocation7 + $0x50]] }
 0x23e   :  { %v850_v28 = vadd.f32 %v846_v2, %v841_v47  ;;  %v859_v15 = vsel %vm7452_vm5, %v849_v58, 0.0  ;;  %v851_v14 = vadd.f32 %v847_v32, %v842_v41  ;;  %v875_v49 = vsel %vm874_vm3, %v7768_v48, %v7767_v36  ;;  %v4957_v42 = vpop.permute.xlu0 %1594  ;;  %v7770_v2 = vld [vmem:[#allocation79_spill] sm:$0xff]  ;;  %v7771_v47 = vld [vmem:[#allocation77_spill] sm:$0xff]  ;;  %v4970_v8 = vpop.permute.xlu1 %1596 }
 0x23f   :  { %v877_v0 = vsel %vm874_vm3, %v7767_v36, %v7768_v48  ;;  %7769 = vst [vmem:[#allocation36_spill] sm:$0xff] %v4957_v42  ;;  %v876_v58 = vsel %vm874_vm3, %v7771_v47, %v7770_v2  ;;  %v878_v32 = vsel %vm874_vm3, %v7770_v2, %v7771_v47  ;;  %v899_v41 = vmul.f32 %v4434_v26, %v889_v44 }
 0x240   :  { %v900_v13 = vmul.f32 %v4434_v26, %v887_v9  ;;  %vm990_vm15 = vcmp.lt.s32.totalorder %v3829_v59, 19  ;;  %7772 = vst [vmem:[#allocation38_spill] sm:$0xff] %v4970_v8  ;;  %v4972_v36 = vadd.f32 %v858_v20, %v807_v16  ;;  %v901_v48 = vmul.f32 %v4434_v26, %v890_v27  ;;  %2017 = vrot.lane.b32.xlu0 %v3274_v52, %s3206_s23 }
 0x241   :  { %v902_v37 = vmul.f32 %v4434_v26, %v888_v10  ;;  %v4977_v4 = vstv %s4887_s21  ;;  %v863_v2 = vadd.f32 %v859_v15, %v808_v25  ;;  %v860_v9 = vsel %vm4906_vm6, %v850_v28, 0.0  ;;  %2019 = vrot.lane.b32.xlu1 %v3278_v56, %s3206_s23  ;;  %v7773_v25 = vld [vmem:[#allocation88_spill] sm:$0xff]  ;;  %v7774_v10 = vld [vmem:[#allocation90_spill] sm:$0xff]  ;;  %s5850_s21 = sld [smem:[#allocation7 + $0x20]] }
 0x242   :  { %v894_v44 = vmul.f32 %v4418_v3, %v877_v0  ;;  %v895_v47 = vmul.f32 %v4418_v3, %v875_v49  ;;  %v861_v26 = vsel %vm7452_vm5, %v851_v14, 0.0  ;;  %v896_v16 = vmul.f32 %v4418_v3, %v878_v32  ;;  %v4997_v28 = vpop.permute.xlu0 %1630  ;;  %v7776_v0 = vld [vmem:[#allocation89_spill] sm:$0xff]  ;;  %v7777_v14 = vld [vmem:[#allocation91_spill] sm:$0xff]  ;;  %vm5085_vm5 = vmand %vm587_vm12, %vm172_vm14 }
 0x243   :  { %v897_v20 = vmul.f32 %v4418_v3, %v876_v58  ;;  %v944_v19 = vsel %vm929_vm1, %v7774_v10, %v7773_v25  ;;  %7775 = vst [vmem:[#allocation150_spill] sm:$0xff] %v4997_v28  ;;  %v942_v49 = vsel %vm929_vm1, %v7773_v25, %v7774_v10  ;;  %v945_v32 = vsel %vm929_vm1, %v7777_v14, %v7776_v0  ;;  %v5007_v3 = vpop.permute.xlu1 %1632  ;;  %v7783_v25 = vld [vmem:[#allocation86_spill] sm:$0xff] }
 0x244   :  { %v903_v27 = vadd.f32 %v899_v41, %v894_v44  ;;  %v904_v15 = vadd.f32 %v900_v13, %v895_v47  ;;  %7778 = vst [vmem:[#allocation43_spill] sm:$0xff] %v5007_v3  ;;  %v864_v58 = vadd.f32 %v860_v9, %v809_v29  ;;  %vm7779_vm3 = vcmp.lt.s32.totalorder %v3865_v50, 14  ;;  %v7782_v47 = vld [vmem:[#allocation84_spill] sm:$0xff]  ;;  %2021 = vrot.lane.b32.xlu0 %v3284_v61, %s3206_s23  ;;  %v7784_v9 = vld [vmem:[#allocation85_spill] sm:$0xff]  ;;  %v7785_v3 = vld [vmem:[#allocation87_spill] sm:$0xff] }
 0x245   :  { %vm5013_vm6 = vmand %vm587_vm12, %vm7779_vm3  ;;  %v905_v13 = vadd.f32 %v901_v48, %v896_v16  ;;  %v906_v44 = vadd.f32 %v902_v37, %v897_v20  ;;  %v932_v10 = vsel %vm929_vm1, %v7783_v25, %v7782_v47  ;;  %v930_v29 = vsel %vm929_vm1, %v7782_v47, %v7783_v25  ;;  %2023 = vrot.lane.b32.xlu1 %v3288_v63, %s3206_s23 }
 0x246   :  { %v933_v28 = vsel %vm929_vm1, %v7785_v3, %v7784_v9  ;;  %v954_v37 = vmul.f32 %v4504_v30, %v944_v19  ;;  %v943_v48 = vsel %vm929_vm1, %v7776_v0, %v7777_v14  ;;  %vm976_vm3 = vcmp.ge.s32.totalorder %v3829_v59, 16  ;;  %v5044_v8 = vpop.permute.xlu0 %1634 }
 0x247   :  { %v865_v16 = vadd.f32 %v861_v26, %v810_v33  ;;  %v955_v20 = vmul.f32 %v4504_v30, %v942_v49  ;;  %v956_v47 = vmul.f32 %v4504_v30, %v945_v32  ;;  %v5042_v25 = vstv %s4955_s22  ;;  %7786 = vst [vmem:[#allocation41_spill] sm:$0xff] %v5044_v8  ;;  %v5057_v26 = vpop.permute.xlu1 %1636  ;;  %v7788_v8 = vld [vmem:[#allocation96_spill] sm:$0xff]  ;;  %vm5155_vm12 = vmand %vm976_vm3, %vm140_vm2  ;;  %s3211_s22 = smov 95  }
 0x248   :  { %v913_v19 = vsel %vm5013_vm6, %v903_v27, 0.0  ;;  %v914_v0 = vsel %vm167_vm7, %v904_v15, 0.0  ;;  %v949_v14 = vmul.f32 %v4501_v18, %v932_v10  ;;  %v931_v33 = vsel %vm929_vm1, %v7784_v9, %v7785_v3  ;;  %7787 = vst [vmem:[#allocation39_spill] sm:$0xff] %v5057_v26  ;;  %2030 = vrot.lane.b32.xlu0 %v3268_v46, %s3206_s23  ;;  %v7792_v9 = vld [vmem:[#allocation92_spill] sm:$0xff] }
 0x249   :  { %v950_v49 = vmul.f32 %v4501_v18, %v930_v29  ;;  %v951_v32 = vmul.f32 %v4501_v18, %v933_v28  ;;  %v957_v27 = vmul.f32 %v4504_v30, %v943_v48  ;;  %v1005_v15 = vsel %vm990_vm15, %v7789_v1, %v7788_v8  ;;  %2032 = vrot.lane.b32.xlu1 %v3266_v45, %s3206_s23 }
 0x24a   :  { %v915_v3 = vsel %vm5013_vm6, %v905_v13, 0.0  ;;  %v916_v10 = vsel %vm167_vm7, %v906_v44, 0.0  ;;  %v958_v29 = vadd.f32 %v954_v37, %v949_v14  ;;  %vm1045_vm1 = vcmp.lt.s32.totalorder %v3829_v59, 18  ;;  %v7793_v37 = vld [vmem:[#allocation94_spill] sm:$0xff]  ;;  %v5093_v14 = vpop.permute.xlu0 %1643  ;;  %vm5256_vm6 = vmand %vm976_vm3, %vm146_vm8 }
 0x24b   :  { %v5076_v30 = vstv %s4985_s1  ;;  %v952_v28 = vmul.f32 %v4501_v18, %v931_v33  ;;  %v959_v13 = vadd.f32 %v955_v20, %v950_v49  ;;  %v960_v44 = vadd.f32 %v956_v47, %v951_v32  ;;  %7794 = vst [vmem:[#allocation37_spill] sm:$0xff] %v5093_v14  ;;  %v5101_v40 = vpop.permute.xlu1 %1645  ;;  %v7796_v32 = vld [vmem:[#allocation97_spill] sm:$0xff]  ;;  %s5907_s1 = sld [smem:[#allocation7 + $0x21]] }
 0x24c   :  { %v993_v48 = vsel %vm990_vm15, %v7793_v37, %v7792_v9  ;;  %v917_v26 = vadd.f32 %v913_v19, %v4972_v36  ;;  %v918_v18 = vadd.f32 %v914_v0, %v863_v2  ;;  %v1003_v33 = vsel %vm990_vm15, %v7788_v8, %v7789_v1  ;;  %7795 = vst [vmem:[#allocation149_spill] sm:$0xff] %v5101_v40  ;;  %v7798_v19 = vld [vmem:[#allocation93_spill] sm:$0xff]  ;;  %v7799_v0 = vld [vmem:[#allocation95_spill] sm:$0xff] }
 0x24d   :  { %v1015_v42 = vmul.f32 %v4541_v38, %v1005_v15  ;;  %v919_v20 = vadd.f32 %v915_v3, %v864_v58  ;;  %v920_v47 = vadd.f32 %v916_v10, %v865_v16  ;;  %v961_v49 = vadd.f32 %v957_v27, %v952_v28  ;;  %2034 = vrot.lane.b32.xlu0 %v3282_v60, %s3206_s23 }
 0x24e   :  { %v1006_v14 = vsel %vm990_vm15, %v7797_v55, %v7796_v32  ;;  %v968_v1 = vsel %vm5085_vm5, %v958_v29, 0.0  ;;  %v991_v8 = vsel %vm990_vm15, %v7792_v9, %v7793_v37  ;;  %v1010_v36 = vmul.f32 %v4538_v22, %v993_v48  ;;  %2036 = vrot.lane.b32.xlu1 %v3272_v51, %s3206_s23  ;;  %s5873_s23 = sld [smem:[#allocation7 + $0x51]] }
 0x24f   :  { %v1004_v2 = vsel %vm990_vm15, %v7796_v32, %v7797_v55  ;;  %v969_v58 = vsel %vm173_vm13, %v959_v13, 0.0  ;;  %v970_v16 = vsel %vm5085_vm5, %v960_v44, 0.0  ;;  %v994_v27 = vsel %vm990_vm15, %v7799_v0, %v7798_v19  ;;  %v5135_v55 = vpop.permute.xlu0 %1647  ;;  %v5146_v41 = vpop.permute.xlu1 %1649 }
 0x250   :  { %v1016_v15 = vmul.f32 %v4541_v38, %v1003_v33  ;;  %v992_v3 = vsel %vm990_vm15, %v7798_v19, %v7799_v0  ;;  %v1019_v10 = vadd.f32 %v1015_v42, %v1010_v36  ;;  %v1017_v29 = vmul.f32 %v4541_v38, %v1006_v14  ;;  %v7802_v36 = vld [vmem:[#allocation106_spill] sm:$0xff] }
 0x251   :  { %vm1100_vm5 = vcmp.lt.s32.totalorder %v3829_v59, 17  ;;  %v5144_v28 = vstv %s5055_s25  ;;  %v971_v13 = vsel %vm173_vm13, %v961_v49, 0.0  ;;  %v1011_v44 = vmul.f32 %v4538_v22, %v991_v8  ;;  %2078 = vrot.lane.b32.xlu0 %v3274_v52, %s3207_s29  ;;  %s5909_s25 = sld [smem:[#allocation7 + $0x52]] }
 0x252   :  { %v1018_v42 = vmul.f32 %v4541_v38, %v1004_v2  ;;  %v5161_v37 = vstv %s5066_s26  ;;  %v972_v48 = vadd.f32 %v968_v1, %v917_v26  ;;  %v973_v14 = vadd.f32 %v969_v58, %v918_v18  ;;  %2080 = vrot.lane.b32.xlu1 %v3278_v56, %s3207_s29  ;;  %v7803_v38 = vld [vmem:[#allocation104_spill] sm:$0xff]  ;;  %s3212_s26 = smov 94  }
 0x253   :  { %v974_v33 = vadd.f32 %v970_v16, %v919_v20  ;;  %v1012_v49 = vmul.f32 %v4538_v22, %v994_v27  ;;  %v1013_v32 = vmul.f32 %v4538_v22, %v992_v3  ;;  %v1020_v8 = vadd.f32 %v1016_v15, %v1011_v44  ;;  %v5177_v18 = vpop.permute.xlu0 %1689  ;;  %v7805_v16 = vld [vmem:[#allocation105_spill] sm:$0xff]  ;;  %v7806_v22 = vld [vmem:[#allocation107_spill] sm:$0xff]  ;;  %v5185_v0 = vpop.permute.xlu1 %1691  ;;  %v7808_v15 = vld [vmem:[#allocation102_spill] sm:$0xff] }
 0x254   :  { %v1058_v2 = vsel %vm1045_vm1, %v7803_v38, %v7802_v36  ;;  %v1060_v26 = vsel %vm1045_vm1, %v7802_v36, %v7803_v38  ;;  %7804 = vst [vmem:[#allocation48_spill] sm:$0xff] %v5177_v18  ;;  %v975_v20 = vadd.f32 %v971_v13, %v920_v47  ;;  %v1029_v1 = vsel %vm5155_vm12, %v1019_v10, 0.0  ;;  %7807 = vst [vmem:[#allocation50_spill] sm:$0xff] %v5185_v0  ;;  %v7809_v3 = vld [vmem:[#allocation100_spill] sm:$0xff]  ;;  %v7811_v13 = vld [vmem:[#allocation103_spill] sm:$0xff] }
 0x255   :  { %v1021_v58 = vadd.f32 %v1017_v29, %v1012_v49  ;;  %v1061_v19 = vsel %vm1045_vm1, %v7806_v22, %v7805_v16  ;;  %v1022_v27 = vadd.f32 %v1018_v42, %v1013_v32  ;;  %v1046_v44 = vsel %vm1045_vm1, %v7809_v3, %v7808_v15  ;;  %2082 = vrot.lane.b32.xlu0 %v3284_v61, %s3207_s29  ;;  %v7810_v29 = vld [vmem:[#allocation101_spill] sm:$0xff] }
 0x256   :  { %v1048_v47 = vsel %vm1045_vm1, %v7808_v15, %v7809_v3  ;;  %v5196_v10 = vstv %s5107_s27  ;;  %v1049_v42 = vsel %vm1045_vm1, %v7811_v13, %v7810_v29  ;;  %v1070_v49 = vmul.f32 %v4684_v39, %v1060_v26  ;;  %2084 = vrot.lane.b32.xlu1 %v3288_v63, %s3207_s29  ;;  %s6048_s27 = sld [smem:[#allocation7 + $0x22]] }
 0x257   :  { %v1071_v32 = vmul.f32 %v4684_v39, %v1058_v2  ;;  %v1059_v36 = vsel %vm1045_vm1, %v7805_v16, %v7806_v22  ;;  %v1030_v38 = vsel %vm141_vm4, %v1020_v8, 0.0  ;;  %v1033_v15 = vadd.f32 %v1029_v1, %v972_v48  ;;  %v5221_v26 = vpop.permute.xlu0 %1693  ;;  %v5233_v8 = vpop.permute.xlu1 %1695 }
 0x258   :  { %v1072_v3 = vmul.f32 %v4684_v39, %v1061_v19  ;;  %vm1155_vm15 = vcmp.lt.s32.totalorder %v3829_v59, 16  ;;  %v5219_v0 = vstv %s5133_s28  ;;  %7812 = vst [vmem:[#allocation44_spill] sm:$0xff] %v5221_v26  ;;  %v1031_v2 = vsel %vm5155_vm12, %v1021_v58, 0.0  ;;  %7813 = vst [vmem:[#allocation46_spill] sm:$0xff] %v5233_v8  ;;  %v7814_v58 = vld [vmem:[#allocation112_spill] sm:$0xff]  ;;  %s6050_s28 = sld [smem:[#allocation7 + $0x53]] }
 0x259   :  { %v1065_v16 = vmul.f32 %v4681_v24, %v1048_v47  ;;  %v1066_v22 = vmul.f32 %v4681_v24, %v1046_v44  ;;  %v1047_v48 = vsel %vm1045_vm1, %v7810_v29, %v7811_v13  ;;  %v1032_v1 = vsel %vm141_vm4, %v1022_v27, 0.0  ;;  %v7815_v47 = vld [vmem:[#allocation114_spill] sm:$0xff]  ;;  %2091 = vrot.lane.b32.xlu0 %v3268_v46, %s3207_s29 }
 0x25a   :  { %v1067_v19 = vmul.f32 %v4681_v24, %v1049_v42  ;;  %v1073_v9 = vmul.f32 %v4684_v39, %v1059_v36  ;;  %v1115_v44 = vsel %vm1100_vm5, %v7815_v47, %v7814_v58  ;;  %v1034_v29 = vadd.f32 %v1030_v38, %v973_v14  ;;  %2093 = vrot.lane.b32.xlu1 %v3266_v45, %s3207_s29  ;;  %v7819_v36 = vld [vmem:[#allocation110_spill] sm:$0xff] }
 0x25b   :  { %v1074_v13 = vadd.f32 %v1070_v49, %v1065_v16  ;;  %v1075_v18 = vadd.f32 %v1071_v32, %v1066_v22  ;;  %v1113_v27 = vsel %vm1100_vm5, %v7814_v58, %v7815_v47  ;;  %v1035_v39 = vadd.f32 %v1031_v2, %v974_v33  ;;  %v7818_v32 = vld [vmem:[#allocation108_spill] sm:$0xff]  ;;  %v5264_v16 = vpop.permute.xlu0 %1702  ;;  %v7821_v2 = vld [vmem:[#allocation113_spill] sm:$0xff] }
 0x25c   :  { %v1068_v42 = vmul.f32 %v4681_v24, %v1047_v48  ;;  %v1076_v49 = vadd.f32 %v1072_v3, %v1067_v19  ;;  %v1103_v38 = vsel %vm1100_vm5, %v7819_v36, %v7818_v32  ;;  %7820 = vst [vmem:[#allocation49_spill] sm:$0xff] %v5264_v16  ;;  %v1036_v22 = vadd.f32 %v1032_v1, %v975_v20  ;;  %v7822_v48 = vld [vmem:[#allocation115_spill] sm:$0xff]  ;;  %v5275_v19 = vpop.permute.xlu1 %1704  ;;  %v7828_v16 = vld [vmem:[#allocation122_spill] sm:$0xff] }
 0x25d   :  { %v1101_v24 = vsel %vm1100_vm5, %v7818_v32, %v7819_v36  ;;  %v1125_v33 = vmul.f32 %v4745_v57, %v1115_v44  ;;  %v1116_v3 = vsel %vm1100_vm5, %v7822_v48, %v7821_v2  ;;  %7823 = vst [vmem:[#allocation51_spill] sm:$0xff] %v5275_v19  ;;  %v1126_v47 = vmul.f32 %v4745_v57, %v1113_v27  ;;  %v7824_v27 = vld [vmem:[#allocation109_spill] sm:$0xff]  ;;  %v7827_v19 = vld [vmem:[#allocation120_spill] sm:$0xff] }
 0x25e   :  { %v1077_v58 = vadd.f32 %v1073_v9, %v1068_v42  ;;  %v1114_v20 = vsel %vm1100_vm5, %v7821_v2, %v7822_v48  ;;  %v5283_v1 = vstv %s5198_s0  ;;  %2095 = vrot.lane.b32.xlu0 %v3282_v60, %s3207_s29  ;;  %v1084_v44 = vsel %vm5256_vm6, %v1074_v13, 0.0  ;;  %v7825_v42 = vld [vmem:[#allocation111_spill] sm:$0xff]  ;;  %2097 = vrot.lane.b32.xlu1 %v3272_v51, %s3207_s29  ;;  %s6063_s29 = sld [smem:[#allocation7 + $0x23]]  ;;  %s6076_s0 = sld [smem:[#allocation7 + $0x54]] }
 0x25f   :  { %v1085_v32 = vsel %vm147_vm9, %v1075_v18, 0.0  ;;  %v1120_v9 = vmul.f32 %v4742_v6, %v1103_v38  ;;  %v1104_v36 = vsel %vm1100_vm5, %v7825_v42, %v7824_v27  ;;  %v1086_v2 = vsel %vm5256_vm6, %v1076_v49, 0.0  ;;  %v5310_v48 = vpop.permute.xlu0 %1706  ;;  %vm5503_vm6 = vmand %vm976_vm3, %vm160_vm0 }
 0x260   :  { %v1121_v13 = vmul.f32 %v4742_v6, %v1101_v24  ;;  %v1102_v18 = vsel %vm1100_vm5, %v7824_v27, %v7825_v42  ;;  %v1127_v38 = vmul.f32 %v4745_v57, %v1116_v3  ;;  %7826 = vst [vmem:[#allocation45_spill] sm:$0xff] %v5310_v48  ;;  %v1128_v26 = vmul.f32 %v4745_v57, %v1114_v20  ;;  %v5321_v24 = vpop.permute.xlu1 %1708  ;;  %vm5330_vm5 = vmand %vm976_vm3, %vm152_vm10 }
 0x261   :  { %v1129_v8 = vadd.f32 %v1125_v33, %v1120_v9  ;;  %v1170_v14 = vsel %vm1155_vm15, %v7828_v16, %v7827_v19  ;;  %vm1208_vm1 = vcmp.lt.s32.totalorder %v3829_v59, 15  ;;  %v5319_v49 = vstv %s5231_s30  ;;  %7829 = vst [vmem:[#allocation47_spill] sm:$0xff] %v5321_v24  ;;  %v7833_v9 = vld [vmem:[#allocation118_spill] sm:$0xff]  ;;  %s6124_s30 = sld [smem:[#allocation7 + $0x24]] }
 0x262   :  { %v1088_v27 = vadd.f32 %v1084_v44, %v1033_v15  ;;  %v1087_v3 = vsel %vm147_vm9, %v1077_v58, 0.0  ;;  %v1122_v42 = vmul.f32 %v4742_v6, %v1104_v36  ;;  %v1130_v33 = vadd.f32 %v1126_v47, %v1121_v13  ;;  %2133 = vrot.lane.b32.xlu0 %v3274_v52, %s3208_s6  ;;  %v7832_v58 = vld [vmem:[#allocation116_spill] sm:$0xff]  ;;  %2135 = vrot.lane.b32.xlu1 %v3278_v56, %s3208_s6 }
 0x263   :  { %v1089_v20 = vadd.f32 %v1085_v32, %v1034_v29  ;;  %v1090_v15 = vadd.f32 %v1086_v2, %v1035_v39  ;;  %v1123_v44 = vmul.f32 %v4742_v6, %v1102_v18  ;;  %v1158_v36 = vsel %vm1155_vm15, %v7833_v9, %v7832_v58  ;;  %v7834_v29 = vld [vmem:[#allocation121_spill] sm:$0xff]  ;;  %v7835_v39 = vld [vmem:[#allocation123_spill] sm:$0xff]  ;;  %v5352_v32 = vpop.permute.xlu0 %1744 }
 0x264   :  { %v1131_v24 = vadd.f32 %v1127_v38, %v1122_v42  ;;  %v1168_v47 = vsel %vm1155_vm15, %v7827_v19, %v7828_v16  ;;  %v1180_v13 = vmul.f32 %v4806_v23, %v1170_v14  ;;  %v1171_v6 = vsel %vm1155_vm15, %v7835_v39, %v7834_v29  ;;  %7836 = vst [vmem:[#allocation56_spill] sm:$0xff] %v5352_v32  ;;  %v5360_v19 = vpop.permute.xlu1 %1746 }
 0x265   :  { %v1091_v2 = vadd.f32 %v1087_v3, %v1036_v22  ;;  %v1139_v18 = vsel %vm5330_vm5, %v1129_v8, 0.0  ;;  %v1132_v38 = vadd.f32 %v1128_v26, %v1123_v44  ;;  %v1169_v16 = vsel %vm1155_vm15, %v7834_v29, %v7835_v39  ;;  %7837 = vst [vmem:[#allocation58_spill] sm:$0xff] %v5360_v19  ;;  %v7838_v8 = vld [vmem:[#allocation117_spill] sm:$0xff]  ;;  %v7839_v26 = vld [vmem:[#allocation119_spill] sm:$0xff] }
 0x266   :  { %v1140_v14 = vsel %vm153_vm11, %v1130_v33, 0.0  ;;  %v1156_v22 = vsel %vm1155_vm15, %v7832_v58, %v7833_v9  ;;  %v1175_v3 = vmul.f32 %v4785_v54, %v1158_v36  ;;  %v1159_v42 = vsel %vm1155_vm15, %v7839_v26, %v7838_v8  ;;  %2137 = vrot.lane.b32.xlu0 %v3284_v61, %s3208_s6  ;;  %2139 = vrot.lane.b32.xlu1 %v3288_v63, %s3208_s6 }
 0x267   :  { %v1157_v33 = vsel %vm1155_vm15, %v7838_v8, %v7839_v26  ;;  %v1181_v44 = vmul.f32 %v4806_v23, %v1168_v47  ;;  %v1182_v58 = vmul.f32 %v4806_v23, %v1171_v6  ;;  %v5386_v9 = vstv %s5296_s4  ;;  %v5397_v8 = vpop.permute.xlu0 %1748  ;;  %s3213_s4 = smov 93  }
 0x268   :  { %v1141_v36 = vsel %vm5330_vm5, %v1131_v24, 0.0  ;;  %v1184_v29 = vadd.f32 %v1180_v13, %v1175_v3  ;;  %v1183_v39 = vmul.f32 %v4806_v23, %v1169_v16  ;;  %vm1263_vm12 = vcmp.lt.s32.totalorder %v3829_v59, 14  ;;  %7840 = vst [vmem:[#allocation52_spill] sm:$0xff] %v5397_v8  ;;  %v5401_v48 = vpop.permute.xlu1 %1750  ;;  %v7842_v23 = vld [vmem:[#allocation130_spill] sm:$0xff]  ;;  %v7843_v13 = vld [vmem:[#allocation128_spill] sm:$0xff] }
 0x269   :  { %v5395_v19 = vstv %s5308_s5  ;;  %v1143_v47 = vadd.f32 %v1139_v18, %v1088_v27  ;;  %v1144_v26 = vadd.f32 %v1140_v14, %v1089_v20  ;;  %v1176_v6 = vmul.f32 %v4785_v54, %v1156_v22  ;;  %7841 = vst [vmem:[#allocation54_spill] sm:$0xff] %v5401_v48  ;;  %v7844_v22 = vld [vmem:[#allocation129_spill] sm:$0xff]  ;;  %s3214_s5 = smov 83  }
 0x26a   :  { %v1177_v32 = vmul.f32 %v4785_v54, %v1159_v42  ;;  %v1142_v24 = vsel %vm153_vm11, %v1132_v38, 0.0  ;;  %v1178_v57 = vmul.f32 %v4785_v54, %v1157_v33  ;;  %v1221_v16 = vsel %vm1208_vm1, %v7843_v13, %v7842_v23  ;;  %2146 = vrot.lane.b32.xlu0 %v3268_v46, %s3208_s6  ;;  %v7845_v38 = vld [vmem:[#allocation131_spill] sm:$0xff]  ;;  %2148 = vrot.lane.b32.xlu1 %v3266_v45, %s3208_s6  ;;  %v7846_v33 = vld [vmem:[#allocation126_spill] sm:$0xff] }
 0x26b   :  { %v1223_v27 = vsel %vm1208_vm1, %v7842_v23, %v7843_v13  ;;  %v1145_v20 = vadd.f32 %v1141_v36, %v1090_v15  ;;  %v1185_v18 = vadd.f32 %v1181_v44, %v1176_v6  ;;  %v1224_v54 = vsel %vm1208_vm1, %v7845_v38, %v7844_v22  ;;  %v7847_v15 = vld [vmem:[#allocation124_spill] sm:$0xff]  ;;  %v7849_v6 = vld [vmem:[#allocation125_spill] sm:$0xff]  ;;  %v7850_v23 = vld [vmem:[#allocation127_spill] sm:$0xff] }
 0x26c   :  { %v1186_v14 = vadd.f32 %v1182_v58, %v1177_v32  ;;  %v1192_v3 = vsel %vm976_vm3, %v1184_v29, 0.0  ;;  %v1187_v42 = vadd.f32 %v1183_v39, %v1178_v57  ;;  %v1209_v32 = vsel %vm1208_vm1, %v7847_v15, %v7846_v33  ;;  %v5434_v58 = vpop.permute.xlu0 %1757  ;;  %v5442_v57 = vpop.permute.xlu1 %1759 }
 0x26d   :  { %v1211_v44 = vsel %vm1208_vm1, %v7846_v33, %v7847_v15  ;;  %7848 = vst [vmem:[#allocation59_spill] sm:$0xff] %v5434_v58  ;;  %v1146_v36 = vadd.f32 %v1142_v24, %v1091_v2  ;;  %v1212_v13 = vsel %vm1208_vm1, %v7850_v23, %v7849_v6  ;;  %v1233_v29 = vmul.f32 %v4912_v21, %v1223_v27 }
 0x26e   :  { %v1234_v39 = vmul.f32 %v4912_v21, %v1221_v16  ;;  %7851 = vst [vmem:[#allocation57_spill] sm:$0xff] %v5442_v57  ;;  %v1222_v48 = vsel %vm1208_vm1, %v7844_v22, %v7845_v38  ;;  %v1235_v33 = vmul.f32 %v4912_v21, %v1224_v54  ;;  %vm1318_vm15 = vcmp.lt.s32.totalorder %v3829_v59, 13  ;;  %2150 = vrot.lane.b32.xlu0 %v3282_v60, %s3208_s6  ;;  %v7854_v57 = vld [vmem:[#allocation139_spill] sm:$0xff] }
 0x26f   :  { %v5451_v2 = vstv %s5373_s7  ;;  %v5454_v24 = vstv %s5375_s8  ;;  %v5458_v27 = vadd.f32 %v1192_v3, %v1143_v47  ;;  %v5460_v16 = vadd.f32 %v1185_v18, %v1144_v26  ;;  %2152 = vrot.lane.b32.xlu1 %v3272_v51, %s3208_s6  ;;  %s3215_s6 = smov 82   ;;  %s6567_s7 = sld [smem:[#allocation7 + $0x55]] }
 0x270   :  { %v1228_v15 = vmul.f32 %v4898_v31, %v1211_v44  ;;  %v1229_v8 = vmul.f32 %v4898_v31, %v1209_v32  ;;  %v1194_v22 = vsel %vm976_vm3, %v1186_v14, 0.0  ;;  %v5468_v38 = vadd.f32 %v1187_v42, %v1146_v36  ;;  %v5475_v18 = vpop.permute.xlu0 %1761  ;;  %v7853_v44 = vld [vmem:[#allocation137_spill] sm:$0xff]  ;;  %v5482_v42 = vpop.permute.xlu1 %1763  ;;  %s3216_s8 = smov 81  }
 0x271   :  { %v1210_v47 = vsel %vm1208_vm1, %v7849_v6, %v7850_v23  ;;  %v1230_v26 = vmul.f32 %v4898_v31, %v1212_v13  ;;  %7852 = vst [vmem:[#allocation53_spill] sm:$0xff] %v5475_v18  ;;  %v1236_v32 = vmul.f32 %v4912_v21, %v1222_v48  ;;  %v1278_v14 = vsel %vm1263_vm12, %v7854_v57, %v7853_v44  ;;  %v7856_v23 = vld [vmem:[#allocation140_spill] sm:$0xff]  ;;  %v7857_v13 = vld [vmem:[#allocation138_spill] sm:$0xff] }
 0x272   :  { %v1237_v54 = vadd.f32 %v1233_v29, %v1228_v15  ;;  %v1238_v3 = vadd.f32 %v1234_v39, %v1229_v8  ;;  %7855 = vst [vmem:[#allocation55_spill] sm:$0xff] %v5482_v42  ;;  %v1276_v6 = vsel %vm1263_vm12, %v7853_v44, %v7854_v57  ;;  %v1277_v8 = vsel %vm1263_vm12, %v7857_v13, %v7856_v23  ;;  %v7860_v57 = vld [vmem:[#allocation132_spill] sm:$0xff] }
 0x273   :  { %v1239_v36 = vadd.f32 %v1235_v33, %v1230_v26  ;;  %v1279_v21 = vsel %vm1263_vm12, %v7856_v23, %v7857_v13  ;;  %2188 = vrot.lane.b32.xlu0 %v3274_v52, %s3209_s10  ;;  %v1198_v48 = vadd.f32 %v1194_v22, %v1145_v20  ;;  %v1231_v29 = vmul.f32 %v4898_v31, %v1210_v47  ;;  %v7861_v33 = vld [vmem:[#allocation134_spill] sm:$0xff]  ;;  %v7863_v20 = vld [vmem:[#allocation135_spill] sm:$0xff]  ;;  %v7864_v22 = vld [vmem:[#allocation133_spill] sm:$0xff] }
 0x274   :  { %v1266_v15 = vsel %vm1263_vm12, %v7861_v33, %v7860_v57  ;;  %v5512_v26 = vstv %s5420_s9  ;;  %2190 = vrot.lane.b32.xlu1 %v3278_v56, %s3209_s10  ;;  %v1264_v31 = vsel %vm1263_vm12, %v7860_v57, %v7861_v33  ;;  %v1265_v47 = vsel %vm1263_vm12, %v7864_v22, %v7863_v20  ;;  %v5529_v13 = vpop.permute.xlu0 %1799  ;;  %v5534_v33 = vpop.permute.xlu1 %1801  ;;  %s6710_s9 = sld [smem:[#allocation7 + $0x25]] }
 0x275   :  { %7862 = vst [vmem:[#allocation64_spill] sm:$0xff] %v5512_v26  ;;  %v1267_v44 = vsel %vm1263_vm12, %v7863_v20, %v7864_v22  ;;  %v1288_v23 = vmul.f32 %v4977_v4, %v1278_v14  ;;  %v1240_v42 = vadd.f32 %v1236_v32, %v1231_v29  ;;  %v1289_v58 = vmul.f32 %v4977_v4, %v1276_v6  ;;  %v7869_v22 = vld [vmem:[#allocation141_spill] sm:$0xff] }
 0x276   :  { %v1290_v18 = vmul.f32 %v4977_v4, %v1279_v21  ;;  %v1291_v57 = vmul.f32 %v4977_v4, %v1277_v8  ;;  %7865 = vst [vmem:[#allocation66_spill] sm:$0xff] %v5534_v33  ;;  %v1247_v26 = vsel %vm5503_vm6, %v1237_v54, 0.0  ;;  %vm7866_vm1 = vcmp.lt.s32.totalorder %v3872_v43, 15  ;;  %v7867_v8 = vld [vmem:[#allocation151_spill] sm:$0xff]  ;;  %v7868_v21 = vld [vmem:[#allocation152_spill] sm:$0xff] }
 0x277   :  { %v1248_v40 = vsel %vm7866_vm1, %v1238_v3, 0.0  ;;  %v1249_v14 = vsel %vm5503_vm6, %v1239_v36, 0.0  ;;  %v1283_v20 = vmul.f32 %v4929_v7, %v1266_v15  ;;  %2192 = vrot.lane.b32.xlu0 %v3284_v61, %s3209_s10  ;;  %v1284_v32 = vmul.f32 %v4929_v7, %v1264_v31 }
 0x278   :  { %v1285_v4 = vmul.f32 %v4929_v7, %v1267_v44  ;;  %v1286_v6 = vmul.f32 %v4929_v7, %v1265_v47  ;;  %v1333_v54 = vsel %vm1318_vm15, %v4075_v11, %v7867_v8  ;;  %2194 = vrot.lane.b32.xlu1 %v3288_v63, %s3209_s10  ;;  %v1331_v36 = vsel %vm1318_vm15, %v7867_v8, %v4075_v11  ;;  %v5573_v39 = vpop.permute.xlu0 %1803  ;;  %v7870_v47 = vld [vmem:[#allocation144_spill] sm:$0xff] }
 0x279   :  { %v1292_v3 = vadd.f32 %v1288_v23, %v1283_v20  ;;  %v1332_v7 = vsel %vm1318_vm15, %v7868_v21, %v4081_v35  ;;  %v1334_v29 = vsel %vm1318_vm15, %v4081_v35, %v7868_v21  ;;  %vm1373_vm5 = vcmp.lt.s32.totalorder %v3829_v59, 3  ;;  %v5579_v23 = vpop.permute.xlu1 %1805 }
 0x27a   :  { %v1293_v15 = vadd.f32 %v1289_v58, %v1284_v32  ;;  %v1294_v11 = vadd.f32 %v1290_v18, %v1285_v4  ;;  %v1295_v31 = vadd.f32 %v1291_v57, %v1286_v6  ;;  %v1321_v44 = vsel %vm1318_vm15, %v7870_v47, %v7869_v22  ;;  %v7874_v18 = vld [vmem:[#allocation146_spill] sm:$0xff] }
 0x27b   :  { %vm7871_vm12 = vcmp.lt.s32.totalorder %v3865_v50, 14  ;;  %v1319_v58 = vsel %vm1318_vm15, %v7869_v22, %v7870_v47  ;;  %v7875_v57 = vld [vmem:[#allocation142_spill] sm:$0xff]  ;;  %v1343_v4 = vmul.f32 %v5076_v30, %v1333_v54  ;;  %2201 = vrot.lane.b32.xlu0 %v3268_v46, %s3209_s10  ;;  %v1251_v6 = vadd.f32 %v1247_v26, %v5458_v27 }
 0x27c   :  { %vm5585_vm6 = vmand %vm976_vm3, %vm7871_vm12  ;;  %v1320_v20 = vsel %vm1318_vm15, %v7875_v57, %v7874_v18  ;;  %v1322_v32 = vsel %vm1318_vm15, %v7874_v18, %v7875_v57  ;;  %v1344_v8 = vmul.f32 %v5076_v30, %v1331_v36  ;;  %v1345_v21 = vmul.f32 %v5076_v30, %v1334_v29  ;;  %2203 = vrot.lane.b32.xlu1 %v3266_v45, %s3209_s10  ;;  %v5616_v33 = vpop.permute.xlu0 %1812 }
 0x27d   :  { %v1346_v22 = vmul.f32 %v5076_v30, %v1332_v7  ;;  %v1252_v47 = vadd.f32 %v1248_v40, %v5460_v16  ;;  %vm7876_vm15 = vmmov %vm7866_vm1  ;;  %v1253_v18 = vadd.f32 %v1249_v14, %v1198_v48  ;;  %v1338_v57 = vmul.f32 %v5042_v25, %v1321_v44  ;;  %v5625_v40 = vpop.permute.xlu1 %1814 }
 0x27e   :  { %v1250_v54 = vsel %vm7876_vm15, %v1240_v42, 0.0  ;;  %v1302_v27 = vsel %vm5585_vm6, %v1292_v3, 0.0  ;;  %v1339_v26 = vmul.f32 %v5042_v25, %v1319_v58  ;;  %v1340_v30 = vmul.f32 %v5042_v25, %v1322_v32  ;;  %vm5640_vm1 = vmand %vm976_vm3, %vm172_vm14 }
 0x27f   :  { %v1341_v36 = vmul.f32 %v5042_v25, %v1320_v20  ;;  %v1303_v16 = vsel %vm167_vm7, %v1293_v15, 0.0  ;;  %v1304_v42 = vsel %vm5585_vm6, %v1294_v11, 0.0  ;;  %v1305_v48 = vsel %vm167_vm7, %v1295_v31, 0.0  ;;  %2205 = vrot.lane.b32.xlu0 %v3282_v60, %s3209_s10 }
 0x280   :  { %v1347_v14 = vadd.f32 %v1343_v4, %v1338_v57  ;;  %v1254_v25 = vadd.f32 %v1250_v54, %v5468_v38  ;;  %v1348_v7 = vadd.f32 %v1344_v8, %v1339_v26  ;;  %v1349_v29 = vadd.f32 %v1345_v21, %v1340_v30  ;;  %2207 = vrot.lane.b32.xlu1 %v3272_v51, %s3209_s10  ;;  %v5656_v35 = vpop.permute.xlu0 %1816  ;;  %v7880_v26 = vld [vmem:[#allocation153_spill] sm:$0xff]  ;;  %s6724_s10 = sld [smem:[#allocation7 + $0x56]] }
 0x281   :  { %v1350_v15 = vadd.f32 %v1346_v22, %v1341_v36  ;;  %vm1426_vm12 = vcmp.lt.s32.totalorder %v3829_v59, 2  ;;  %v1306_v11 = vadd.f32 %v1302_v27, %v1251_v6  ;;  %v5648_v31 = vstv %s5552_s2  ;;  %v5662_v8 = vpop.permute.xlu1 %1818  ;;  %v7879_v27 = vld [vmem:[#allocation154_spill] sm:$0xff]  ;;  %s3217_s2 = smov 80  }
 0x282   :  { %v5651_v38 = vstv %s5569_s11  ;;  %v5654_v44 = vstv %s5571_s13  ;;  %v1307_v58 = vadd.f32 %v1303_v16, %v1252_v47  ;;  %v1308_v20 = vadd.f32 %v1304_v42, %v1253_v18  ;;  %s3009_s11 = sld [smem:[#allocation7 + $0x26]]  ;;  %s3010_s13 = sld [smem:[#allocation7 + $0x57]] }
 0x283   :  { %v1309_v32 = vadd.f32 %v1305_v48, %v1254_v25  ;;  %v1388_v4 = vsel %vm1373_vm5, %v4261_v5, %v4207_v12  ;;  %v1357_v6 = vsel %vm5640_vm1, %v1347_v14, 0.0  ;;  %v1386_v21 = vsel %vm1373_vm5, %v4207_v12, %v4261_v5  ;;  %2243 = vrot.lane.b32.xlu0 %v3274_v52, %s3210_s18 }
 0x284   :  { %v1389_v22 = vsel %vm1373_vm5, %v4270_v34, %v4218_v17  ;;  %v5675_v47 = vstv %s5602_s14  ;;  %v1358_v54 = vsel %vm173_vm13, %v1348_v7, 0.0  ;;  %v1359_v12 = vsel %vm5640_vm1, %v1349_v29, 0.0  ;;  %2245 = vrot.lane.b32.xlu1 %v3278_v56, %s3210_s18  ;;  %v5708_v42 = vpop.permute.xlu0 %1854  ;;  %s3218_s14 = smov 79  }
 0x285   :  { %v1360_v5 = vsel %vm173_vm13, %v1350_v15, 0.0  ;;  %v1376_v18 = vsel %vm1373_vm5, %v4175_v53, %v4126_v62  ;;  %v1374_v57 = vsel %vm1373_vm5, %v4126_v62, %v4175_v53  ;;  %v1375_v30 = vsel %vm1373_vm5, %v7880_v26, %v7879_v27  ;;  %7881 = vst [vmem:[#allocation65_spill] sm:$0xff] %v5708_v42  ;;  %v5720_v25 = vpop.permute.xlu1 %1856 }
 0x286   :  { %v1377_v36 = vsel %vm1373_vm5, %v7879_v27, %v7880_v26  ;;  %v1398_v16 = vmul.f32 %v5161_v37, %v1388_v4  ;;  %v1399_v48 = vmul.f32 %v5161_v37, %v1386_v21  ;;  %v1387_v62 = vsel %vm1373_vm5, %v4218_v17, %v4270_v34  ;;  %7882 = vst [vmem:[#allocation67_spill] sm:$0xff] %v5720_v25  ;;  %v7884_v21 = vld [vmem:[#allocation17_spill] sm:$0xff]  ;;  %v7889_v26 = vld [vmem:[#allocation12_spill] sm:$0xff] }
 0x287   :  { %v1400_v53 = vmul.f32 %v5161_v37, %v1389_v22  ;;  %vm1479_vm3 = vcmp.lt.s32.totalorder %v3829_v59, 1  ;;  %v5718_v14 = vstv %s5623_s15  ;;  %v5722_v3 = vadd.f32 %v1357_v6, %v1306_v11  ;;  %2247 = vrot.lane.b32.xlu0 %v3284_v61, %s3210_s18  ;;  %v7883_v6 = vld [vmem:[#allocation13_spill] sm:$0xff]  ;;  %s3011_s15 = sld [smem:[#allocation7 + $0x27]] }
 0x288   :  { %v5724_v7 = vadd.f32 %v1358_v54, %v1307_v58  ;;  %v5726_v29 = vadd.f32 %v1359_v12, %v1308_v20  ;;  %v1393_v15 = vmul.f32 %v5144_v28, %v1376_v18  ;;  %v5731_v17 = vadd.f32 %v1360_v5, %v1309_v32  ;;  %2249 = vrot.lane.b32.xlu1 %v3288_v63, %s3210_s18  ;;  %v5747_v54 = vpop.permute.xlu0 %1858  ;;  %v7886_v5 = vld [vmem:[#allocation15_spill] sm:$0xff] }
 0x289   :  { %v1394_v34 = vmul.f32 %v5144_v28, %v1374_v57  ;;  %v1395_v4 = vmul.f32 %v5144_v28, %v1377_v36  ;;  %v1396_v11 = vmul.f32 %v5144_v28, %v1375_v30  ;;  %v1401_v20 = vmul.f32 %v5161_v37, %v1387_v62  ;;  %7885 = vst [vmem:[#allocation60_spill] sm:$0xff] %v5747_v54  ;;  %v7887_v18 = vld [vmem:[#allocation19_spill] sm:$0xff]  ;;  %v5757_v27 = vpop.permute.xlu1 %1860  ;;  %v7890_v30 = vld [vmem:[#allocation16_spill] sm:$0xff] }
 0x28a   :  { %v1402_v58 = vadd.f32 %v1398_v16, %v1393_v15  ;;  %v1439_v32 = vsel %vm1426_vm12, %v7884_v21, %v7883_v6  ;;  %v1441_v22 = vsel %vm1426_vm12, %v7883_v6, %v7884_v21  ;;  %v1440_v57 = vsel %vm1426_vm12, %v7887_v18, %v7886_v5  ;;  %7888 = vst [vmem:[#allocation62_spill] sm:$0xff] %v5757_v27  ;;  %v7892_v15 = vld [vmem:[#allocation18_spill] sm:$0xff]  ;;  %v7898_v27 = vld [vmem:[#allocation24_spill] sm:$0xff] }
 0x28b   :  { %v1403_v12 = vadd.f32 %v1399_v48, %v1394_v34  ;;  %v1404_v28 = vadd.f32 %v1400_v53, %v1395_v4  ;;  %v1442_v37 = vsel %vm1426_vm12, %v7886_v5, %v7887_v18  ;;  %v1427_v36 = vsel %vm1426_vm12, %v7890_v30, %v7889_v26  ;;  %2256 = vrot.lane.b32.xlu0 %v3268_v46, %s3210_s18  ;;  %v7891_v53 = vld [vmem:[#allocation14_spill] sm:$0xff] }
 0x28c   :  { %v1429_v16 = vsel %vm1426_vm12, %v7889_v26, %v7890_v30  ;;  %v5768_v48 = vstv %s5677_s16  ;;  %v5771_v62 = vstv %s5679_s17  ;;  %v1428_v34 = vsel %vm1426_vm12, %v7892_v15, %v7891_v53  ;;  %2258 = vrot.lane.b32.xlu1 %v3266_v45, %s3210_s18  ;;  %v5792_v25 = vpop.permute.xlu0 %1867  ;;  %s3012_s16 = sld [smem:[#allocation7 + $0x58]]  ;;  %s3219_s17 = smov 78  }
 0x28d   :  { %v1430_v4 = vsel %vm1426_vm12, %v7891_v53, %v7892_v15  ;;  %v1451_v6 = vmul.f32 %v5219_v0, %v1441_v22  ;;  %v1452_v21 = vmul.f32 %v5219_v0, %v1439_v32  ;;  %v1410_v5 = vsel %vm140_vm2, %v1402_v58, 0.0  ;;  %v5800_v58 = vpop.permute.xlu1 %1869 }
 0x28e   :  { %v1405_v18 = vadd.f32 %v1401_v20, %v1396_v11  ;;  %v1453_v26 = vmul.f32 %v5219_v0, %v1442_v37  ;;  %v1454_v30 = vmul.f32 %v5219_v0, %v1440_v57  ;;  %vm1532_vm5 = vcmp.lt.s32.totalorder %v3829_v59, 127  ;;  %7893 = vst [vmem:[#allocation61_spill] sm:$0xff] %v5800_v58  ;;  %v7894_v20 = vld [vmem:[#allocation27_spill] sm:$0xff]  ;;  %v7895_v57 = vld [vmem:[#allocation20_spill] sm:$0xff] }
 0x28f   :  { %v1411_v22 = vsel %vm141_vm4, %v1403_v12, 0.0  ;;  %v1412_v32 = vsel %vm140_vm2, %v1404_v28, 0.0  ;;  %v1446_v53 = vmul.f32 %v5196_v10, %v1429_v16  ;;  %v1447_v15 = vmul.f32 %v5196_v10, %v1427_v36  ;;  %2260 = vrot.lane.b32.xlu0 %v3282_v60, %s3210_s18  ;;  %v7896_v16 = vld [vmem:[#allocation21_spill] sm:$0xff] }
 0x290   :  { %v1448_v11 = vmul.f32 %v5196_v10, %v1430_v4  ;;  %v1449_v0 = vmul.f32 %v5196_v10, %v1428_v34  ;;  %v1492_v37 = vsel %vm1479_vm3, %v7895_v57, %v7894_v20  ;;  %v1494_v12 = vsel %vm1479_vm3, %v7894_v20, %v7895_v57  ;;  %v7897_v4 = vld [vmem:[#allocation25_spill] sm:$0xff]  ;;  %2262 = vrot.lane.b32.xlu1 %v3272_v51, %s3210_s18  ;;  %s3013_s18 = sld [smem:[#allocation7 + $0x28]] }
 0x291   :  { %v1455_v28 = vadd.f32 %v1451_v6, %v1446_v53  ;;  %v1456_v36 = vadd.f32 %v1452_v21, %v1447_v15  ;;  %v1493_v10 = vsel %vm1479_vm3, %v7897_v4, %v7896_v16  ;;  %v1495_v34 = vsel %vm1479_vm3, %v7896_v16, %v7897_v4  ;;  %v7899_v6 = vld [vmem:[#allocation143_spill] sm:$0xff]  ;;  %v5836_v15 = vpop.permute.xlu0 %1871  ;;  %v7900_v16 = vld [vmem:[#allocation22_spill] sm:$0xff] }
 0x292   :  { %v1457_v20 = vadd.f32 %v1453_v26, %v1448_v11  ;;  %v1458_v57 = vadd.f32 %v1454_v30, %v1449_v0  ;;  %v1480_v21 = vsel %vm1479_vm3, %v7899_v6, %v7898_v27  ;;  %v1482_v53 = vsel %vm1479_vm3, %v7898_v27, %v7899_v6  ;;  %v7901_v4 = vld [vmem:[#allocation26_spill] sm:$0xff]  ;;  %v5848_v0 = vpop.permute.xlu1 %1873 }
 0x293   :  { %v1481_v58 = vsel %vm1479_vm3, %v7901_v4, %v7900_v16  ;;  %v1483_v26 = vsel %vm1479_vm3, %v7900_v16, %v7901_v4  ;;  %v1504_v30 = vmul.f32 %v5319_v49, %v1494_v12  ;;  %v1505_v11 = vmul.f32 %v5319_v49, %v1492_v37  ;;  %2296 = vrot.lane.b32.xlu0 %v3274_v52, %s3211_s22 }
 0x294   :  { %v1414_v27 = vadd.f32 %v1410_v5, %v5722_v3  ;;  %v1415_v6 = vadd.f32 %v1411_v22, %v5724_v7  ;;  %v1506_v42 = vmul.f32 %v5319_v49, %v1495_v34  ;;  %v1507_v54 = vmul.f32 %v5319_v49, %v1493_v10  ;;  %2298 = vrot.lane.b32.xlu1 %v3278_v56, %s3211_s22  ;;  %v7904_v34 = vld [vmem:[#allocation28_spill] sm:$0xff] }
 0x295   :  { %v1413_v12 = vsel %vm141_vm4, %v1405_v18, 0.0  ;;  %v1416_v37 = vadd.f32 %v1412_v32, %v5726_v29  ;;  %v1499_v16 = vmul.f32 %v5283_v1, %v1482_v53  ;;  %v1500_v4 = vmul.f32 %v5283_v1, %v1480_v21  ;;  %v5871_v18 = vpop.permute.xlu0 %1907  ;;  %v7905_v21 = vld [vmem:[#allocation35_spill] sm:$0xff] }
 0x296   :  { %v1463_v3 = vsel %vm146_vm8, %v1455_v28, 0.0  ;;  %v1464_v49 = vsel %vm147_vm9, %v1456_v36, 0.0  ;;  %v1501_v7 = vmul.f32 %v5283_v1, %v1483_v26  ;;  %v1502_v5 = vmul.f32 %v5283_v1, %v1481_v58  ;;  %7902 = vst [vmem:[#allocation63_spill] sm:$0xff] %v5871_v18  ;;  %v5880_v36 = vpop.permute.xlu1 %1909  ;;  %v7907_v26 = vld [vmem:[#allocation23_spill] sm:$0xff] }
 0x297   :  { %v1465_v29 = vsel %vm146_vm8, %v1457_v20, 0.0  ;;  %v1466_v22 = vsel %vm147_vm9, %v1458_v57, 0.0  ;;  %v1508_v32 = vadd.f32 %v1504_v30, %v1499_v16  ;;  %v1509_v28 = vadd.f32 %v1505_v11, %v1500_v4  ;;  %7903 = vst [vmem:[#allocation72_spill] sm:$0xff] %v5880_v36  ;;  %2300 = vrot.lane.b32.xlu0 %v3284_v61, %s3211_s22  ;;  %v7906_v57 = vld [vmem:[#allocation32_spill] sm:$0xff] }
 0x298   :  { %vm1585_vm6 = vcmp.lt.s32.totalorder %v3829_v59, 126  ;;  %v1417_v1 = vadd.f32 %v1413_v12, %v5731_v17  ;;  %v1510_v58 = vadd.f32 %v1506_v42, %v1501_v7  ;;  %v1511_v10 = vadd.f32 %v1507_v54, %v1502_v5  ;;  %2302 = vrot.lane.b32.xlu1 %v3288_v63, %s3211_s22 }
 0x299   :  { %v1545_v53 = vsel %vm1532_vm5, %v7905_v21, %v7904_v34  ;;  %v1467_v20 = vadd.f32 %v1463_v3, %v1414_v27  ;;  %v1533_v30 = vsel %vm1532_vm5, %v7907_v26, %v7906_v57  ;;  %v5894_v11 = vstv %s5812_s19  ;;  %v5905_v16 = vpop.permute.xlu0 %1911  ;;  %s3014_s19 = sld [smem:[#allocation7 + $0x59]] }
 0x29a   :  { %v5897_v17 = vstv %s5826_s20  ;;  %v1468_v42 = vadd.f32 %v1464_v49, %v1415_v6  ;;  %v1469_v54 = vadd.f32 %v1465_v29, %v1416_v37  ;;  %v1470_v12 = vadd.f32 %v1466_v22, %v1417_v1  ;;  %v5919_v49 = vpop.permute.xlu1 %1913  ;;  %s3220_s20 = smov 77  }
 0x29b   :  { %v1547_v27 = vsel %vm1532_vm5, %v7904_v34, %v7905_v21  ;;  %v1516_v4 = vsel %vm152_vm10, %v1508_v32, 0.0  ;;  %v1517_v3 = vsel %vm153_vm11, %v1509_v28, 0.0  ;;  %v1557_v6 = vmul.f32 %v5395_v19, %v1545_v53  ;;  %7909 = vst [vmem:[#allocation68_spill] sm:$0xff] %v5919_v49  ;;  %2309 = vrot.lane.b32.xlu0 %v3268_v46, %s3211_s22  ;;  %v7910_v32 = vld [vmem:[#allocation34_spill] sm:$0xff]  ;;  %v7911_v28 = vld [vmem:[#allocation145_spill] sm:$0xff] }
 0x29c   :  { %v5917_v37 = vstv %s5850_s21  ;;  %v1518_v7 = vsel %vm152_vm10, %v1510_v58, 0.0  ;;  %v1519_v5 = vsel %vm153_vm11, %v1511_v10, 0.0  ;;  %v1535_v29 = vsel %vm1532_vm5, %v7906_v57, %v7907_v26  ;;  %v7912_v34 = vld [vmem:[#allocation30_spill] sm:$0xff]  ;;  %v7913_v21 = vld [vmem:[#allocation33_spill] sm:$0xff]  ;;  %2311 = vrot.lane.b32.xlu1 %v3266_v45, %s3211_s22  ;;  %s3015_s21 = sld [smem:[#allocation7 + $0x29]] }
 0x29d   :  { %7908 = vst [vmem:[#allocation74_spill] sm:$0xff] %v5917_v37  ;;  %v1552_v22 = vmul.f32 %v5386_v9, %v1533_v30  ;;  %v1534_v1 = vsel %vm1532_vm5, %v7911_v28, %v7910_v32  ;;  %v1536_v58 = vsel %vm1532_vm5, %v7910_v32, %v7911_v28  ;;  %v1558_v10 = vmul.f32 %v5395_v19, %v1547_v27  ;;  %v5954_v32 = vpop.permute.xlu0 %1920 }
 0x29e   :  { %v1546_v53 = vsel %vm1532_vm5, %v7913_v21, %v7912_v34  ;;  %vm1638_vm15 = vcmp.lt.s32.totalorder %v3829_v59, 125  ;;  %v1520_v57 = vadd.f32 %v1516_v4, %v1467_v20  ;;  %v5948_v26 = vadd.f32 %v1517_v3, %v1468_v42  ;;  %v5964_v20 = vpop.permute.xlu1 %1922 }
 0x29f   :  { %v1548_v30 = vsel %vm1532_vm5, %v7912_v34, %v7913_v21  ;;  %v5957_v27 = vstv %s5873_s23  ;;  %v5959_v28 = vadd.f32 %v1518_v7, %v1469_v54  ;;  %v5961_v37 = vadd.f32 %v1519_v5, %v1470_v12  ;;  %7915 = vst [vmem:[#allocation73_spill] sm:$0xff] %v5964_v20  ;;  %v7916_v34 = vld [vmem:[#allocation36_spill] sm:$0xff]  ;;  %2313 = vrot.lane.b32.xlu0 %v3282_v60, %s3211_s22  ;;  %v7918_v5 = vld [vmem:[#allocation38_spill] sm:$0xff]  ;;  %v7925_v20 = vld [vmem:[#allocation29_spill] sm:$0xff]  ;;  %s3017_s23 = sld [smem:[#allocation7 + $0x2a]] }
 0x2a0   :  { %7914 = vst [vmem:[#allocation70_spill] sm:$0xff] %v5957_v27  ;;  %v1553_v36 = vmul.f32 %v5386_v9, %v1535_v29  ;;  %v1561_v49 = vadd.f32 %v1557_v6, %v1552_v22  ;;  %v1554_v42 = vmul.f32 %v5386_v9, %v1534_v1  ;;  %v1555_v4 = vmul.f32 %v5386_v9, %v1536_v58  ;;  %v7917_v21 = vld [vmem:[#allocation40_spill] sm:$0xff]  ;;  %v7919_v9 = vld [vmem:[#allocation42_spill] sm:$0xff]  ;;  %v7921_v1 = vld [vmem:[#allocation31_spill] sm:$0xff] }
 0x2a1   :  { %v1559_v3 = vmul.f32 %v5395_v19, %v1546_v53  ;;  %v1598_v54 = vsel %vm1585_vm6, %v7917_v21, %v7916_v34  ;;  %v1560_v6 = vmul.f32 %v5395_v19, %v1548_v30  ;;  %v1600_v7 = vsel %vm1585_vm6, %v7916_v34, %v7917_v21  ;;  %2315 = vrot.lane.b32.xlu1 %v3272_v51, %s3211_s22  ;;  %v7920_v22 = vld [vmem:[#allocation148_spill] sm:$0xff]  ;;  %v5994_v58 = vpop.permute.xlu0 %1924  ;;  %v7924_v21 = vld [vmem:[#allocation147_spill] sm:$0xff]  ;;  %s3016_s22 = sld [smem:[#allocation7 + $0x5a]] }
 0x2a2   :  { %v1562_v12 = vadd.f32 %v1558_v10, %v1553_v36  ;;  %v1599_v29 = vsel %vm1585_vm6, %v7919_v9, %v7918_v5  ;;  %v1586_v36 = vsel %vm1585_vm6, %v7921_v1, %v7920_v22  ;;  %v1601_v19 = vsel %vm1585_vm6, %v7918_v5, %v7919_v9  ;;  %v6013_v9 = vpop.permute.xlu1 %1926 }
 0x2a3   :  { %v5997_v10 = vstv %s5907_s1  ;;  %v6000_v53 = vstv %s5909_s25  ;;  %v1569_v30 = vsel %vm160_vm0, %v1561_v49, 0.0  ;;  %v1588_v34 = vsel %vm1585_vm6, %v7920_v22, %v7921_v1  ;;  %7926 = vst [vmem:[#allocation71_spill] sm:$0xff] %v6013_v9  ;;  %2351 = vrot.lane.b32.xlu0 %v3274_v52, %s3212_s26  ;;  %s3018_s1 = sld [smem:[#allocation7 + $0x5b]] }
 0x2a4   :  { %7922 = vst [vmem:[#allocation75_spill] sm:$0xff] %v5997_v10  ;;  %7923 = vst [vmem:[#allocation69_spill] sm:$0xff] %v6000_v53  ;;  %v1587_v27 = vsel %vm1585_vm6, %v7925_v20, %v7924_v21  ;;  %v1610_v5 = vmul.f32 %v5454_v24, %v1598_v54  ;;  %v1563_v10 = vadd.f32 %v1559_v3, %v1554_v42  ;;  %vm7927_vm1 = vcmp.lt.s32.totalorder %v3872_v43, 15  ;;  %s3019_s25 = sld [smem:[#allocation7 + $0x2b]] }
 0x2a5   :  { %v1589_v49 = vsel %vm1585_vm6, %v7924_v21, %v7925_v20  ;;  %v1611_v53 = vmul.f32 %v5454_v24, %v1600_v7  ;;  %v1612_v18 = vmul.f32 %v5454_v24, %v1599_v29  ;;  %v1570_v22 = vsel %vm7927_vm1, %v1562_v12, 0.0  ;;  %2353 = vrot.lane.b32.xlu1 %v3278_v56, %s3212_s26  ;;  %v7928_v29 = vld [vmem:[#allocation37_spill] sm:$0xff]  ;;  %v6035_v9 = vpop.permute.xlu0 %1962  ;;  %vm7935_vm3 = vmmov %vm7927_vm1 }
 0x2a6   :  { %v1564_v54 = vadd.f32 %v1560_v6, %v1555_v4  ;;  %v1605_v1 = vmul.f32 %v5451_v2, %v1586_v36  ;;  %v1613_v42 = vmul.f32 %v5454_v24, %v1601_v19  ;;  %v1573_v20 = vadd.f32 %v1569_v30, %v1520_v57  ;;  %v7929_v57 = vld [vmem:[#allocation149_spill] sm:$0xff]  ;;  %v6046_v6 = vpop.permute.xlu1 %1964  ;;  %v7932_v30 = vld [vmem:[#allocation150_spill] sm:$0xff] }
 0x2a7   :  { %v1606_v3 = vmul.f32 %v5451_v2, %v1588_v34  ;;  %v1607_v7 = vmul.f32 %v5451_v2, %v1587_v27  ;;  %v1651_v21 = vsel %vm1638_vm15, %v7928_v29, %v5135_v55  ;;  %v1608_v4 = vmul.f32 %v5451_v2, %v1589_v49  ;;  %7930 = vst [vmem:[#allocation82_spill] sm:$0xff] %v6046_v6  ;;  %v7931_v2 = vld [vmem:[#allocation41_spill] sm:$0xff]  ;;  %v7934_v49 = vld [vmem:[#allocation43_spill] sm:$0xff] }
 0x2a8   :  { %v1614_v12 = vadd.f32 %v1610_v5, %v1605_v1  ;;  %v1653_v24 = vsel %vm1638_vm15, %v5135_v55, %v7928_v29  ;;  %v1652_v27 = vsel %vm1638_vm15, %v7929_v57, %v5146_v41  ;;  %v1639_v34 = vsel %vm1638_vm15, %v7932_v30, %v7931_v2  ;;  %2355 = vrot.lane.b32.xlu0 %v3284_v61, %s3212_s26 }
 0x2a9   :  { %v1615_v36 = vadd.f32 %v1611_v53, %v1606_v3  ;;  %v1616_v19 = vadd.f32 %v1612_v18, %v1607_v7  ;;  %v1654_v55 = vsel %vm1638_vm15, %v5146_v41, %v7929_v57  ;;  %vm1697_vm12 = vcmp.lt.s32.totalorder %v3829_v59, 115  ;;  %v7933_v53 = vld [vmem:[#allocation39_spill] sm:$0xff]  ;;  %2357 = vrot.lane.b32.xlu1 %v3288_v63, %s3212_s26 }
 0x2aa   :  { %v1617_v5 = vadd.f32 %v1613_v42, %v1608_v4  ;;  %v1641_v18 = vsel %vm1638_vm15, %v7931_v2, %v7932_v30  ;;  %v1640_v1 = vsel %vm1638_vm15, %v7934_v49, %v7933_v53  ;;  %v1663_v41 = vmul.f32 %v5648_v31, %v1651_v21  ;;  %v6085_v4 = vpop.permute.xlu0 %1966  ;;  %v7936_v2 = vld [vmem:[#allocation64_spill] sm:$0xff] }
 0x2ab   :  { %v1574_v3 = vadd.f32 %v1570_v22, %v5948_v26  ;;  %v1642_v42 = vsel %vm1638_vm15, %v7933_v53, %v7934_v49  ;;  %v1664_v7 = vmul.f32 %v5648_v31, %v1653_v24  ;;  %v1665_v29 = vmul.f32 %v5648_v31, %v1652_v27  ;;  %v6093_v22 = vpop.permute.xlu1 %1968 }
 0x2ac   :  { %v1571_v21 = vsel %vm160_vm0, %v1563_v10, 0.0  ;;  %v1572_v57 = vsel %vm7935_vm3, %v1564_v54, 0.0  ;;  %v1658_v30 = vmul.f32 %v7936_v2, %v1639_v34  ;;  %v1666_v26 = vmul.f32 %v5648_v31, %v1654_v55  ;;  %2364 = vrot.lane.b32.xlu0 %v3268_v46, %s3212_s26 }
 0x2ad   :  { %vm7937_vm5 = vcmp.lt.s32.totalorder %v3865_v50, 14  ;;  %v1623_v24 = vsel %vm167_vm7, %v1615_v36, 0.0  ;;  %v1659_v27 = vmul.f32 %v7936_v2, %v1641_v18  ;;  %v1660_v49 = vmul.f32 %v7936_v2, %v1640_v1  ;;  %2366 = vrot.lane.b32.xlu1 %v3266_v45, %s3212_s26  ;;  %v7939_v1 = vld [vmem:[#allocation136_spill] sm:$0xff] }
 0x2ae   :  { %v1622_v53 = vsel %vm7937_vm5, %v1614_v12, 0.0  ;;  %vm7938_vm6 = vmmov %vm7937_vm5  ;;  %v1625_v31 = vsel %vm167_vm7, %v1617_v5, 0.0  ;;  %v1661_v54 = vmul.f32 %v7936_v2, %v1642_v42  ;;  %v1667_v12 = vadd.f32 %v1663_v41, %v1658_v30 }
 0x2af   :  { %v1624_v10 = vsel %vm7938_vm6, %v1616_v19, 0.0  ;;  %v1575_v36 = vadd.f32 %v1571_v21, %v5959_v28  ;;  %v1576_v34 = vadd.f32 %v1572_v57, %v5961_v37  ;;  %v1668_v55 = vadd.f32 %v1664_v7, %v1659_v27  ;;  %v6114_v19 = vpop.permute.xlu0 %1975  ;;  %v6116_v41 = vpop.permute.xlu1 %1977  ;;  %v7943_v21 = vld [vmem:[#allocation45_spill] sm:$0xff] }
 0x2b0   :  { %v1669_v18 = vadd.f32 %v1665_v29, %v1660_v49  ;;  %vm1686_vm15 = vcmp.lt.s32.totalorder %v7939_v1, 240  ;;  %vm1752_vm1 = vcmp.lt.s32.totalorder %v3829_v59, 114  ;;  %v1626_v5 = vadd.f32 %v1622_v53, %v1573_v20  ;;  %2368 = vrot.lane.b32.xlu0 %v3282_v60, %s3212_s26  ;;  %v7944_v57 = vld [vmem:[#allocation49_spill] sm:$0xff]  ;;  %v7946_v49 = vld [vmem:[#allocation47_spill] sm:$0xff] }
 0x2b1   :  { %v1670_v42 = vadd.f32 %v1666_v26, %v1661_v54  ;;  %v6119_v2 = vstv %s6048_s27  ;;  %v6122_v30 = vstv %s6050_s28  ;;  %v1627_v37 = vadd.f32 %v1623_v24, %v1574_v3  ;;  %2370 = vrot.lane.b32.xlu1 %v3272_v51, %s3212_s26  ;;  %vm6307_vm6 = vmand %vm1686_vm15, %vm147_vm9  ;;  %s3020_s26 = sld [smem:[#allocation7 + $0x5c]]  ;;  %s3022_s28 = sld [smem:[#allocation7 + $0x5d]] }
 0x2b2   :  { %7940 = vst [vmem:[#allocation80_spill] sm:$0xff] %v6119_v2  ;;  %7941 = vst [vmem:[#allocation83_spill] sm:$0xff] %v6122_v30  ;;  %v1628_v28 = vadd.f32 %v1624_v10, %v1575_v36  ;;  %v1629_v7 = vadd.f32 %v1625_v31, %v1576_v34  ;;  %v6129_v29 = vstv %s6063_s29  ;;  %v1675_v20 = vsel %vm172_vm14, %v1667_v12, 0.0  ;;  %v7947_v10 = vld [vmem:[#allocation51_spill] sm:$0xff]  ;;  %v7948_v34 = vld [vmem:[#allocation44_spill] sm:$0xff]  ;;  %s3021_s27 = sld [smem:[#allocation7 + $0x2c]] }
 0x2b3   :  { %7942 = vst [vmem:[#allocation81_spill] sm:$0xff] %v6129_v29  ;;  %v1710_v26 = vsel %vm1697_vm12, %v7944_v57, %v7943_v21  ;;  %v1712_v3 = vsel %vm1697_vm12, %v7943_v21, %v7944_v57  ;;  %v6144_v53 = vstv %s6076_s0  ;;  %v1676_v24 = vsel %vm173_vm13, %v1668_v55, 0.0  ;;  %v6159_v12 = vpop.permute.xlu0 %1979  ;;  %v7949_v55 = vld [vmem:[#allocation48_spill] sm:$0xff]  ;;  %v7950_v57 = vld [vmem:[#allocation46_spill] sm:$0xff]  ;;  %s3024_s29 = sld [smem:[#allocation7 + $0x5e]]  ;;  %s3023_s0 = sld [smem:[#allocation7 + $0x2d]] }
 0x2b4   :  { %7945 = vst [vmem:[#allocation78_spill] sm:$0xff] %v6144_v53  ;;  %v1677_v27 = vsel %vm172_vm14, %v1669_v18, 0.0  ;;  %v1711_v31 = vsel %vm1697_vm12, %v7947_v10, %v7946_v49  ;;  %v1713_v54 = vsel %vm1697_vm12, %v7946_v49, %v7947_v10  ;;  %vm1807_vm3 = vcmp.lt.s32.totalorder %v3829_v59, 113  ;;  %v7951_v29 = vld [vmem:[#allocation50_spill] sm:$0xff]  ;;  %v6175_v10 = vpop.permute.xlu1 %1981  ;;  %2406 = vrot.lane.b32.xlu0 %v3274_v52, %s3213_s4 }
 0x2b5   :  { %v1678_v36 = vsel %vm173_vm13, %v1670_v42, 0.0  ;;  %v1698_v18 = vsel %vm1697_vm12, %v7949_v55, %v7948_v34  ;;  %v1700_v21 = vsel %vm1697_vm12, %v7948_v34, %v7949_v55  ;;  %v1699_v49 = vsel %vm1697_vm12, %v7951_v29, %v7950_v57  ;;  %2408 = vrot.lane.b32.xlu1 %v3278_v56, %s3213_s4 }
 0x2b6   :  { %v6177_v53 = vadd.f32 %v1675_v20, %v1626_v5  ;;  %v1701_v42 = vsel %vm1697_vm12, %v7950_v57, %v7951_v29  ;;  %v1722_v2 = vmul.f32 %v5654_v44, %v1710_v26  ;;  %v1723_v30 = vmul.f32 %v5654_v44, %v1712_v3  ;;  %vm6230_vm12 = vmand %vm1686_vm15, %vm141_vm4 }
 0x2b7   :  { %v6187_v34 = vadd.f32 %v1676_v24, %v1627_v37  ;;  %v6189_v55 = vadd.f32 %v1677_v27, %v1628_v28  ;;  %v1724_v5 = vmul.f32 %v5654_v44, %v1711_v31  ;;  %v1725_v20 = vmul.f32 %v5654_v44, %v1713_v54  ;;  %v6200_v6 = vpop.permute.xlu0 %2017  ;;  %v7953_v28 = vld [vmem:[#allocation53_spill] sm:$0xff]  ;;  %v7954_v24 = vld [vmem:[#allocation59_spill] sm:$0xff] }
 0x2b8   :  { %v6195_v29 = vadd.f32 %v1678_v36, %v1629_v7  ;;  %v1717_v26 = vmul.f32 %v5651_v38, %v1698_v18  ;;  %v1718_v3 = vmul.f32 %v5651_v38, %v1700_v21  ;;  %v1719_v57 = vmul.f32 %v5651_v38, %v1699_v49  ;;  %7952 = vst [vmem:[#allocation76_spill] sm:$0xff] %v6200_v6  ;;  %v6211_v27 = vpop.permute.xlu1 %2019  ;;  %v7957_v18 = vld [vmem:[#allocation55_spill] sm:$0xff]  ;;  %v7958_v21 = vld [vmem:[#allocation57_spill] sm:$0xff] }
 0x2b9   :  { %v1720_v37 = vmul.f32 %v5651_v38, %v1701_v42  ;;  %v1765_v44 = vsel %vm1752_vm1, %v7954_v24, %v7953_v28  ;;  %v1767_v7 = vsel %vm1752_vm1, %v7953_v28, %v7954_v24  ;;  %7955 = vst [vmem:[#allocation79_spill] sm:$0xff] %v6211_v27  ;;  %v6214_v31 = vstv %s6124_s30  ;;  %2410 = vrot.lane.b32.xlu0 %v3284_v61, %s3213_s4  ;;  %s3025_s30 = sld [smem:[#allocation7 + $0x2e]] }
 0x2ba   :  { %7956 = vst [vmem:[#allocation77_spill] sm:$0xff] %v6214_v31  ;;  %v1726_v54 = vadd.f32 %v1722_v2, %v1717_v26  ;;  %v1727_v36 = vadd.f32 %v1723_v30, %v1718_v3  ;;  %v1766_v38 = vsel %vm1752_vm1, %v7958_v21, %v7957_v18  ;;  %v1768_v49 = vsel %vm1752_vm1, %v7957_v18, %v7958_v21  ;;  %v7961_v26 = vld [vmem:[#allocation52_spill] sm:$0xff]  ;;  %v7963_v18 = vld [vmem:[#allocation54_spill] sm:$0xff] }
 0x2bb   :  { %v1728_v30 = vadd.f32 %v1724_v5, %v1719_v57  ;;  %v1729_v42 = vadd.f32 %v1725_v20, %v1720_v37  ;;  %v7962_v3 = vld [vmem:[#allocation56_spill] sm:$0xff]  ;;  %2412 = vrot.lane.b32.xlu1 %v3288_v63, %s3213_s4  ;;  %v7964_v21 = vld [vmem:[#allocation58_spill] sm:$0xff]  ;;  %v1777_v20 = vmul.f32 %v5718_v14, %v1765_v44  ;;  %v1778_v57 = vmul.f32 %v5718_v14, %v1767_v7  ;;  %v6254_v37 = vpop.permute.xlu0 %2021 }
 0x2bc   :  { %v1753_v28 = vsel %vm1752_vm1, %v7962_v3, %v7961_v26  ;;  %v1755_v24 = vsel %vm1752_vm1, %v7961_v26, %v7962_v3  ;;  %v1754_v31 = vsel %vm1752_vm1, %v7964_v21, %v7963_v18  ;;  %v1756_v5 = vsel %vm1752_vm1, %v7963_v18, %v7964_v21  ;;  %v6266_v21 = vpop.permute.xlu1 %2023 }
 0x2bd   :  { %v1779_v26 = vmul.f32 %v5718_v14, %v1766_v38  ;;  %v1780_v3 = vmul.f32 %v5718_v14, %v1768_v49  ;;  %v1820_v27 = vsel %vm1807_vm3, %v5616_v33, %v5656_v35  ;;  %v1822_v18 = vsel %vm1807_vm3, %v5656_v35, %v5616_v33  ;;  %7965 = vst [vmem:[#allocation88_spill] sm:$0xff] %v6266_v21 }
 0x2be   :  { %v1736_v44 = vsel %vm140_vm2, %v1726_v54, 0.0  ;;  %v1737_v7 = vsel %vm6230_vm12, %v1727_v36, 0.0  ;;  %v1772_v14 = vmul.f32 %v5675_v47, %v1753_v28  ;;  %v1773_v38 = vmul.f32 %v5675_v47, %v1755_v24  ;;  %2419 = vrot.lane.b32.xlu0 %v3268_v46, %s3213_s4 }
 0x2bf   :  { %vm1862_vm5 = vcmp.lt.s32.totalorder %v3829_v59, 112  ;;  %v1774_v49 = vmul.f32 %v5675_v47, %v1754_v31  ;;  %v1775_v33 = vmul.f32 %v5675_v47, %v1756_v5  ;;  %v1808_v35 = vsel %vm1807_vm3, %v5529_v13, %v5573_v39  ;;  %2421 = vrot.lane.b32.xlu1 %v3266_v45, %s3213_s4  ;;  %v6299_v24 = vpop.permute.xlu0 %2030 }
 0x2c0   :  { %v1810_v54 = vsel %vm1807_vm3, %v5573_v39, %v5529_v13  ;;  %v1832_v36 = vmul.f32 %v5771_v62, %v1820_v27  ;;  %v1833_v28 = vmul.f32 %v5771_v62, %v1822_v18  ;;  %v1821_v47 = vsel %vm1807_vm3, %v5625_v40, %v5662_v8  ;;  %v6301_v6 = vpop.permute.xlu1 %2032 }
 0x2c1   :  { %v1823_v31 = vsel %vm1807_vm3, %v5662_v8, %v5625_v40  ;;  %v1781_v13 = vadd.f32 %v1777_v20, %v1772_v14  ;;  %v1782_v39 = vadd.f32 %v1778_v57, %v1773_v38  ;;  %v1783_v5 = vadd.f32 %v1779_v26, %v1774_v49  ;;  %v7968_v8 = vld [vmem:[#allocation66_spill] sm:$0xff] }
 0x2c2   :  { %v1784_v21 = vadd.f32 %v1780_v3, %v1775_v33  ;;  %v1827_v18 = vmul.f32 %v5768_v48, %v1808_v35  ;;  %v1828_v40 = vmul.f32 %v5768_v48, %v1810_v54  ;;  %v1809_v20 = vsel %vm1807_vm3, %v7968_v8, %v5579_v23  ;;  %2423 = vrot.lane.b32.xlu0 %v3282_v60, %s3213_s4 }
 0x2c3   :  { %v1811_v57 = vsel %vm1807_vm3, %v5579_v23, %v7968_v8  ;;  %v1738_v26 = vsel %vm140_vm2, %v1728_v30, 0.0  ;;  %v1739_v3 = vsel %vm6230_vm12, %v1729_v42, 0.0  ;;  %v1834_v14 = vmul.f32 %v5771_v62, %v1821_v47  ;;  %2425 = vrot.lane.b32.xlu1 %v3272_v51, %s3213_s4  ;;  %v6334_v54 = vpop.permute.xlu0 %2034  ;;  %vm6346_vm3 = vmand %vm1686_vm15, %vm153_vm11  ;;  %v7972_v8 = vld [vmem:[#allocation65_spill] sm:$0xff]  ;;  %s3026_s4 = sld [smem:[#allocation7 + $0x5f]] }
 0x2c4   :  { %v1835_v38 = vmul.f32 %v5771_v62, %v1823_v31  ;;  %v1740_v49 = vadd.f32 %v1736_v44, %v6177_v53  ;;  %v1741_v23 = vadd.f32 %v1737_v7, %v6187_v34  ;;  %v1836_v33 = vadd.f32 %v1832_v36, %v1827_v18  ;;  %v6350_v34 = vpop.permute.xlu1 %2036 }
 0x2c5   :  { %v1837_v35 = vadd.f32 %v1833_v28, %v1828_v40  ;;  %vm1915_vm1 = vcmp.lt.s32.totalorder %v3829_v59, 111  ;;  %v1791_v2 = vsel %vm146_vm8, %v1781_v13, 0.0  ;;  %v1792_v30 = vsel %vm6307_vm6, %v1782_v39, 0.0  ;;  %v7971_v40 = vld [vmem:[#allocation60_spill] sm:$0xff] }
 0x2c6   :  { %v1829_v62 = vmul.f32 %v5768_v48, %v1809_v20  ;;  %v1830_v42 = vmul.f32 %v5768_v48, %v1811_v57  ;;  %v1742_v44 = vadd.f32 %v1738_v26, %v6189_v55  ;;  %v1743_v7 = vadd.f32 %v1739_v3, %v6195_v29  ;;  %2467 = vrot.lane.b32.xlu0 %v3274_v52, %s3214_s5  ;;  %v7973_v3 = vld [vmem:[#allocation61_spill] sm:$0xff] }
 0x2c7   :  { %v1793_v36 = vsel %vm146_vm8, %v1783_v5, 0.0  ;;  %v1794_v48 = vsel %vm6307_vm6, %v1784_v21, 0.0  ;;  %v1875_v31 = vsel %vm1862_vm5, %v5792_v25, %v5836_v15  ;;  %v1877_v55 = vsel %vm1862_vm5, %v5836_v15, %v5792_v25  ;;  %2469 = vrot.lane.b32.xlu1 %v3278_v56, %s3214_s5  ;;  %v6374_v5 = vpop.permute.xlu0 %2078 }
 0x2c8   :  { %v1838_v28 = vadd.f32 %v1834_v14, %v1829_v62  ;;  %v1839_v47 = vadd.f32 %v1835_v38, %v1830_v42  ;;  %v1795_v29 = vadd.f32 %v1791_v2, %v1740_v49  ;;  %v1796_v21 = vadd.f32 %v1792_v30, %v1741_v23  ;;  %v6384_v20 = vpop.permute.xlu1 %2080  ;;  %v7974_v30 = vld [vmem:[#allocation62_spill] sm:$0xff]  ;;  %v7975_v62 = vld [vmem:[#allocation67_spill] sm:$0xff] }
 0x2c9   :  { %v1846_v13 = vsel %vm152_vm10, %v1836_v33, 0.0  ;;  %v1847_v39 = vsel %vm6346_vm3, %v1837_v35, 0.0  ;;  %v1797_v27 = vadd.f32 %v1793_v36, %v1742_v44  ;;  %v1798_v18 = vadd.f32 %v1794_v48, %v1743_v7 }
 0x2ca   :  { %v1863_v25 = vsel %vm1862_vm5, %v7972_v8, %v7971_v40  ;;  %v1865_v15 = vsel %vm1862_vm5, %v7971_v40, %v7972_v8  ;;  %v1887_v57 = vmul.f32 %v5897_v17, %v1875_v31  ;;  %v1888_v26 = vmul.f32 %v5897_v17, %v1877_v55  ;;  %2471 = vrot.lane.b32.xlu0 %v3284_v61, %s3214_s5  ;;  %v7978_v8 = vld [vmem:[#allocation71_spill] sm:$0xff] }
 0x2cb   :  { %v1876_v14 = vsel %vm1862_vm5, %v7973_v3, %v5848_v0  ;;  %v1878_v38 = vsel %vm1862_vm5, %v5848_v0, %v7973_v3  ;;  %vm1970_vm12 = vcmp.lt.s32.totalorder %v3829_v59, 110  ;;  %v1850_v49 = vadd.f32 %v1846_v13, %v1795_v29  ;;  %2473 = vrot.lane.b32.xlu1 %v3288_v63, %s3214_s5  ;;  %v6415_v7 = vpop.permute.xlu0 %2082  ;;  %v7980_v3 = vld [vmem:[#allocation68_spill] sm:$0xff] }
 0x2cc   :  { %v1851_v23 = vadd.f32 %v1847_v39, %v1796_v21  ;;  %v1848_v33 = vsel %vm152_vm10, %v1838_v28, 0.0  ;;  %v1849_v35 = vsel %vm6346_vm3, %v1839_v47, 0.0  ;;  %v1882_v2 = vmul.f32 %v5894_v11, %v1863_v25  ;;  %v6427_v47 = vpop.permute.xlu1 %2084  ;;  %v7976_v39 = vld [vmem:[#allocation63_spill] sm:$0xff]  ;;  %v7979_v25 = vld [vmem:[#allocation73_spill] sm:$0xff] }
 0x2cd   :  { %v1883_v0 = vmul.f32 %v5894_v11, %v1865_v15  ;;  %v1864_v42 = vsel %vm1862_vm5, %v7975_v62, %v7974_v30  ;;  %v1866_v44 = vsel %vm1862_vm5, %v7974_v30, %v7975_v62  ;;  %v1889_v53 = vmul.f32 %v5897_v17, %v1876_v14  ;;  %v7981_v14 = vld [vmem:[#allocation72_spill] sm:$0xff]  ;;  %v7982_v30 = vld [vmem:[#allocation74_spill] sm:$0xff] }
 0x2ce   :  { %v1890_v36 = vmul.f32 %v5897_v17, %v1878_v38  ;;  %v1928_v48 = vsel %vm1915_vm1, %v5954_v32, %v5994_v58  ;;  %v1930_v28 = vsel %vm1915_vm1, %v5994_v58, %v5954_v32  ;;  %v1852_v31 = vadd.f32 %v1848_v33, %v1797_v27  ;;  %2480 = vrot.lane.b32.xlu0 %v3268_v46, %s3214_s5  ;;  %v7977_v58 = vld [vmem:[#allocation70_spill] sm:$0xff] }
 0x2cf   :  { %v1853_v55 = vadd.f32 %v1849_v35, %v1798_v18  ;;  %v1891_v29 = vadd.f32 %v1887_v57, %v1882_v2  ;;  %v1892_v21 = vadd.f32 %v1888_v26, %v1883_v0  ;;  %v1884_v17 = vmul.f32 %v5894_v11, %v1864_v42  ;;  %2482 = vrot.lane.b32.xlu1 %v3266_v45, %s3214_s5  ;;  %v6453_v57 = vpop.permute.xlu0 %2091 }
 0x2d0   :  { %v1885_v13 = vmul.f32 %v5894_v11, %v1866_v44  ;;  %v1916_v40 = vsel %vm1915_vm1, %v7976_v39, %v5905_v16  ;;  %v1918_v32 = vsel %vm1915_vm1, %v5905_v16, %v7976_v39  ;;  %v1940_v27 = vmul.f32 %v7977_v58, %v1928_v48  ;;  %v6463_v35 = vpop.permute.xlu1 %2093 }
 0x2d1   :  { %v1941_v18 = vmul.f32 %v7977_v58, %v1930_v28  ;;  %v1929_v11 = vsel %vm1915_vm1, %v7979_v25, %v7978_v8  ;;  %v1931_v15 = vsel %vm1915_vm1, %v7978_v8, %v7979_v25  ;;  %v1893_v16 = vadd.f32 %v1889_v53, %v1884_v17 }
 0x2d2   :  { %v1894_v26 = vadd.f32 %v1890_v36, %v1885_v13  ;;  %v1917_v38 = vsel %vm1915_vm1, %v7981_v14, %v7980_v3  ;;  %v1919_v33 = vsel %vm1915_vm1, %v7980_v3, %v7981_v14  ;;  %v1900_v2 = vsel %vm1686_vm15, %v1892_v21, 0.0  ;;  %2484 = vrot.lane.b32.xlu0 %v3282_v60, %s3214_s5 }
 0x2d3   :  { %v6467_v0 = vadd.f32 %v1891_v29, %v1850_v49  ;;  %v1935_v62 = vmul.f32 %v7982_v30, %v1916_v40  ;;  %v1936_v42 = vmul.f32 %v7982_v30, %v1918_v32  ;;  %vm2025_vm5 = vcmp.lt.s32.totalorder %v3829_v59, 109  ;;  %2486 = vrot.lane.b32.xlu1 %v3272_v51, %s3214_s5  ;;  %v6488_v17 = vpop.permute.xlu0 %2095  ;;  %s3027_s5 = sld [smem:[#allocation7 + $0x2f]] }
 0x2d4   :  { %v1942_v44 = vmul.f32 %v7977_v58, %v1929_v11  ;;  %v1943_v53 = vmul.f32 %v7977_v58, %v1931_v15  ;;  %v1983_v36 = vsel %vm1970_vm12, %v6114_v19, %v6159_v12  ;;  %v1985_v49 = vsel %vm1970_vm12, %v6159_v12, %v6114_v19  ;;  %v6506_v40 = vpop.permute.xlu1 %2097  ;;  %v7988_v11 = vld [vmem:[#allocation75_spill] sm:$0xff] }
 0x2d5   :  { %v1937_v48 = vmul.f32 %v7982_v30, %v1917_v38  ;;  %v1938_v28 = vmul.f32 %v7982_v30, %v1919_v33  ;;  %v1944_v29 = vadd.f32 %v1940_v27, %v1935_v62  ;;  %v1945_v21 = vadd.f32 %v1941_v18, %v1936_v42 }
 0x2d6   :  { %v1971_v13 = vsel %vm1970_vm12, %v6035_v9, %v6085_v4  ;;  %v1973_v19 = vsel %vm1970_vm12, %v6085_v4, %v6035_v9  ;;  %v1984_v12 = vsel %vm1970_vm12, %v6116_v41, %v6175_v10  ;;  %v1986_v39 = vsel %vm1970_vm12, %v6175_v10, %v6116_v41  ;;  %v7986_v4 = vld [vmem:[#allocation69_spill] sm:$0xff]  ;;  %2522 = vrot.lane.b32.xlu0 %v3274_v52, %s3215_s6 }
 0x2d7   :  { %v1904_v32 = vadd.f32 %v1900_v2, %v1851_v23  ;;  %v1902_v58 = vsel %vm1686_vm15, %v1894_v26, 0.0  ;;  %vm7983_vm6 = vcmp.lt.s32.totalorder %v3872_v43, 15  ;;  %v1995_v27 = vmul.f32 %v7986_v4, %v1983_v36  ;;  %v7987_v23 = vld [vmem:[#allocation82_spill] sm:$0xff]  ;;  %2524 = vrot.lane.b32.xlu1 %v3278_v56, %s3215_s6  ;;  %v6536_v38 = vpop.permute.xlu0 %2133 }
 0x2d8   :  { %vm6514_vm1 = vmand %vm1686_vm15, %vm7983_vm6  ;;  %v1996_v18 = vmul.f32 %v7986_v4, %v1985_v49  ;;  %v1946_v41 = vadd.f32 %v1942_v44, %v1937_v48  ;;  %v1947_v10 = vadd.f32 %v1943_v53, %v1938_v28  ;;  %v1972_v8 = vsel %vm1970_vm12, %v7987_v23, %v6093_v22  ;;  %v6542_v62 = vpop.permute.xlu1 %2135 }
 0x2d9   :  { %v1974_v25 = vsel %vm1970_vm12, %v6093_v22, %v7987_v23  ;;  %v1990_v15 = vmul.f32 %v7988_v11, %v1971_v13  ;;  %v1991_v26 = vmul.f32 %v7988_v11, %v1973_v19  ;;  %v1997_v3 = vmul.f32 %v7986_v4, %v1984_v12  ;;  %vm6577_vm12 = vmand %vm1686_vm15, %vm167_vm7  ;;  %v7992_v19 = vld [vmem:[#allocation88_spill] sm:$0xff]  ;;  %v7993_v12 = vld [vmem:[#allocation79_spill] sm:$0xff] }
 0x2da   :  { %v1998_v14 = vmul.f32 %v7986_v4, %v1986_v39  ;;  %v1905_v33 = vadd.f32 %v1893_v16, %v1852_v31  ;;  %v1906_v2 = vadd.f32 %v1902_v58, %v1853_v55  ;;  %v1954_v30 = vsel %vm160_vm0, %v1944_v29, 0.0  ;;  %2526 = vrot.lane.b32.xlu0 %v3284_v61, %s3215_s6  ;;  %v7991_v29 = vld [vmem:[#allocation76_spill] sm:$0xff]  ;;  %v7994_v4 = vld [vmem:[#allocation83_spill] sm:$0xff] }
 0x2db   :  { %v1955_v22 = vsel %vm6514_vm1, %v1945_v21, 0.0  ;;  %v1992_v42 = vmul.f32 %v7988_v11, %v1972_v8  ;;  %v1993_v44 = vmul.f32 %v7988_v11, %v1974_v25  ;;  %v1999_v53 = vadd.f32 %v1995_v27, %v1990_v15  ;;  %2528 = vrot.lane.b32.xlu1 %v3288_v63, %s3215_s6  ;;  %v6581_v28 = vpop.permute.xlu0 %2137  ;;  %v7996_v11 = vld [vmem:[#allocation80_spill] sm:$0xff] }
 0x2dc   :  { %v2000_v36 = vadd.f32 %v1996_v18, %v1991_v26  ;;  %vm2086_vm3 = vcmp.lt.s32.totalorder %v3829_v59, 99  ;;  %v2038_v31 = vsel %vm2025_vm5, %v6299_v24, %v6334_v54  ;;  %v2040_v55 = vsel %vm2025_vm5, %v6334_v54, %v6299_v24  ;;  %v6599_v9 = vpop.permute.xlu1 %2139 }
 0x2dd   :  { %v2039_v16 = vsel %vm2025_vm5, %v6301_v6, %v6350_v34  ;;  %v2041_v49 = vsel %vm2025_vm5, %v6350_v34, %v6301_v6  ;;  %v1956_v48 = vsel %vm160_vm0, %v1946_v41, 0.0  ;;  %v1957_v24 = vsel %vm6514_vm1, %v1947_v10, 0.0 }
 0x2de   :  { %v2001_v6 = vadd.f32 %v1997_v3, %v1992_v42  ;;  %v2002_v34 = vadd.f32 %v1998_v14, %v1993_v44  ;;  %v2026_v21 = vsel %vm2025_vm5, %v7991_v29, %v6254_v37  ;;  %v2028_v13 = vsel %vm2025_vm5, %v6254_v37, %v7991_v29  ;;  %2535 = vrot.lane.b32.xlu0 %v3268_v46, %s3215_s6 }
 0x2df   :  { %v2027_v39 = vsel %vm2025_vm5, %v7993_v12, %v7992_v19  ;;  %v2029_v58 = vsel %vm2025_vm5, %v7992_v19, %v7993_v12  ;;  %v2050_v27 = vmul.f32 %v7994_v4, %v2038_v31  ;;  %v2051_v18 = vmul.f32 %v7994_v4, %v2040_v55  ;;  %2537 = vrot.lane.b32.xlu1 %v3266_v45, %s3215_s6 }
 0x2e0   :  { %v2052_v41 = vmul.f32 %v7994_v4, %v2039_v16  ;;  %v2053_v37 = vmul.f32 %v7994_v4, %v2041_v49  ;;  %v1958_v10 = vadd.f32 %v1954_v30, %v6467_v0  ;;  %v1959_v23 = vadd.f32 %v1955_v22, %v1904_v32  ;;  %v2147_v32 = vpop.permute.xlu0 %2146  ;;  %v2149_v44 = vpop.permute.xlu1 %2148 }
 0x2e1   :  { %vm7995_vm6 = vcmp.lt.s32.totalorder %v3865_v50, 14  ;;  %v2010_v25 = vsel %vm6577_vm12, %v2000_v36, 0.0  ;;  %vm2141_vm5 = vcmp.lt.s32.totalorder %v3829_v59, 98  ;;  %v2045_v15 = vmul.f32 %v7996_v11, %v2026_v21 }
 0x2e2   :  { %v2009_v8 = vsel %vm7995_vm6, %v1999_v53, 0.0  ;;  %v2046_v26 = vmul.f32 %v7996_v11, %v2028_v13  ;;  %v2047_v3 = vmul.f32 %v7996_v11, %v2027_v39  ;;  %v2048_v0 = vmul.f32 %v7996_v11, %v2029_v58  ;;  %vm7997_vm1 = vmmov %vm7995_vm6  ;;  %2539 = vrot.lane.b32.xlu0 %v3282_v60, %s3215_s6 }
 0x2e3   :  { %v1960_v14 = vadd.f32 %v1956_v48, %v1905_v33  ;;  %v1961_v30 = vadd.f32 %v1957_v24, %v1906_v2  ;;  %v2011_v22 = vsel %vm7997_vm1, %v2001_v6, 0.0  ;;  %v2012_v42 = vsel %vm6577_vm12, %v2002_v34, 0.0  ;;  %vm6638_vm12 = vmand %vm1686_vm15, %vm173_vm13  ;;  %2541 = vrot.lane.b32.xlu1 %v3272_v51, %s3215_s6  ;;  %s3028_s6 = sld [smem:[#allocation7 + $0x60]] }
 0x2e4   :  { %vm2075_vm6 = vcmp.lt.s32.totalorder %v7939_v1, 224  ;;  %v2054_v53 = vadd.f32 %v2050_v27, %v2045_v15  ;;  %v6624_v36 = vadd.f32 %v2051_v18, %v2046_v26  ;;  %v2056_v31 = vadd.f32 %v2052_v41, %v2047_v3  ;;  %v2151_v34 = vpop.permute.xlu0 %2150  ;;  %v8001_v27 = vld [vmem:[#allocation81_spill] sm:$0xff] }
 0x2e5   :  { %v6626_v55 = vadd.f32 %v2053_v37, %v2048_v0  ;;  %v6630_v33 = vadd.f32 %v2009_v8, %v1958_v10  ;;  %v6632_v2 = vadd.f32 %v2010_v25, %v1959_v23  ;;  %v2165_v49 = vstv %s6567_s7  ;;  %vm6740_vm15 = vmand %vm2075_vm6, %vm141_vm4  ;;  %s7162_s7 = sld [smem:[#allocation7 + $0x30]] }
 0x2e6   :  { %vm2196_vm1 = vcmp.lt.s32.totalorder %v3829_v59, 97  ;;  %v6646_v48 = vadd.f32 %v2011_v22, %v1960_v14  ;;  %v6648_v24 = vadd.f32 %v2012_v42, %v1961_v30  ;;  %v2099_v54 = vsel %vm2086_vm3, %v6453_v57, %v6488_v17  ;;  %2577 = vrot.lane.b32.xlu0 %v3274_v52, %s3216_s8 }
 0x2e7   :  { %v2101_v6 = vsel %vm2086_vm3, %v6488_v17, %v6453_v57  ;;  %v2087_v29 = vsel %vm2086_vm3, %v6374_v5, %v6415_v7  ;;  %v2089_v21 = vsel %vm2086_vm3, %v6415_v7, %v6374_v5  ;;  %v2088_v13 = vsel %vm2086_vm3, %v6384_v20, %v6427_v47  ;;  %v2153_v17 = vpop.permute.xlu1 %2152  ;;  %2579 = vrot.lane.b32.xlu1 %v3278_v56, %s3216_s8 }
 0x2e8   :  { %v2090_v57 = vsel %vm2086_vm3, %v6427_v47, %v6384_v20  ;;  %v2064_v19 = vsel %vm172_vm14, %v2054_v53, 0.0  ;;  %v2065_v12 = vsel %vm6638_vm12, %v6624_v36, 0.0  ;;  %v2066_v5 = vsel %vm172_vm14, %v2056_v31, 0.0  ;;  %v8000_v20 = vld [vmem:[#allocation78_spill] sm:$0xff]  ;;  %v2189_v23 = vpop.permute.xlu0 %2188  ;;  %v8004_v31 = vld [vmem:[#allocation77_spill] sm:$0xff] }
 0x2e9   :  { %v2067_v7 = vsel %vm6638_vm12, %v6626_v55, 0.0  ;;  %v2111_v47 = vmul.f32 %v8000_v20, %v2099_v54  ;;  %v2112_v39 = vmul.f32 %v8000_v20, %v2101_v6  ;;  %v2100_v58 = vsel %vm2086_vm3, %v6463_v35, %v6506_v40  ;;  %vm6809_vm12 = vmand %vm2075_vm6, %vm153_vm11 }
 0x2ea   :  { %v2102_v4 = vsel %vm2086_vm3, %v6506_v40, %v6463_v35  ;;  %v2106_v18 = vmul.f32 %v8001_v27, %v2087_v29  ;;  %v2107_v41 = vmul.f32 %v8001_v27, %v2089_v21  ;;  %v2108_v37 = vmul.f32 %v8001_v27, %v2088_v13  ;;  %2581 = vrot.lane.b32.xlu0 %v3284_v61, %s3216_s8  ;;  %vm6770_vm3 = vmand %vm2075_vm6, %vm147_vm9 }
 0x2eb   :  { %v2109_v10 = vmul.f32 %v8001_v27, %v2090_v57  ;;  %v2154_v8 = vsel %vm2141_vm5, %v2147_v32, %v2151_v34  ;;  %v2156_v25 = vsel %vm2141_vm5, %v2151_v34, %v2147_v32  ;;  %v2155_v35 = vsel %vm2141_vm5, %v2149_v44, %v2153_v17  ;;  %v2191_v11 = vpop.permute.xlu1 %2190  ;;  %2583 = vrot.lane.b32.xlu1 %v3288_v63, %s3216_s8 }
 0x2ec   :  { %v2157_v40 = vsel %vm2141_vm5, %v2153_v17, %v2149_v44  ;;  %v2113_v15 = vmul.f32 %v8000_v20, %v2100_v58  ;;  %v2114_v26 = vmul.f32 %v8000_v20, %v2102_v4  ;;  %v2142_v3 = vsel %vm2141_vm5, %v6536_v38, %v6581_v28  ;;  %v2193_v36 = vpop.permute.xlu0 %2192 }
 0x2ed   :  { %v2144_v0 = vsel %vm2141_vm5, %v6581_v28, %v6536_v38  ;;  %v2115_v32 = vadd.f32 %v2111_v47, %v2106_v18  ;;  %v2116_v14 = vadd.f32 %v2112_v39, %v2107_v41  ;;  %v2143_v30 = vsel %vm2141_vm5, %v6542_v62, %v6599_v9 }
 0x2ee   :  { %v2145_v22 = vsel %vm2141_vm5, %v6599_v9, %v6542_v62  ;;  %v2166_v28 = vmul.f32 %v2165_v49, %v2154_v8  ;;  %v2167_v42 = vmul.f32 %v2165_v49, %v2156_v25  ;;  %v2168_v44 = vmul.f32 %v2165_v49, %v2155_v35  ;;  %2590 = vrot.lane.b32.xlu0 %v3268_v46, %s3216_s8 }
 0x2ef   :  { %v2169_v53 = vmul.f32 %v2165_v49, %v2157_v40  ;;  %v2161_v55 = vmul.f32 %v8004_v31, %v2142_v3  ;;  %v2162_v62 = vmul.f32 %v8004_v31, %v2144_v0  ;;  %v2197_v9 = vsel %vm2196_vm1, %v2189_v23, %v2193_v36  ;;  %v2195_v54 = vpop.permute.xlu1 %2194  ;;  %2592 = vrot.lane.b32.xlu1 %v3266_v45, %s3216_s8 }
 0x2f0   :  { %v2199_v16 = vsel %vm2196_vm1, %v2193_v36, %v2189_v23  ;;  %v2163_v6 = vmul.f32 %v8004_v31, %v2143_v30  ;;  %v2164_v34 = vmul.f32 %v8004_v31, %v2145_v22  ;;  %v2198_v29 = vsel %vm2196_vm1, %v2191_v11, %v2195_v54  ;;  %v2202_v4 = vpop.permute.xlu0 %2201 }
 0x2f1   :  { %v2200_v49 = vsel %vm2196_vm1, %v2195_v54, %v2191_v11  ;;  %v2125_v21 = vsel %vm140_vm2, %v2115_v32, 0.0  ;;  %v2126_v13 = vsel %vm6740_vm15, %v2116_v14, 0.0  ;;  %v2117_v57 = vadd.f32 %v2113_v15, %v2108_v37 }
 0x2f2   :  { %v2118_v17 = vadd.f32 %v2114_v26, %v2109_v10  ;;  %v2170_v20 = vadd.f32 %v2166_v28, %v2161_v55  ;;  %v2171_v47 = vadd.f32 %v2167_v42, %v2162_v62  ;;  %v2172_v39 = vadd.f32 %v2168_v44, %v2163_v6  ;;  %2594 = vrot.lane.b32.xlu0 %v3282_v60, %s3216_s8 }
 0x2f3   :  { %v2173_v58 = vadd.f32 %v2169_v53, %v2164_v34  ;;  %v2068_v27 = vadd.f32 %v2064_v19, %v6630_v33  ;;  %v2069_v18 = vadd.f32 %v2065_v12, %v6632_v2  ;;  %v2215_v37 = vstv %s6710_s9  ;;  %v2204_v10 = vpop.permute.xlu1 %2203  ;;  %2596 = vrot.lane.b32.xlu1 %v3272_v51, %s3216_s8  ;;  %s7164_s8 = sld [smem:[#allocation7 + $0x61]]  ;;  %s3222_s9 = smov [#allocation8]  }
 0x2f4   :  { %v2070_v23 = vadd.f32 %v2066_v5, %v6646_v48  ;;  %v2071_v8 = vadd.f32 %v2067_v7, %v6648_v24  ;;  %v2220_v33 = vstv %s6724_s10  ;;  %vm2251_vm5 = vcmp.lt.s32.totalorder %v3829_v59, 96  ;;  %v2206_v35 = vpop.permute.xlu0 %2205  ;;  %s2921_s10 = sshll.u32 %s3222_s9, 4  ;;  %s2922_s10 = int_to_ptr.vmem [resolvable:$true] %s2921_s10 }
 0x2f5   :  { %v2129_v2 = vadd.f32 %v2125_v21, %v2068_v27  ;;  %v2130_v19 = vadd.f32 %v2126_v13, %v2069_v18  ;;  %v2127_v12 = vsel %vm140_vm2, %v2117_v57, 0.0  ;;  %v2128_v25 = vsel %vm6740_vm15, %v2118_v17, 0.0  ;;  %p3146_p0 = scmp.lt.s32.totalorder %s2922_s10, %s2922_s10 }
 0x2f6   :  { %v2180_v48 = vsel %vm146_vm8, %v2170_v20, 0.0  ;;  %v2181_v24 = vsel %vm6770_vm3, %v2171_v47, 0.0  ;;  %v2182_v5 = vsel %vm146_vm8, %v2172_v39, 0.0  ;;  %v2183_v7 = vsel %vm6770_vm3, %v2173_v58, 0.0  ;;  %2632 = vrot.lane.b32.xlu0 %v3274_v52, %s3217_s2 }
 0x2f7   :  { %v2216_v40 = vmul.f32 %v2215_v37, %v2197_v9  ;;  %v2217_v11 = vmul.f32 %v2215_v37, %v2199_v16  ;;  %v2209_v15 = vsel %vm2196_vm1, %v2202_v4, %v2206_v35  ;;  %v2211_v26 = vsel %vm2196_vm1, %v2206_v35, %v2202_v4  ;;  %v2208_v3 = vpop.permute.xlu1 %2207  ;;  %2634 = vrot.lane.b32.xlu1 %v3278_v56, %s3217_s2 }
 0x2f8   :  { %v2221_v0 = vmul.f32 %v2220_v33, %v2209_v15  ;;  %v2222_v32 = vmul.f32 %v2220_v33, %v2211_v26  ;;  %v2210_v14 = vsel %vm2196_vm1, %v2204_v10, %v2208_v3  ;;  %v2212_v30 = vsel %vm2196_vm1, %v2208_v3, %v2204_v10  ;;  %v2244_v62 = vpop.permute.xlu0 %2243 }
 0x2f9   :  { %v2218_v22 = vmul.f32 %v2215_v37, %v2198_v29  ;;  %v2219_v38 = vmul.f32 %v2215_v37, %v2200_v49  ;;  %v2223_v42 = vmul.f32 %v2220_v33, %v2210_v14  ;;  %v2224_v44 = vmul.f32 %v2220_v33, %v2212_v30 }
 0x2fa   :  { %v2131_v53 = vadd.f32 %v2127_v12, %v2070_v23  ;;  %v2132_v36 = vadd.f32 %v2128_v25, %v2071_v8  ;;  %v2225_v31 = vadd.f32 %v2221_v0, %v2216_v40  ;;  %v2226_v55 = vadd.f32 %v2222_v32, %v2217_v11  ;;  %2636 = vrot.lane.b32.xlu0 %v3284_v61, %s3217_s2 }
 0x2fb   :  { %v2184_v9 = vadd.f32 %v2180_v48, %v2129_v2  ;;  %v2185_v16 = vadd.f32 %v2181_v24, %v2130_v19  ;;  %v2227_v54 = vadd.f32 %v2223_v42, %v2218_v22  ;;  %v2228_v6 = vadd.f32 %v2224_v44, %v2219_v38  ;;  %v2246_v34 = vpop.permute.xlu1 %2245  ;;  %2638 = vrot.lane.b32.xlu1 %v3288_v63, %s3217_s2 }
 0x2fc   :  { %v2186_v29 = vadd.f32 %v2182_v5, %v2131_v53  ;;  %v2187_v49 = vadd.f32 %v2183_v7, %v2132_v36  ;;  %v2235_v21 = vsel %vm152_vm10, %v2225_v31, 0.0  ;;  %v2236_v13 = vsel %vm6809_vm12, %v2226_v55, 0.0  ;;  %v2248_v4 = vpop.permute.xlu0 %2247 }
 0x2fd   :  { %v2239_v57 = vadd.f32 %v2235_v21, %v2184_v9  ;;  %v2240_v17 = vadd.f32 %v2236_v13, %v2185_v16  ;;  %v2237_v20 = vsel %vm152_vm10, %v2227_v54, 0.0  ;;  %v2238_v47 = vsel %vm6809_vm12, %v2228_v6, 0.0  ;;  %vm6943_vm12 = vmand %vm2075_vm6, %vm167_vm7 }
 0x2fe   :  { %v2241_v39 = vadd.f32 %v2237_v20, %v2186_v29  ;;  %v2242_v58 = vadd.f32 %v2238_v47, %v2187_v49  ;;  %v2252_v27 = vsel %vm2251_vm5, %v2244_v62, %v2248_v4  ;;  %v2254_v18 = vsel %vm2251_vm5, %v2248_v4, %v2244_v62  ;;  %2645 = vrot.lane.b32.xlu0 %v3268_v46, %s3217_s2 }
 0x2ff   :  { %v2250_v41 = vpop.permute.xlu1 %2249  ;;  %2647 = vrot.lane.b32.xlu1 %v3266_v45, %s3217_s2  ;;  %v2270_v33 = vstv %s3009_s11  ;;  %v2275_v2 = vstv %s3010_s13  ;;  %vm2304_vm1 = vcmp.lt.s32.totalorder %v3829_v59, 95  ;;  %v2323_v21 = vstv %s3011_s15 }
 0x300   :  { %v2253_v37 = vsel %vm2251_vm5, %v2246_v34, %v2250_v41  ;;  %v2255_v10 = vsel %vm2251_vm5, %v2250_v41, %v2246_v34  ;;  %v2257_v23 = vpop.permute.xlu0 %2256  ;;  %v2271_v12 = vmul.f32 %v2270_v33, %v2252_v27  ;;  %v2272_v25 = vmul.f32 %v2270_v33, %v2254_v18 }
 0x301   :  { %v2273_v15 = vmul.f32 %v2270_v33, %v2253_v37  ;;  %v2274_v26 = vmul.f32 %v2270_v33, %v2255_v10  ;;  %v2328_v13 = vstv %s3012_s16  ;;  %vm8009_vm15 = vcmp.lt.s32.totalorder %v3872_v43, 15 }
 0x302   :  { %2649 = vrot.lane.b32.xlu0 %v3282_v60, %s3217_s2  ;;  %vm6894_vm3 = vmand %vm2075_vm6, %vm8009_vm15  ;;  %vm2414_vm15 = vcmp.lt.s32.totalorder %v3829_v59, 93 }
 0x303   :  { %v2259_v8 = vpop.permute.xlu1 %2258  ;;  %2651 = vrot.lane.b32.xlu1 %v3272_v51, %s3217_s2  ;;  %s3141_s2 = scalar_lea.vmem %s2922_s10, 64 }
 0x304   :  { %v2261_v19 = vpop.permute.xlu0 %2260  ;;  %p3142_p13 = scmp.ne.s32.totalorder %s2922_s10, %s3141_s2  ;;  %p3147_p1 = scmp.lt.s32.totalorder %s3141_s2, %s3141_s2 }
 0x305   :  { %v2264_v48 = vsel %vm2251_vm5, %v2257_v23, %v2261_v19  ;;  %v2266_v24 = vsel %vm2251_vm5, %v2261_v19, %v2257_v23 }
 0x306   :  { %v2276_v7 = vmul.f32 %v2275_v2, %v2264_v48  ;;  %v2277_v35 = vmul.f32 %v2275_v2, %v2266_v24  ;;  %2685 = vrot.lane.b32.xlu0 %v3274_v52, %s3218_s14  ;;  %p3148_p2 = por %p3147_p1, %p3146_p0 }
 0x307   :  { %v2263_v5 = vpop.permute.xlu1 %2262  ;;  %2687 = vrot.lane.b32.xlu1 %v3278_v56, %s3218_s14 }
 0x308   :  { %v2265_v40 = vsel %vm2251_vm5, %v2259_v8, %v2263_v5  ;;  %v2267_v11 = vsel %vm2251_vm5, %v2263_v5, %v2259_v8  ;;  %v2280_v32 = vadd.f32 %v2276_v7, %v2271_v12  ;;  %v2281_v14 = vadd.f32 %v2277_v35, %v2272_v25  ;;  %v2297_v30 = vpop.permute.xlu0 %2296  ;;  %p3149_p3 = pnand %p3148_p2, %p3142_p13 }
 0x309   :  { %v2278_v3 = vmul.f32 %v2275_v2, %v2265_v40  ;;  %v2279_v0 = vmul.f32 %v2275_v2, %v2267_v11  ;;  %vm2359_vm5 = vcmp.lt.s32.totalorder %v3829_v59, 94 }
 0x30a   :  { %v2289_v42 = vsel %vm2075_vm6, %v2281_v14, 0.0  ;;  %v2292_v44 = vadd.f32 %v2280_v32, %v2239_v57  ;;  %2689 = vrot.lane.b32.xlu0 %v3284_v61, %s3218_s14 }
 0x30b   :  { %v2282_v22 = vadd.f32 %v2278_v3, %v2273_v15  ;;  %v2283_v38 = vadd.f32 %v2279_v0, %v2274_v26  ;;  %v2299_v28 = vpop.permute.xlu1 %2298  ;;  %v2293_v53 = vadd.f32 %v2289_v42, %v2240_v17  ;;  %2691 = vrot.lane.b32.xlu1 %v3288_v63, %s3218_s14 }
 0x30c   :  { %v2301_v62 = vpop.permute.xlu0 %2300 }
 0x30d   :  { %v2291_v36 = vsel %vm2075_vm6, %v2283_v38, 0.0  ;;  %v2294_v31 = vadd.f32 %v2282_v22, %v2241_v39  ;;  %v2305_v9 = vsel %vm2304_vm1, %v2297_v30, %v2301_v62  ;;  %v2307_v16 = vsel %vm2304_vm1, %v2301_v62, %v2297_v30 }
 0x30e   :  { %v2295_v55 = vadd.f32 %v2291_v36, %v2242_v58  ;;  %2698 = vrot.lane.b32.xlu0 %v3268_v46, %s3218_s14  ;;  %v2324_v17 = vmul.f32 %v2323_v21, %v2305_v9  ;;  %v2325_v20 = vmul.f32 %v2323_v21, %v2307_v16 }
 0x30f   :  { %v2303_v54 = vpop.permute.xlu1 %2302  ;;  %2700 = vrot.lane.b32.xlu1 %v3266_v45, %s3218_s14 }
 0x310   :  { %v2306_v6 = vsel %vm2304_vm1, %v2299_v28, %v2303_v54  ;;  %v2308_v34 = vsel %vm2304_vm1, %v2303_v54, %v2299_v28  ;;  %v2310_v29 = vpop.permute.xlu0 %2309 }
 0x311   :  { %v2326_v37 = vmul.f32 %v2323_v21, %v2306_v6  ;;  %v2327_v10 = vmul.f32 %v2323_v21, %v2308_v34 }
 0x312   :  { %2702 = vrot.lane.b32.xlu0 %v3282_v60, %s3218_s14 }
 0x313   :  { %v2312_v49 = vpop.permute.xlu1 %2311  ;;  %2704 = vrot.lane.b32.xlu1 %v3272_v51, %s3218_s14 }
 0x314   :  { %v2314_v57 = vpop.permute.xlu0 %2313 }
 0x315   :  { %v2317_v47 = vsel %vm2304_vm1, %v2310_v29, %v2314_v57  ;;  %v2319_v39 = vsel %vm2304_vm1, %v2314_v57, %v2310_v29 }
 0x316   :  { %v2329_v4 = vmul.f32 %v2328_v13, %v2317_v47  ;;  %v2330_v27 = vmul.f32 %v2328_v13, %v2319_v39  ;;  %2740 = vrot.lane.b32.xlu0 %v3274_v52, %s3219_s17 }
 0x317   :  { %v2316_v58 = vpop.permute.xlu1 %2315  ;;  %2742 = vrot.lane.b32.xlu1 %v3278_v56, %s3219_s17 }
 0x318   :  { %v2318_v18 = vsel %vm2304_vm1, %v2312_v49, %v2316_v58  ;;  %v2320_v41 = vsel %vm2304_vm1, %v2316_v58, %v2312_v49  ;;  %v2333_v2 = vadd.f32 %v2329_v4, %v2324_v17  ;;  %v2334_v19 = vadd.f32 %v2330_v27, %v2325_v20  ;;  %v2352_v12 = vpop.permute.xlu0 %2351 }
 0x319   :  { %v2331_v8 = vmul.f32 %v2328_v13, %v2318_v18  ;;  %v2332_v33 = vmul.f32 %v2328_v13, %v2320_v41  ;;  %vm8014_vm1 = vcmp.lt.s32.totalorder %v3865_v50, 14 }
 0x31a   :  { %v2343_v5 = vsel %vm160_vm0, %v2333_v2, 0.0  ;;  %v2344_v7 = vsel %vm6894_vm3, %v2334_v19, 0.0  ;;  %2744 = vrot.lane.b32.xlu0 %v3284_v61, %s3219_s17 }
 0x31b   :  { %v2335_v25 = vadd.f32 %v2331_v8, %v2326_v37  ;;  %v2336_v48 = vadd.f32 %v2332_v33, %v2327_v10  ;;  %v2354_v24 = vpop.permute.xlu1 %2353  ;;  %v2347_v35 = vadd.f32 %v2343_v5, %v2292_v44  ;;  %v2348_v40 = vadd.f32 %v2344_v7, %v2293_v53  ;;  %2746 = vrot.lane.b32.xlu1 %v3288_v63, %s3219_s17 }
 0x31c   :  { %v2356_v0 = vpop.permute.xlu0 %2355  ;;  %v2378_v44 = vstv %s3013_s18  ;;  %v2383_v53 = vstv %s3014_s19  ;;  %v2438_v5 = vstv %s3016_s22 }
 0x31d   :  { %v2345_v11 = vsel %vm160_vm0, %v2335_v25, 0.0  ;;  %v2346_v15 = vsel %vm6894_vm3, %v2336_v48, 0.0  ;;  %v2360_v32 = vsel %vm2359_vm5, %v2352_v12, %v2356_v0  ;;  %v2362_v14 = vsel %vm2359_vm5, %v2356_v0, %v2352_v12  ;;  %vm8015_vm3 = vmmov %vm8014_vm1 }
 0x31e   :  { %v2349_v26 = vadd.f32 %v2345_v11, %v2294_v31  ;;  %v2350_v3 = vadd.f32 %v2346_v15, %v2295_v55  ;;  %2753 = vrot.lane.b32.xlu0 %v3268_v46, %s3219_s17  ;;  %v2379_v31 = vmul.f32 %v2378_v44, %v2360_v32  ;;  %v2380_v55 = vmul.f32 %v2378_v44, %v2362_v14 }
 0x31f   :  { %v2358_v30 = vpop.permute.xlu1 %2357  ;;  %2755 = vrot.lane.b32.xlu1 %v3266_v45, %s3219_s17 }
 0x320   :  { %v2361_v22 = vsel %vm2359_vm5, %v2354_v24, %v2358_v30  ;;  %v2363_v38 = vsel %vm2359_vm5, %v2358_v30, %v2354_v24  ;;  %v2365_v28 = vpop.permute.xlu0 %2364  ;;  %v2433_v24 = vstv %s3015_s21 }
 0x321   :  { %v2381_v49 = vmul.f32 %v2378_v44, %v2361_v22  ;;  %v2382_v21 = vmul.f32 %v2378_v44, %v2363_v38 }
 0x322   :  { %2757 = vrot.lane.b32.xlu0 %v3282_v60, %s3219_s17 }
 0x323   :  { %v2367_v42 = vpop.permute.xlu1 %2366  ;;  %2759 = vrot.lane.b32.xlu1 %v3272_v51, %s3219_s17 }
 0x324   :  { %v2369_v36 = vpop.permute.xlu0 %2368 }
 0x325   :  { %v2372_v62 = vsel %vm2359_vm5, %v2365_v28, %v2369_v36  ;;  %v2374_v9 = vsel %vm2359_vm5, %v2369_v36, %v2365_v28 }
 0x326   :  { %v2384_v54 = vmul.f32 %v2383_v53, %v2372_v62  ;;  %v2385_v6 = vmul.f32 %v2383_v53, %v2374_v9  ;;  %2795 = vrot.lane.b32.xlu0 %v3274_v52, %s3220_s20 }
 0x327   :  { %v2371_v16 = vpop.permute.xlu1 %2370  ;;  %2797 = vrot.lane.b32.xlu1 %v3278_v56, %s3220_s20 }
 0x328   :  { %v2373_v34 = vsel %vm2359_vm5, %v2367_v42, %v2371_v16  ;;  %v2375_v29 = vsel %vm2359_vm5, %v2371_v16, %v2367_v42  ;;  %v2388_v20 = vadd.f32 %v2384_v54, %v2379_v31  ;;  %v2389_v47 = vadd.f32 %v2385_v6, %v2380_v55  ;;  %v2407_v39 = vpop.permute.xlu0 %2406  ;;  %vm6990_vm5 = vmand %vm2075_vm6, %vm173_vm13 }
 0x329   :  { %v2386_v57 = vmul.f32 %v2383_v53, %v2373_v34  ;;  %v2387_v17 = vmul.f32 %v2383_v53, %v2375_v29  ;;  %vm2464_vm6 = vcmp.lt.s32.totalorder %v7939_v1, 208 }
 0x32a   :  { %v2398_v27 = vsel %vm8014_vm1, %v2388_v20, 0.0  ;;  %v2399_v18 = vsel %vm6943_vm12, %v2389_v47, 0.0  ;;  %2799 = vrot.lane.b32.xlu0 %v3284_v61, %s3220_s20  ;;  %v2494_v47 = vstv %s3017_s23  ;;  %vm7024_vm1 = vmand %vm2464_vm6, %vm141_vm4  ;;  %vm2585_vm4 = vcmp.lt.s32.totalorder %v3829_v59, 81 }
 0x32b   :  { %v2390_v58 = vadd.f32 %v2386_v57, %v2381_v49  ;;  %v2391_v52 = vadd.f32 %v2387_v17, %v2382_v21  ;;  %v2409_v4 = vpop.permute.xlu1 %2408  ;;  %v2402_v41 = vadd.f32 %v2398_v27, %v2347_v35  ;;  %v2403_v56 = vadd.f32 %v2399_v18, %v2348_v40  ;;  %2801 = vrot.lane.b32.xlu1 %v3288_v63, %s3220_s20 }
 0x32c   :  { %v2411_v33 = vpop.permute.xlu0 %2410 }
 0x32d   :  { %v2400_v37 = vsel %vm8015_vm3, %v2390_v58, 0.0  ;;  %v2401_v10 = vsel %vm6943_vm12, %v2391_v52, 0.0  ;;  %v2415_v61 = vsel %vm2414_vm15, %v2407_v39, %v2411_v33  ;;  %v2417_v2 = vsel %vm2414_vm15, %v2411_v33, %v2407_v39 }
 0x32e   :  { %v2404_v23 = vadd.f32 %v2400_v37, %v2349_v26  ;;  %v2405_v8 = vadd.f32 %v2401_v10, %v2350_v3  ;;  %2808 = vrot.lane.b32.xlu0 %v3268_v46, %s3220_s20  ;;  %v2434_v35 = vmul.f32 %v2433_v24, %v2415_v61  ;;  %v2435_v40 = vmul.f32 %v2433_v24, %v2417_v2 }
 0x32f   :  { %v2413_v19 = vpop.permute.xlu1 %2412  ;;  %2810 = vrot.lane.b32.xlu1 %v3266_v45, %s3220_s20  ;;  %vm2475_vm12 = vcmp.lt.s32.totalorder %v3829_v59, 83  ;;  %v2499_v39 = vstv %s3018_s1  ;;  %vm2803_vm3 = vcmp.lt.s32.totalorder %v3829_v59, 77 }
 0x330   :  { %v2416_v12 = vsel %vm2414_vm15, %v2409_v4, %v2413_v19  ;;  %v2418_v25 = vsel %vm2414_vm15, %v2413_v19, %v2409_v4  ;;  %v2420_v63 = vpop.permute.xlu0 %2419 }
 0x331   :  { %v2437_v0 = vmul.f32 %v2433_v24, %v2418_v25 }
 0x332   :  { %2812 = vrot.lane.b32.xlu0 %v3282_v60, %s3220_s20 }
 0x333   :  { %v2422_v48 = vpop.permute.xlu1 %2421  ;;  %2814 = vrot.lane.b32.xlu1 %v3272_v51, %s3220_s20  ;;  %v2436_v51 = vmul.f32 %v2433_v24, %v2416_v12 }
 0x334   :  { %v2424_v7 = vpop.permute.xlu0 %2423 }
 0x335   :  { %v2427_v11 = vsel %vm2414_vm15, %v2420_v63, %v2424_v7  ;;  %v2429_v46 = vsel %vm2414_vm15, %v2424_v7, %v2420_v63 }
 0x336   :  { %v2439_v15 = vmul.f32 %v2438_v5, %v2427_v11  ;;  %v2440_v26 = vmul.f32 %v2438_v5, %v2429_v46 }
 0x337   :  { %v2426_v45 = vpop.permute.xlu1 %2425 }
 0x338   :  { %v2428_v3 = vsel %vm2414_vm15, %v2422_v48, %v2426_v45  ;;  %v2430_v60 = vsel %vm2414_vm15, %v2426_v45, %v2422_v48  ;;  %v2443_v22 = vadd.f32 %v2439_v15, %v2434_v35  ;;  %v2444_v38 = vadd.f32 %v2440_v26, %v2435_v40  ;;  %v2468_v28 = vpop.permute.xlu0 %2467 }
 0x339   :  { %v2441_v14 = vmul.f32 %v2438_v5, %v2428_v3  ;;  %v2442_v30 = vmul.f32 %v2438_v5, %v2430_v60  ;;  %vm2530_vm15 = vcmp.lt.s32.totalorder %v3829_v59, 82 }
 0x33a   :  { %v2453_v36 = vsel %vm172_vm14, %v2443_v22, 0.0  ;;  %v2454_v31 = vsel %vm6990_vm5, %v2444_v38, 0.0  ;;  %v2549_v38 = vstv %s3019_s25 }
 0x33b   :  { %v2445_v42 = vadd.f32 %v2441_v14, %v2436_v51  ;;  %v2446_v44 = vadd.f32 %v2442_v30, %v2437_v0  ;;  %v2470_v53 = vpop.permute.xlu1 %2469  ;;  %v2457_v55 = vadd.f32 %v2453_v36, %v2402_v41  ;;  %v2458_v62 = vadd.f32 %v2454_v31, %v2403_v56 }
 0x33c   :  { %v2472_v34 = vpop.permute.xlu0 %2471 }
 0x33d   :  { %v2455_v9 = vsel %vm172_vm14, %v2445_v42, 0.0  ;;  %v2456_v16 = vsel %vm6990_vm5, %v2446_v44, 0.0  ;;  %v2476_v29 = vsel %vm2475_vm12, %v2468_v28, %v2472_v34  ;;  %v2478_v49 = vsel %vm2475_vm12, %v2472_v34, %v2468_v28 }
 0x33e   :  { %v2459_v54 = vadd.f32 %v2455_v9, %v2404_v23  ;;  %v2460_v6 = vadd.f32 %v2456_v16, %v2405_v8  ;;  %v2495_v52 = vmul.f32 %v2494_v47, %v2476_v29  ;;  %v2496_v4 = vmul.f32 %v2494_v47, %v2478_v49 }
 0x33f   :  { %v2474_v21 = vpop.permute.xlu1 %2473  ;;  %v2554_v28 = vstv %s3020_s26  ;;  %vm8024_vm5 = vcmp.lt.s32.totalorder %v3872_v43, 15 }
 0x340   :  { %v2477_v13 = vsel %vm2475_vm12, %v2470_v53, %v2474_v21  ;;  %v2479_v57 = vsel %vm2475_vm12, %v2474_v21, %v2470_v53  ;;  %v2481_v17 = vpop.permute.xlu0 %2480 }
 0x341   :  { %v2497_v8 = vmul.f32 %v2494_v47, %v2477_v13  ;;  %v2498_v33 = vmul.f32 %v2494_v47, %v2479_v57 }
 0x343   :  { %v2483_v20 = vpop.permute.xlu1 %2482 }
 0x344   :  { %v2485_v58 = vpop.permute.xlu0 %2484 }
 0x345   :  { %v2488_v27 = vsel %vm2475_vm12, %v2481_v17, %v2485_v58  ;;  %v2490_v18 = vsel %vm2475_vm12, %v2485_v58, %v2481_v17 }
 0x346   :  { %v2500_v56 = vmul.f32 %v2499_v39, %v2488_v27  ;;  %v2501_v37 = vmul.f32 %v2499_v39, %v2490_v18 }
 0x347   :  { %v2487_v41 = vpop.permute.xlu1 %2486 }
 0x348   :  { %v2489_v10 = vsel %vm2475_vm12, %v2483_v20, %v2487_v41  ;;  %v2491_v23 = vsel %vm2475_vm12, %v2487_v41, %v2483_v20  ;;  %v2504_v12 = vadd.f32 %v2500_v56, %v2495_v52  ;;  %v2505_v25 = vadd.f32 %v2501_v37, %v2496_v4  ;;  %v2523_v63 = vpop.permute.xlu0 %2522  ;;  %vm7182_vm12 = vmand %vm2464_vm6, %vm8024_vm5 }
 0x349   :  { %v2502_v2 = vmul.f32 %v2499_v39, %v2489_v10  ;;  %v2503_v19 = vmul.f32 %v2499_v39, %v2491_v23 }
 0x34a   :  { %v2514_v7 = vsel %vm140_vm2, %v2504_v12, 0.0  ;;  %v2515_v35 = vsel %vm7024_vm1, %v2505_v25, 0.0  ;;  %v2604_v25 = vstv %s3021_s27 }
 0x34b   :  { %v2506_v48 = vadd.f32 %v2502_v2, %v2497_v8  ;;  %v2507_v24 = vadd.f32 %v2503_v19, %v2498_v33  ;;  %v2525_v5 = vpop.permute.xlu1 %2524  ;;  %v2518_v40 = vadd.f32 %v2514_v7, %v2457_v55  ;;  %v2519_v11 = vadd.f32 %v2515_v35, %v2458_v62 }
 0x34c   :  { %v2527_v3 = vpop.permute.xlu0 %2526 }
 0x34d   :  { %v2516_v46 = vsel %vm140_vm2, %v2506_v48, 0.0  ;;  %v2517_v45 = vsel %vm7024_vm1, %v2507_v24, 0.0  ;;  %v2531_v60 = vsel %vm2530_vm15, %v2523_v63, %v2527_v3  ;;  %v2533_v51 = vsel %vm2530_vm15, %v2527_v3, %v2523_v63  ;;  %vm7057_vm2 = vmand %vm2464_vm6, %vm147_vm9 }
 0x34e   :  { %v2520_v15 = vadd.f32 %v2516_v46, %v2459_v54  ;;  %v2521_v26 = vadd.f32 %v2517_v45, %v2460_v6  ;;  %v2550_v44 = vmul.f32 %v2549_v38, %v2531_v60  ;;  %v2551_v53 = vmul.f32 %v2549_v38, %v2533_v51  ;;  %vm7200_vm1 = vmand %vm2464_vm6, %vm167_vm7 }
 0x34f   :  { %v2529_v0 = vpop.permute.xlu1 %2528  ;;  %v2609_v63 = vstv %s3022_s28  ;;  %vm2640_vm9 = vcmp.lt.s32.totalorder %v3829_v59, 80  ;;  %v2772_v60 = vstv %s3028_s6  ;;  %vm8029_vm7 = vcmp.lt.s32.totalorder %v3865_v50, 14 }
 0x350   :  { %v2532_v32 = vsel %vm2530_vm15, %v2525_v5, %v2529_v0  ;;  %v2534_v14 = vsel %vm2530_vm15, %v2529_v0, %v2525_v5  ;;  %v2536_v30 = vpop.permute.xlu0 %2535 }
 0x351   :  { %v2552_v6 = vmul.f32 %v2549_v38, %v2532_v32  ;;  %v2553_v34 = vmul.f32 %v2549_v38, %v2534_v14 }
 0x353   :  { %v2538_v22 = vpop.permute.xlu1 %2537 }
 0x354   :  { %v2540_v42 = vpop.permute.xlu0 %2539 }
 0x355   :  { %v2543_v36 = vsel %vm2530_vm15, %v2536_v30, %v2540_v42  ;;  %v2545_v31 = vsel %vm2530_vm15, %v2540_v42, %v2536_v30 }
 0x356   :  { %v2555_v62 = vmul.f32 %v2554_v28, %v2543_v36  ;;  %v2556_v9 = vmul.f32 %v2554_v28, %v2545_v31 }
 0x357   :  { %v2542_v55 = vpop.permute.xlu1 %2541 }
 0x358   :  { %v2544_v16 = vsel %vm2530_vm15, %v2538_v22, %v2542_v55  ;;  %v2546_v54 = vsel %vm2530_vm15, %v2542_v55, %v2538_v22  ;;  %v2559_v13 = vadd.f32 %v2555_v62, %v2550_v44  ;;  %v2560_v57 = vadd.f32 %v2556_v9, %v2551_v53  ;;  %v2578_v17 = vpop.permute.xlu0 %2577  ;;  %vm8030_vm15 = vmmov %vm8029_vm7 }
 0x359   :  { %v2557_v49 = vmul.f32 %v2554_v28, %v2544_v16  ;;  %v2558_v21 = vmul.f32 %v2554_v28, %v2546_v54 }
 0x35a   :  { %v2569_v58 = vsel %vm146_vm8, %v2559_v13, 0.0  ;;  %v2570_v52 = vsel %vm7057_vm2, %v2560_v57, 0.0 }
 0x35b   :  { %v2561_v20 = vadd.f32 %v2557_v49, %v2552_v6  ;;  %v2562_v47 = vadd.f32 %v2558_v21, %v2553_v34  ;;  %v2580_v39 = vpop.permute.xlu1 %2579  ;;  %v2573_v4 = vadd.f32 %v2569_v58, %v2518_v40  ;;  %v2574_v27 = vadd.f32 %v2570_v52, %v2519_v11 }
 0x35c   :  { %v2582_v10 = vpop.permute.xlu0 %2581 }
 0x35d   :  { %v2571_v18 = vsel %vm146_vm8, %v2561_v20, 0.0  ;;  %v2572_v41 = vsel %vm7057_vm2, %v2562_v47, 0.0  ;;  %v2586_v23 = vsel %vm2585_vm4, %v2578_v17, %v2582_v10  ;;  %v2588_v8 = vsel %vm2585_vm4, %v2582_v10, %v2578_v17  ;;  %vm7090_vm8 = vmand %vm2464_vm6, %vm153_vm11 }
 0x35e   :  { %v2575_v56 = vadd.f32 %v2571_v18, %v2520_v15  ;;  %v2576_v37 = vadd.f32 %v2572_v41, %v2521_v26  ;;  %v2605_v24 = vmul.f32 %v2604_v25, %v2586_v23  ;;  %v2606_v5 = vmul.f32 %v2604_v25, %v2588_v8 }
 0x35f   :  { %v2584_v33 = vpop.permute.xlu1 %2583  ;;  %v2664_v41 = vstv %s3024_s29  ;;  %v2659_v10 = vstv %s3023_s0  ;;  %vm2748_vm11 = vcmp.lt.s32.totalorder %v3829_v59, 78 }
 0x360   :  { %v2587_v61 = vsel %vm2585_vm4, %v2580_v39, %v2584_v33  ;;  %v2589_v2 = vsel %vm2585_vm4, %v2584_v33, %v2580_v39  ;;  %v2591_v19 = vpop.permute.xlu0 %2590 }
 0x361   :  { %v2607_v26 = vmul.f32 %v2604_v25, %v2587_v61  ;;  %v2608_v3 = vmul.f32 %v2604_v25, %v2589_v2  ;;  %v2712_v2 = vstv %s3025_s30 }
 0x363   :  { %v2593_v12 = vpop.permute.xlu1 %2592 }
 0x364   :  { %v2595_v48 = vpop.permute.xlu0 %2594 }
 0x365   :  { %v2598_v7 = vsel %vm2585_vm4, %v2591_v19, %v2595_v48  ;;  %v2600_v35 = vsel %vm2585_vm4, %v2595_v48, %v2591_v19 }
 0x366   :  { %v2610_v11 = vmul.f32 %v2609_v63, %v2598_v7  ;;  %v2611_v46 = vmul.f32 %v2609_v63, %v2600_v35 }
 0x367   :  { %v2597_v40 = vpop.permute.xlu1 %2596 }
 0x368   :  { %v2599_v45 = vsel %vm2585_vm4, %v2593_v12, %v2597_v40  ;;  %v2601_v15 = vsel %vm2585_vm4, %v2597_v40, %v2593_v12  ;;  %v2614_v32 = vadd.f32 %v2610_v11, %v2605_v24  ;;  %v2615_v14 = vadd.f32 %v2611_v46, %v2606_v5  ;;  %v2633_v30 = vpop.permute.xlu0 %2632 }
 0x369   :  { %v2612_v51 = vmul.f32 %v2609_v63, %v2599_v45  ;;  %v2613_v0 = vmul.f32 %v2609_v63, %v2601_v15  ;;  %v2717_v63 = vstv %s3026_s4 }
 0x36a   :  { %v2624_v42 = vsel %vm152_vm10, %v2614_v32, 0.0  ;;  %v2625_v44 = vsel %vm7090_vm8, %v2615_v14, 0.0 }
 0x36b   :  { %v2616_v22 = vadd.f32 %v2612_v51, %v2607_v26  ;;  %v2617_v38 = vadd.f32 %v2613_v0, %v2608_v3  ;;  %v2635_v28 = vpop.permute.xlu1 %2634  ;;  %v7098_v53 = vadd.f32 %v2624_v42, %v2573_v4  ;;  %v7100_v36 = vadd.f32 %v2625_v44, %v2574_v27 }
 0x36c   :  { %v2637_v16 = vpop.permute.xlu0 %2636  ;;  %v2767_v3 = vstv %s3027_s5 }
 0x36d   :  { %v2626_v31 = vsel %vm152_vm10, %v2616_v22, 0.0  ;;  %v2627_v55 = vsel %vm7090_vm8, %v2617_v38, 0.0  ;;  %v2641_v23 = vsel %vm2640_vm9, %v2633_v30, %v2637_v16  ;;  %v2643_v8 = vsel %vm2640_vm9, %v2637_v16, %v2633_v30 }
 0x36e   :  { %v7106_v62 = vadd.f32 %v2626_v31, %v2575_v56  ;;  %v7108_v9 = vadd.f32 %v2627_v55, %v2576_v37  ;;  %vm2693_vm10 = vcmp.lt.s32.totalorder %v3829_v59, 79  ;;  %v2660_v24 = vmul.f32 %v2659_v10, %v2641_v23 }
 0x36f   :  { %v2639_v54 = vpop.permute.xlu1 %2638  ;;  %v2661_v5 = vmul.f32 %v2659_v10, %v2643_v8 }
 0x370   :  { %v2646_v6 = vpop.permute.xlu0 %2645  ;;  %v2642_v7 = vsel %vm2640_vm9, %v2635_v28, %v2639_v54  ;;  %v2644_v35 = vsel %vm2640_vm9, %v2639_v54, %v2635_v28 }
 0x371   :  { %v2662_v0 = vmul.f32 %v2659_v10, %v2642_v7  ;;  %v2663_v32 = vmul.f32 %v2659_v10, %v2644_v35 }
 0x373   :  { %v2648_v34 = vpop.permute.xlu1 %2647 }
 0x374   :  { %v2650_v29 = vpop.permute.xlu0 %2649 }
 0x375   :  { %v2653_v56 = vsel %vm2640_vm9, %v2646_v6, %v2650_v29  ;;  %v2655_v37 = vsel %vm2640_vm9, %v2650_v29, %v2646_v6 }
 0x376   :  { %v2665_v12 = vmul.f32 %v2664_v41, %v2653_v56  ;;  %v2666_v25 = vmul.f32 %v2664_v41, %v2655_v37 }
 0x377   :  { %v2652_v49 = vpop.permute.xlu1 %2651 }
 0x378   :  { %v2686_v21 = vpop.permute.xlu0 %2685  ;;  %v2654_v33 = vsel %vm2640_vm9, %v2648_v34, %v2652_v49  ;;  %v2656_v61 = vsel %vm2640_vm9, %v2652_v49, %v2648_v34  ;;  %v2669_v14 = vadd.f32 %v2665_v12, %v2660_v24  ;;  %v2670_v30 = vadd.f32 %v2666_v25, %v2661_v5 }
 0x379   :  { %v2667_v40 = vmul.f32 %v2664_v41, %v2654_v33  ;;  %v2668_v11 = vmul.f32 %v2664_v41, %v2656_v61 }
 0x37a   :  { %v2678_v25 = vsel %vm2464_vm6, %v2670_v30, 0.0  ;;  %v2822_v30 = vstv %s7162_s7 }
 0x37b   :  { %v7110_v13 = vpop.permute.xlu1 %2687  ;;  %v2671_v31 = vadd.f32 %v2667_v40, %v2662_v0  ;;  %v2672_v55 = vadd.f32 %v2668_v11, %v2663_v32 }
 0x37c   :  { %v2690_v57 = vpop.permute.xlu0 %2689 }
 0x37d   :  { %v2694_v15 = vsel %vm2693_vm10, %v2686_v21, %v2690_v57  ;;  %v2696_v26 = vsel %vm2693_vm10, %v2690_v57, %v2686_v21  ;;  %v2683_v0 = vadd.f32 %v2671_v31, %v7106_v62 }
 0x37e   :  { %v2713_v16 = vmul.f32 %v2712_v2, %v2694_v15  ;;  %v2714_v54 = vmul.f32 %v2712_v2, %v2696_v26  ;;  %v2682_v15 = vadd.f32 %v2678_v25, %v7100_v36 }
 0x37f   :  { %v2692_v17 = vpop.permute.xlu1 %2691 }
 0x380   :  { %v2699_v20 = vpop.permute.xlu0 %2698  ;;  %v2695_v6 = vsel %vm2693_vm10, %v7110_v13, %v2692_v17  ;;  %v2697_v34 = vsel %vm2693_vm10, %v2692_v17, %v7110_v13 }
 0x381   :  { %v2715_v33 = vmul.f32 %v2712_v2, %v2695_v6  ;;  %v2716_v61 = vmul.f32 %v2712_v2, %v2697_v34 }
 0x383   :  { %v2701_v47 = vpop.permute.xlu1 %2700 }
 0x384   :  { %v2703_v39 = vpop.permute.xlu0 %2702 }
 0x385   :  { %v2706_v46 = vsel %vm2693_vm10, %v2699_v20, %v2703_v39  ;;  %v2708_v45 = vsel %vm2693_vm10, %v2703_v39, %v2699_v20 }
 0x386   :  { %v2718_v38 = vmul.f32 %v2717_v63, %v2706_v46  ;;  %v2719_v28 = vmul.f32 %v2717_v63, %v2708_v45  ;;  %v2681_v45 = vadd.f32 %v2669_v14, %v7098_v53  ;;  %v2827_v53 = vstv %s7164_s8 }
 0x387   :  { %v2705_v58 = vpop.permute.xlu1 %2704 }
 0x388   :  { %v7112_v52 = vpop.permute.xlu0 %2740  ;;  %v2707_v42 = vsel %vm2693_vm10, %v2701_v47, %v2705_v58  ;;  %v2709_v44 = vsel %vm2693_vm10, %v2705_v58, %v2701_v47  ;;  %v2722_v13 = vadd.f32 %v2718_v38, %v2713_v16  ;;  %v2723_v17 = vadd.f32 %v2719_v28, %v2714_v54 }
 0x389   :  { %v2720_v57 = vmul.f32 %v2717_v63, %v2707_v42  ;;  %v2721_v20 = vmul.f32 %v2717_v63, %v2709_v44 }
 0x38a   :  { %v2732_v35 = vsel %vm160_vm0, %v2722_v13, 0.0  ;;  %v2733_v40 = vsel %vm7182_vm12, %v2723_v17, 0.0 }
 0x38b   :  { %v7114_v4 = vpop.permute.xlu1 %2742  ;;  %v2725_v24 = vadd.f32 %v2721_v20, %v2716_v61  ;;  %v2736_v14 = vadd.f32 %v2732_v35, %v2681_v45  ;;  %v2737_v36 = vadd.f32 %v2733_v40, %v2682_v15 }
 0x38c   :  { %v2745_v27 = vpop.permute.xlu0 %2744 }
 0x38d   :  { %v2749_v41 = vsel %vm2748_vm11, %v7112_v52, %v2745_v27  ;;  %v2751_v56 = vsel %vm2748_vm11, %v2745_v27, %v7112_v52  ;;  %v2735_v44 = vsel %vm7182_vm12, %v2725_v24, 0.0 }
 0x38e   :  { %v2769_v63 = vmul.f32 %v2767_v3, %v2751_v56 }
 0x38f   :  { %v2747_v18 = vpop.permute.xlu1 %2746 }
 0x390   :  { %v2754_v19 = vpop.permute.xlu0 %2753  ;;  %v2750_v37 = vsel %vm2748_vm11, %v7114_v4, %v2747_v18  ;;  %v2752_v10 = vsel %vm2748_vm11, %v2747_v18, %v7114_v4  ;;  %v2680_v4 = vsel %vm2464_vm6, %v2672_v55, 0.0  ;;  %v2768_v18 = vmul.f32 %v2767_v3, %v2749_v41 }
 0x391   :  { %v2770_v5 = vmul.f32 %v2767_v3, %v2750_v37  ;;  %v2771_v7 = vmul.f32 %v2767_v3, %v2752_v10  ;;  %v2684_v32 = vadd.f32 %v2680_v4, %v7108_v9 }
 0x393   :  { %v2756_v48 = vpop.permute.xlu1 %2755 }
 0x394   :  { %v2758_v51 = vpop.permute.xlu0 %2757 }
 0x395   :  { %v2761_v29 = vsel %vm2748_vm11, %v2754_v19, %v2758_v51  ;;  %v2763_v49 = vsel %vm2748_vm11, %v2758_v51, %v2754_v19 }
 0x396   :  { %v2773_v23 = vmul.f32 %v2772_v60, %v2761_v29  ;;  %v2774_v8 = vmul.f32 %v2772_v60, %v2763_v49 }
 0x397   :  { %v2760_v22 = vpop.permute.xlu1 %2759 }
 0x398   :  { %v2796_v21 = vpop.permute.xlu0 %2795  ;;  %v2762_v47 = vsel %vm2748_vm11, %v2756_v48, %v2760_v22  ;;  %v2764_v39 = vsel %vm2748_vm11, %v2760_v22, %v2756_v48  ;;  %v2724_v48 = vadd.f32 %v2720_v57, %v2715_v33  ;;  %v2777_v11 = vadd.f32 %v2773_v23, %v2768_v18 }
 0x399   :  { %v2775_v52 = vmul.f32 %v2772_v60, %v2762_v47  ;;  %v2776_v27 = vmul.f32 %v2772_v60, %v2764_v39  ;;  %v2778_v46 = vadd.f32 %v2774_v8, %v2769_v63  ;;  %v2739_v23 = vadd.f32 %v2735_v44, %v2684_v32 }
 0x39a   :  { %v2734_v42 = vsel %vm160_vm0, %v2724_v48, 0.0  ;;  %v2787_v62 = vsel %vm8029_vm7, %v2777_v11, 0.0  ;;  %vm7240_vm0 = vmand %vm2464_vm6, %vm173_vm13  ;;  %v8033_v32 = vlaneseq }
 0x39b   :  { %v2798_v58 = vpop.permute.xlu1 %2797  ;;  %v2779_v3 = vadd.f32 %v2775_v52, %v2770_v5  ;;  %v2780_v60 = vadd.f32 %v2776_v27, %v2771_v7  ;;  %v2788_v9 = vsel %vm7200_vm1, %v2778_v46, 0.0  ;;  %v2738_v10 = vadd.f32 %v2734_v42, %v2683_v0 }
 0x39c   :  { %v2800_v12 = vpop.permute.xlu0 %2799  ;;  %v2791_v61 = vadd.f32 %v2787_v62, %v2736_v14  ;;  %v2792_v19 = vadd.f32 %v2788_v9, %v2737_v36 }
 0x39d   :  { %v2804_v38 = vsel %vm2803_vm3, %v2796_v21, %v2800_v12  ;;  %v2806_v28 = vsel %vm2803_vm3, %v2800_v12, %v2796_v21  ;;  %v2789_v31 = vsel %vm8030_vm15, %v2779_v3, 0.0  ;;  %v2790_v55 = vsel %vm7200_vm1, %v2780_v60, 0.0 }
 0x39e   :  { %v2823_v34 = vmul.f32 %v2822_v30, %v2804_v38  ;;  %v2824_v29 = vmul.f32 %v2822_v30, %v2806_v28  ;;  %v2793_v27 = vadd.f32 %v2789_v31, %v2738_v10  ;;  %v2794_v12 = vadd.f32 %v2790_v55, %v2739_v23 }
 0x39f   :  { %v2802_v2 = vpop.permute.xlu1 %2801  ;;  %v3221_v60 = vmov 1966171168  }
 0x3a0   :  { %v2809_v51 = vpop.permute.xlu0 %2808  ;;  %v2805_v16 = vsel %vm2803_vm3, %v2798_v58, %v2802_v2  ;;  %v2807_v54 = vsel %vm2803_vm3, %v2802_v2, %v2798_v58 }
 0x3a1   :  { %v2825_v17 = vmul.f32 %v2822_v30, %v2805_v16  ;;  %v2826_v58 = vmul.f32 %v2822_v30, %v2807_v54  ;;  %v2883_v30 = vshrl.u32 %v8033_v32, 7 }
 0x3a3   :  { %v2811_v22 = vpop.permute.xlu1 %2810 }
 0x3a4   :  { %v2813_v6 = vpop.permute.xlu0 %2812 }
 0x3a5   :  { %v2816_v49 = vsel %vm2803_vm3, %v2809_v51, %v2813_v6  ;;  %v2818_v21 = vsel %vm2803_vm3, %v2813_v6, %v2809_v51  ;;  %v2880_v51 = vunpack.c.l.s4 %v3221_v60 }
 0x3a6   :  { %v2828_v20 = vmul.f32 %v2827_v53, %v2816_v49  ;;  %v2829_v47 = vmul.f32 %v2827_v53, %v2818_v21 }
 0x3a7   :  { %v2815_v57 = vpop.permute.xlu1 %2814  ;;  %v2881_v0 = vunpack.c.0.s8 %v2880_v51 }
 0x3a8   :  { %v2817_v39 = vsel %vm2803_vm3, %v2811_v22, %v2815_v57  ;;  %v2819_v13 = vsel %vm2803_vm3, %v2815_v57, %v2811_v22  ;;  %v2832_v8 = vadd.f32 %v2828_v20, %v2823_v34  ;;  %v2833_v33 = vadd.f32 %v2829_v47, %v2824_v29 }
 0x3a9   :  { %v2830_v56 = vmul.f32 %v2827_v53, %v2817_v39  ;;  %v2831_v37 = vmul.f32 %v2827_v53, %v2819_v13  ;;  %v2884_v53 = vsub.s32 %v2881_v0, %v2883_v30 }
 0x3aa   :  { %v2842_v43 = vsel %vm172_vm14, %v2832_v8, 0.0  ;;  %v2843_v1 = vsel %vm7240_vm0, %v2833_v33, 0.0 }
 0x3ab   :  { %v2834_v59 = vadd.f32 %v2830_v56, %v2825_v17  ;;  %v2835_v52 = vadd.f32 %v2831_v37, %v2826_v58  ;;  %v2846_v25 = vadd.f32 %v2842_v43, %v2791_v61  ;;  %v2847_v4 = vadd.f32 %v2843_v1, %v2792_v19 }
 0x3ad   :  { %v2844_v18 = vsel %vm172_vm14, %v2834_v59, 0.0  ;;  %v2845_v63 = vsel %vm7240_vm0, %v2835_v52, 0.0  ;;  %v3031_v24 = vmul.f32 -1.442695, %v2846_v25  ;;  %v3032_v5 = vmul.f32 -1.442695, %v2847_v4 }
 0x3ae   :  { %v2848_v2 = vadd.f32 %v2844_v18, %v2793_v27  ;;  %v2849_v48 = vadd.f32 %v2845_v63, %v2794_v12  ;;  %vm2912_vm14 = vcmp.lt.s32.totalorder %v8033_v32, 256 }
 0x3af   :  { %3091 = vpow2.f32 %v3031_v24 }
 0x3b0   :  { %v3033_v7 = vmul.f32 -1.442695, %v2848_v2  ;;  %v3034_v35 = vmul.f32 -1.442695, %v2849_v48  ;;  %3093 = vpow2.f32 %v3032_v5 }
 0x3b2   :  { %3095 = vpow2.f32 %v3033_v7 }
 0x3b3   :  { %3097 = vpow2.f32 %v3034_v35 }
 0x3b9   :  { %v3092_v40 = vpop.eup %3091 }
 0x3ba   :  { %v3094_v11 = vpop.eup %3093  ;;  %v2862_v46 = vadd.f32 1.0, %v3092_v40 }
 0x3bb   :  { %v2863_v15 = vadd.f32 1.0, %v3094_v11 }
 0x3bc   :  { %v3096_v45 = vpop.eup %3095  ;;  %3099 = vrcp.f32 %v2862_v46 }
 0x3bd   :  { %v3098_v50 = vpop.eup %3097  ;;  %v2864_v26 = vadd.f32 1.0, %v3096_v45  ;;  %3101 = vrcp.f32 %v2863_v15 }
 0x3be   :  { %v2865_v3 = vadd.f32 1.0, %v3098_v50 }
 0x3bf   :  { %3103 = vrcp.f32 %v2864_v26 }
 0x3c0   :  { %3105 = vrcp.f32 %v2865_v3 }
 0x3c6   :  { %v3100_v22 = vpop.eup %3099 }
 0x3c7   :  { %v3102_v14 = vpop.eup %3101 }
 0x3c8   :  { %v2878_v38 = vcombine.low %v3100_v22, %v3102_v14 }
 0x3c9   :  { %v3104_v36 = vpop.eup %3103 }
 0x3ca   :  { %v3106_v28 = vpop.eup %3105  ;;  %v2885_v42 = vrot.slane %v2878_v38, %v2884_v53 }
 0x3cb   :  { %v2893_v44 = vcombine.low %v3104_v36, %v3106_v28 }
 0x3cc   :  { %v2892_v62 = vrot.slane %v2885_v42, %v2884_v53 }
 0x3cd   :  { %v2900_v9 = vrot.slane %v2893_v44, %v2884_v53 }
 0x3ce   :  { %2914 = vst.msk [vmem:[#allocation8] sm:$0x3] %vm2912_vm14, %v2892_v62 }
 0x3cf   :  { %v2907_v31 = vrot.slane %v2900_v9, %v2884_v53 }
 0x3d1   :  { %2915 = vst.msk [vmem:[#allocation8 + $0x2] sm:$0x3] %vm2912_vm14, %v2907_v31 }
 0x3d2   :  { %3152 = shalt.err (!%p3149_p3)
}
 0x3d3   :  { %s3153_s14 = scalar_lea.hbm %s7272_s3, 64 }
 0x3d4   :  { %p3154_p4 = scmp.ne.s32.totalorder %s7272_s3, %s3153_s14  ;;  %p3157_p5 = scmp.lt.u32.totalorder %s3153_s14, %s7272_s3 }
 0x3d6   :  { %p3159_p6 = pnand %p3157_p5, %p3154_p4 }
 0x3d8   :  { %3162 = shalt.err (!%p3159_p6)
}
 0x3d9   :  { %2927 = dma.vmem_to_hbm [thread:$0]  %s2922_s10, 64, %s7272_s3, [#allocation5], %s3183_s12, %s3183_s12, %s3195_s24  }
 0x3da   :  { %3167 = dma.done.wait [#allocation5], 64  }
 0x3db   :  { %3168 = vsyncadd [#allocation5], 4294967232 }
 0x3dc   :  { %2931 = vsyncpa [#allocation4], 1 }
 0x3dd   :  { %2932 = vsyncpa [#allocation5], 1 }
 0x3de   :  { %2933 = vsyncpa [#allocation6], 1 }

</bundles_post_ra>
